<compile_context>
chip_gen: v7x
topology: tpu7x:2x2x1
jax: 0.10.0
libtpu: 0.0.40
codegen_flags: <defaults>
</compile_context>

<pallas_src>
import functools

import jax
import jax.numpy as jnp
import numpy as np
from jax.experimental import pallas as pl
from jax.experimental.pallas import tpu as pltpu

EPS = 1e-5


def _round_up(x, m):
    return (x + m - 1) // m * m


def _vmem_limit_bytes():
    # Leave headroom: ~70% of physical (v7x: 64 MiB -> ~44 MiB, v6e/v5e: 128
    # MiB -> ~89 MiB), capped, falling back to 64 MiB if the query fails.
    try:
        cap = int(pltpu.get_tpu_info().vmem_capacity_bytes)
        return max(32 * 1024 * 1024, min(int(cap * 0.7), 100 * 1024 * 1024))
    except Exception:
        return 64 * 1024 * 1024


VMEM_LIMIT = _vmem_limit_bytes()


# ---------------------------------------------------------------------------
# Kernel 1: 1x1 conv (tiled matmul) + bias + ReLU + fused 2x nearest upsample
#           residual add.  Emits f32 `next` (returned) and bf16 `next` (fed
#           to the 3x3 conv).
# ---------------------------------------------------------------------------
def _fusion_one_kernel(x_ref, w_ref, b_ref, s_ref, d_ref, o32_ref, o16_ref):
    k = pl.program_id(2)
    acc = jnp.dot(x_ref[...], w_ref[...], preferred_element_type=jnp.float32)

    @pl.when(k == 0)
    def _():
        o32_ref[...] = acc

    @pl.when(k > 0)
    def _():
        o32_ref[...] += acc

    @pl.when(k == pl.num_programs(2) - 1)
    def _():
        y = jnp.maximum(o32_ref[...] + b_ref[...], 0.0)
        # Nearest-2x upsample of the (tm/4, tn) `down` block: constant 0/1
        # selection matrix (tm, tm/4) @ down -> (tm, tn).  Exact selection;
        # only bf16 rounding of `down` values is introduced.
        up = jnp.dot(s_ref[...], d_ref[...].astype(jnp.bfloat16),
                     preferred_element_type=jnp.float32)
        y = y + up                      # residual added AFTER the ReLU
        o32_ref[...] = y
        o16_ref[...] = y.astype(jnp.bfloat16)


def _pick_up_row_tile(H, W):
    """Rows per output tile for the 1x1 kernel (tm = th*W)."""
    for th in range(H, 0, -1):
        if H % th or th % 2:
            continue
        if (th * W) % 8 or ((th // 2) * (W // 2)) % 8:
            continue
        if th * W > 2048:
            continue
        return th
    return None


def fusion_one_up(x2d, w1, b1, down_flat, th, W):
    """relu(x2d @ w1 + b1) + upsample2x(down).  Returns (f32, bf16) (M, N)."""
    M, K = x2d.shape
    N = w1.shape[1]
    tm = th * W
    tn = 256 if N % 256 == 0 else 128

    # Pad K to a multiple of 128 (only matters for tiny `inc`).
    Kp = _round_up(max(K, 128), 128)
    if Kp != K:
        x2d = jnp.pad(x2d, ((0, 0), (0, Kp - K)))
        w1 = jnp.pad(w1, ((0, Kp - K), (0, 0)))
    tk = max(t for t in (512, 256, 128) if Kp % t == 0)

    # Constant nearest-2x selection matrix: out row rr*W+w  <-  down row
    # (rr//2)*(W//2) + w//2 (local to the tile; identical for every tile).
    m = np.arange(tm)
    rr, ww = m // W, m % W
    sel = (rr // 2) * (W // 2) + (ww // 2)
    s_np = np.zeros((tm, tm // 4), np.float32)
    s_np[m, sel] = 1.0
    S = jnp.asarray(s_np, jnp.bfloat16)

    grid = (M // tm, N // tn, Kp // tk)
    return pl.pallas_call(
        _fusion_one_kernel,
        out_shape=(jax.ShapeDtypeStruct((M, N), jnp.float32),
                   jax.ShapeDtypeStruct((M, N), jnp.bfloat16)),
        grid_spec=pltpu.PrefetchScalarGridSpec(
            num_scalar_prefetch=0,
            grid=grid,
            in_specs=[
                pl.BlockSpec((tm, tk), lambda i, j, k: (i, k)),
                pl.BlockSpec((tk, tn), lambda i, j, k: (k, j)),
                pl.BlockSpec((1, tn), lambda i, j, k: (0, j)),
                pl.BlockSpec((tm, tm // 4), lambda i, j, k: (0, 0)),
                pl.BlockSpec((tm // 4, tn), lambda i, j, k: (i, j)),
            ],
            out_specs=[pl.BlockSpec((tm, tn), lambda i, j, k: (i, j)),
                       pl.BlockSpec((tm, tn), lambda i, j, k: (i, j))],
        ),
        compiler_params=pltpu.CompilerParams(
            dimension_semantics=("parallel", "parallel", "arbitrary"),
            vmem_limit_bytes=VMEM_LIMIT,
        ),
    )(x2d, w1, b1, S, down_flat)


# ---------------------------------------------------------------------------
# Kernel 2: fused 3x3 conv (stride 1, pad 1) + bias + ReLU.
#   Spatially row-tiled with a 1-row halo; the padded slab is assembled in a
#   VMEM scratch (no HBM pad pass); bf16 input; im2col never touches HBM.
# ---------------------------------------------------------------------------
def _fusion_three_kernel(tH, W, nrt, xc_ref, xt_ref, xb_ref, w_ref, b_ref,
                         o_ref, xpad_ref):
    r = pl.program_id(1)
    c = pl.program_id(2)
    tkc = xc_ref.shape[-1]

    # ---- assemble the zero-padded (tH+2, W+2, tkc) slab in VMEM ----
    zcol = jnp.zeros((tH + 2, 1, tkc), jnp.bfloat16)
    xpad_ref[:, 0:1, :] = zcol
    xpad_ref[:, W + 1:W + 2, :] = zcol
    xpad_ref[1:tH + 1, 1:W + 1, :] = xc_ref[...]

    zrow = jnp.zeros((1, W, tkc), jnp.bfloat16)

    @pl.when(r > 0)
    def _():
        xpad_ref[0:1, 1:W + 1, :] = xt_ref[...]

    @pl.when(r == 0)
    def _():
        xpad_ref[0:1, 1:W + 1, :] = zrow

    @pl.when(r < nrt - 1)
    def _():
        xpad_ref[tH + 1:tH + 2, 1:W + 1, :] = xb_ref[...]

    @pl.when(r == nrt - 1)
    def _():
        xpad_ref[tH + 1:tH + 2, 1:W + 1, :] = zrow

    # ---- 9 taps accumulated into a local value: one o_ref RMW per step ----
    acc = None
    for di in range(3):
        for dj in range(3):
            patch = xpad_ref[di:di + tH, dj:dj + W, :].reshape(tH * W, tkc)
            t = jnp.dot(patch, w_ref[di, dj, :, :],
                        preferred_element_type=jnp.float32)
            acc = t if acc is None else acc + t

    @pl.when(c == 0)
    def _():
        o_ref[...] = acc

    @pl.when(c > 0)
    def _():
        o_ref[...] += acc

    @pl.when(c == pl.num_programs(2) - 1)
    def _():
        o_ref[...] = jnp.maximum(o_ref[...] + b_ref[...], 0.0)


def _pick_row_tile(H, W, Cout, tkc):
    """Largest row tile that fits a conservative per-gen VMEM budget, with a
    preference for >= 2 tiles so the spatial axis can shard across cores."""
    budget = 6 * 1024 * 1024

    def fits(t):
        out_b = t * W * Cout * 4 * 2                      # resident out (dbuf)
        in_b = t * W * tkc * 2 * 2 + (t + 2) * (W + 2) * tkc * 2
        w_b = 9 * tkc * Cout * 2 * 2
        return out_b + in_b + w_b <= budget

    cands = [t for t in range(1, H + 1)
             if H % t == 0 and (t * W) % 8 == 0 and fits(t)]
    if not cands:
        return None
    small = [t for t in cands if t <= max(H // 2, 1)]
    return max(small) if small else max(cands)


def fusion_three(x_bf16, w3, b3, tH):
    """relu(conv3x3(x, pad=1) folded with BN).  x_bf16: (n, H, W, C) bf16."""
    n, H, W, C = x_bf16.shape
    Cout = w3.shape[-1]
    tkc = 256 if C % 256 == 0 else (128 if C % 128 == 0 else C)
    nrt = H // tH

    out = pl.pallas_call(
        functools.partial(_fusion_three_kernel, tH, W, nrt),
        out_shape=jax.ShapeDtypeStruct((n * H * W, Cout), jnp.float32),
        grid_spec=pltpu.PrefetchScalarGridSpec(
            num_scalar_prefetch=0,
            grid=(n, nrt, C // tkc),
            in_specs=[
                # center rows of the tile
                pl.BlockSpec((None, tH, W, tkc),
                             lambda b, r, c: (b, r, 0, c)),
                # 1-row top halo (clamped; masked to zero when r == 0)
                pl.BlockSpec((None, 1, W, tkc),
                             lambda b, r, c: (b, jnp.maximum(r * tH - 1, 0), 0, c)),
                # 1-row bottom halo (clamped; masked to zero when r == nrt-1)
                pl.BlockSpec((None, 1, W, tkc),
                             lambda b, r, c: (b, jnp.minimum((r + 1) * tH, H - 1), 0, c)),
                pl.BlockSpec((3, 3, tkc, Cout), lambda b, r, c: (0, 0, c, 0)),
                pl.BlockSpec((1, Cout), lambda b, r, c: (0, 0)),
            ],
            out_specs=pl.BlockSpec((tH * W, Cout),
                                   lambda b, r, c: (b * nrt + r, 0)),
            scratch_shapes=[pltpu.VMEM((tH + 2, W + 2, tkc), jnp.bfloat16)],
        ),
        compiler_params=pltpu.CompilerParams(
            dimension_semantics=("parallel", "parallel", "arbitrary"),
            vmem_limit_bytes=VMEM_LIMIT,
        ),
    )(x_bf16, x_bf16, x_bf16, w3, b3)
    return out.reshape(n, H, W, Cout)


# ---------------------------------------------------------------------------
# Parameter construction (deterministic, synthetic) and BN folding
# ---------------------------------------------------------------------------
def init_conv_bn(key, cout, cin, kh, kw):
    kw_, kb, kg, kbe, km, kv = jax.random.split(key, 6)
    fan_in = cin * kh * kw
    return dict(
        w=jax.random.normal(kw_, (cout, cin, kh, kw), jnp.float32)
        * (1.0 / np.sqrt(fan_in)),
        b=0.01 * jax.random.normal(kb, (cout,), jnp.float32),
        gamma=1.0 + 0.1 * jax.random.normal(kg, (cout,), jnp.float32),
        beta=0.1 * jax.random.normal(kbe, (cout,), jnp.float32),
        mean=0.1 * jax.random.normal(km, (cout,), jnp.float32),
        var=1.0 + 0.1 * jnp.abs(jax.random.normal(kv, (cout,), jnp.float32)),
    )


def init_fpn_layer(key, inc, ouc=256):
    k1, k3 = jax.random.split(key)
    return dict(fusion_one=init_conv_bn(k1, ouc, inc, 1, 1),
                fusion_three=init_conv_bn(k3, ouc, ouc, 3, 3))


def prepare_fpn_params(raw):
    """Fold BN (inference running stats) + conv bias into scaled weights and a
    single bias; transpose/cast to the kernels' matmul layout once."""
    p1 = raw["fusion_one"]
    s1 = p1["gamma"] * jax.lax.rsqrt(p1["var"] + EPS)
    w1 = (jnp.transpose(p1["w"][:, :, 0, 0], (1, 0)) * s1[None, :]).astype(jnp.bfloat16)
    b1 = ((p1["b"] - p1["mean"]) * s1 + p1["beta"]).reshape(1, -1)

    p3 = raw["fusion_three"]
    s3 = p3["gamma"] * jax.lax.rsqrt(p3["var"] + EPS)
    w3 = (jnp.transpose(p3["w"], (2, 3, 1, 0)) * s3[None, None, None, :]).astype(jnp.bfloat16)
    b3 = ((p3["b"] - p3["mean"]) * s3 + p3["beta"]).reshape(1, -1)
    return dict(w1=w1, b1=b1, w3=w3, b3=b3)


# ---------------------------------------------------------------------------
# FPNLayer forward
# ---------------------------------------------------------------------------
@jax.jit
def fpn_layer_forward(cur_nchw, down_nchw, params):
    cur = jnp.transpose(cur_nchw, (0, 2, 3, 1)).astype(jnp.bfloat16)  # NHWC bf16
    down = jnp.transpose(down_nchw, (0, 2, 3, 1))                     # NHWC f32
    n, H, W, inc = cur.shape
    n2, h2, w2, C = down.shape
    Cout = params["w1"].shape[1]
    assert n2 == n and h2 * 2 == H and w2 * 2 == W and C == Cout

    x2d = cur.reshape(n * H * W, inc)

    # --- next = relu(bn(conv1x1(cur))) + up(down): one fused kernel ---------
    th = _pick_up_row_tile(H, W)
    if th is not None and Cout % 128 == 0:
        down_flat = down.reshape(n * h2 * w2, C)
        nxt_f32, nxt_bf16 = fusion_one_up(x2d, params["w1"], params["b1"],
                                          down_flat, th, W)
    else:
        # TODO(synk): Pallas path for shapes the fused-upsample tiling can't
        # cover; pure-JAX fallback keeps semantics.
        up = jnp.broadcast_to(down[:, :, None, :, None, :],
                              (n, h2, 2, w2, 2, C)).reshape(n * H * W, C)
        y = jnp.maximum(jnp.dot(x2d, params["w1"],
                                preferred_element_type=jnp.float32)
                        + params["b1"], 0.0) + up
        nxt_f32, nxt_bf16 = y, y.astype(jnp.bfloat16)

    nxt_nhwc = nxt_f32.reshape(n, H, W, C)          # returned (f32)
    nxt16_nhwc = nxt_bf16.reshape(n, H, W, C)       # fed to conv3x3 (bf16)

    # --- out = relu(bn(conv3x3(next, pad=1))): one fused kernel -------------
    tkc = 256 if C % 256 == 0 else (128 if C % 128 == 0 else C)
    tH = _pick_row_tile(H, W, Cout, tkc)
    if tH is not None and Cout % 128 == 0:
        out_nhwc = fusion_three(nxt16_nhwc, params["w3"], params["b3"], tH)
    else:
        # TODO(synk): pure-JAX fallback for shapes the row tiling can't cover.
        y = jax.lax.conv_general_dilated(
            nxt16_nhwc.astype(jnp.float32), params["w3"].astype(jnp.float32),
            window_strides=(1, 1), padding=[(1, 1), (1, 1)],
            dimension_numbers=("NHWC", "HWIO", "NHWC"))
        out_nhwc = jnp.maximum(y + params["b3"], 0.0)

    return (jnp.transpose(nxt_nhwc, (0, 3, 1, 2)),   # NHWC -> NCHW
            jnp.transpose(out_nhwc, (0, 3, 1, 2)))


# ---------------------------------------------------------------------------
# Pure-JAX f32 reference (for a sanity check)
# ---------------------------------------------------------------------------
def _ref_conv_bn_relu(x_nhwc, p, pad):
    w = jnp.transpose(p["w"], (2, 3, 1, 0))          # OIHW -> HWIO
    y = jax.lax.conv_general_dilated(
        x_nhwc, w, window_strides=(1, 1), padding=[(pad, pad), (pad, pad)],
        dimension_numbers=("NHWC", "HWIO", "NHWC"),
        precision=jax.lax.Precision.HIGHEST) + p["b"]
    s = p["gamma"] * jax.lax.rsqrt(p["var"] + EPS)
    return jnp.maximum((y - p["mean"]) * s + p["beta"], 0.0)


def reference_forward(cur_nchw, down_nchw, raw):
    cur = jnp.transpose(cur_nchw, (0, 2, 3, 1))
    down = jnp.transpose(down_nchw, (0, 2, 3, 1))
    n, h2, w2, C = down.shape
    up = jnp.broadcast_to(down[:, :, None, :, None, :],
                          (n, h2, 2, w2, 2, C)).reshape(n, 2 * h2, 2 * w2, C)
    nxt = _ref_conv_bn_relu(cur, raw["fusion_one"], pad=0) + up
    out = _ref_conv_bn_relu(nxt, raw["fusion_three"], pad=1)
    return (jnp.transpose(nxt, (0, 3, 1, 2)), jnp.transpose(out, (0, 3, 1, 2)))


# ---------------------------------------------------------------------------
if __name__ == "__main__":
    key = jax.random.PRNGKey(0)
    kparam, kcur, kdown = jax.random.split(key, 3)

    inc = 4
    raw = init_fpn_layer(kparam, inc)
    params = prepare_fpn_params(raw)

    cur = jax.random.normal(kcur, (2, inc, 16, 16), jnp.float32)    # current level
    down = jax.random.normal(kdown, (2, 256, 8, 8), jnp.float32)    # coarser level

    nxt, out = fpn_layer_forward(cur, down, params)
    jax.block_until_ready((nxt, out))

    assert nxt.shape == (2, 256, 16, 16), nxt.shape
    assert out.shape == (2, 256, 16, 16), out.shape
    assert bool(jnp.isfinite(nxt).all()) and bool(jnp.isfinite(out).all())

    # Correctness check vs. a pure-JAX f32 reference (loose tolerance: the
    # Pallas path uses bf16 matmul operands / bf16 intermediate `next` with
    # f32 accumulation).
    r_nxt, r_out = reference_forward(cur, down, raw)
    np.testing.assert_allclose(np.asarray(nxt), np.asarray(r_nxt), atol=0.25, rtol=0.05)
    np.testing.assert_allclose(np.asarray(out), np.asarray(r_out), atol=0.25, rtol=0.05)

    print("KERNEL_OK")
</pallas_src>

<mosaic_0001>
module attributes {stable_mosaic.version = 11 : i64} {
  func.func @_fusion_one_kernel(%arg0: i32, %arg1: i32, %arg2: i32, %arg3: memref<256x128xbf16, #tpu.memory_space<vmem>>, %arg4: memref<128x256xbf16, #tpu.memory_space<vmem>>, %arg5: memref<1x256xf32, #tpu.memory_space<vmem>>, %arg6: memref<256x64xbf16, #tpu.memory_space<vmem>>, %arg7: memref<64x256xf32, #tpu.memory_space<vmem>>, %arg8: memref<256x256xf32, #tpu.memory_space<vmem>>, %arg9: memref<256x256xbf16, #tpu.memory_space<vmem>>) attributes {dimension_semantics = [#tpu.dimension_semantics<parallel>, #tpu.dimension_semantics<parallel>, #tpu.dimension_semantics<arbitrary>], iteration_bounds = array<i64: 2, 1, 1>, scalar_prefetch = 0 : i64, scratch_operands = 0 : i64, tpu.core_type = #tpu.core_type<tc>, window_params = [{transform_indices = @transform_0, window_bounds = array<i64: 256, 128>}, {transform_indices = @transform_1, window_bounds = array<i64: 128, 256>}, {transform_indices = @transform_2, window_bounds = array<i64: 1, 256>}, {pipeline_mode = #tpu.pipeline_mode<synchronous>, transform_indices = @transform_3, window_bounds = array<i64: 256, 64>}, {transform_indices = @transform_4, window_bounds = array<i64: 64, 256>}, {transform_indices = @transform_5, window_bounds = array<i64: 256, 256>}, {transform_indices = @transform_6, window_bounds = array<i64: 256, 256>}]} {
    %c0 = arith.constant 0 : index
    %c0_0 = arith.constant 0 : index
    %0 = vector.load %arg3[%c0, %c0_0] : memref<256x128xbf16, #tpu.memory_space<vmem>>, vector<256x128xbf16>
    %c0_1 = arith.constant 0 : index
    %c0_2 = arith.constant 0 : index
    %1 = vector.load %arg4[%c0_1, %c0_2] : memref<128x256xbf16, #tpu.memory_space<vmem>>, vector<128x256xbf16>
    %cst = arith.constant dense<0.000000e+00> : vector<256x256xf32>
    %2 = tpu.matmul %0, %1, %cst {dimension_numbers = #tpu.dot_dimension_numbers<[1], [0], [0], [1], [0, 0, 1, 1], [], []>} : vector<256x128xbf16>, vector<128x256xbf16>, vector<256x256xf32> -> vector<256x256xf32>
    %c0_i32 = arith.constant 0 : i32
    %3 = arith.cmpi eq, %arg2, %c0_i32 : i32
    %4 = arith.extui %3 : i1 to i32
    %c0_i32_3 = arith.constant 0 : i32
    %5 = arith.cmpi ne, %4, %c0_i32_3 : i32
    scf.if %5 {
      %c0_8 = arith.constant 0 : index
      %c0_9 = arith.constant 0 : index
      %12 = vector.load %arg8[%c0_8, %c0_9] : memref<256x256xf32, #tpu.memory_space<vmem>>, vector<256x256xf32>
      tpu.vector_store %arg8[%c0_8, %c0_9], %2 {strides = array<i32>} : memref<256x256xf32, #tpu.memory_space<vmem>>, vector<256x256xf32>,
    } else {
    }
    %c0_i32_4 = arith.constant 0 : i32
    %6 = arith.cmpi sgt, %arg2, %c0_i32_4 : i32
    %7 = arith.extui %6 : i1 to i32
    %c0_i32_5 = arith.constant 0 : i32
    %8 = arith.cmpi ne, %7, %c0_i32_5 : i32
    scf.if %8 {
      %c0_8 = arith.constant 0 : index
      %c0_9 = arith.constant 0 : index
      %12 = vector.load %arg8[%c0_8, %c0_9] : memref<256x256xf32, #tpu.memory_space<vmem>>, vector<256x256xf32>
      %13 = arith.addf %12, %2 : vector<256x256xf32>
      %c0_10 = arith.constant 0 : index
      %c0_11 = arith.constant 0 : index
      %14 = vector.load %arg8[%c0_10, %c0_11] : memref<256x256xf32, #tpu.memory_space<vmem>>, vector<256x256xf32>
      tpu.vector_store %arg8[%c0_10, %c0_11], %13 {strides = array<i32>} : memref<256x256xf32, #tpu.memory_space<vmem>>, vector<256x256xf32>,
    } else {
    }
    %c0_i32_6 = arith.constant 0 : i32
    %9 = arith.cmpi eq, %arg2, %c0_i32_6 : i32
    %10 = arith.extui %9 : i1 to i32
    %c0_i32_7 = arith.constant 0 : i32
    %11 = arith.cmpi ne, %10, %c0_i32_7 : i32
    scf.if %11 {
      %c0_8 = arith.constant 0 : index
      %c0_9 = arith.constant 0 : index
      %12 = vector.load %arg8[%c0_8, %c0_9] : memref<256x256xf32, #tpu.memory_space<vmem>>, vector<256x256xf32>
      %c0_10 = arith.constant 0 : index
      %c0_11 = arith.constant 0 : index
      %13 = vector.load %arg5[%c0_10, %c0_11] : memref<1x256xf32, #tpu.memory_space<vmem>>, vector<1x256xf32>
      %14 = vector.broadcast %13 : vector<1x256xf32> to vector<256x256xf32>
      %15 = arith.addf %12, %14 : vector<256x256xf32>
      %cst_12 = arith.constant 0.000000e+00 : f32
      %16 = vector.broadcast %cst_12 : f32 to vector<256x256xf32>
      %17 = arith.maximumf %15, %16 : vector<256x256xf32>
      %c0_13 = arith.constant 0 : index
      %c0_14 = arith.constant 0 : index
      %18 = vector.load %arg6[%c0_13, %c0_14] : memref<256x64xbf16, #tpu.memory_space<vmem>>, vector<256x64xbf16>
      %c0_15 = arith.constant 0 : index
      %c0_16 = arith.constant 0 : index
      %19 = vector.load %arg7[%c0_15, %c0_16] : memref<64x256xf32, #tpu.memory_space<vmem>>, vector<64x256xf32>
      %20 = arith.truncf %19 : vector<64x256xf32> to vector<64x256xbf16>
      %cst_17 = arith.constant dense<0.000000e+00> : vector<256x256xf32>
      %21 = tpu.matmul %18, %20, %cst_17 {dimension_numbers = #tpu.dot_dimension_numbers<[1], [0], [0], [1], [0, 0, 1, 1], [], []>} : vector<256x64xbf16>, vector<64x256xbf16>, vector<256x256xf32> -> vector<256x256xf32>
      %22 = arith.addf %17, %21 : vector<256x256xf32>
      %c0_18 = arith.constant 0 : index
      %c0_19 = arith.constant 0 : index
      %23 = vector.load %arg8[%c0_18, %c0_19] : memref<256x256xf32, #tpu.memory_space<vmem>>, vector<256x256xf32>
      tpu.vector_store %arg8[%c0_18, %c0_19], %22 {strides = array<i32>} : memref<256x256xf32, #tpu.memory_space<vmem>>, vector<256x256xf32>,
      %24 = arith.truncf %22 : vector<256x256xf32> to vector<256x256xbf16>
      %c0_20 = arith.constant 0 : index
      %c0_21 = arith.constant 0 : index
      %25 = vector.load %arg9[%c0_20, %c0_21] : memref<256x256xbf16, #tpu.memory_space<vmem>>, vector<256x256xbf16>
      tpu.vector_store %arg9[%c0_20, %c0_21], %24 {strides = array<i32>} : memref<256x256xbf16, #tpu.memory_space<vmem>>, vector<256x256xbf16>,
    } else {
    }
    return
  }
  func.func @transform_0(%arg0: i32, %arg1: i32, %arg2: i32) -> (i32, i32) {
    %c0_i32 = arith.constant 0 : i32
    return %arg0, %arg2 : i32, i32
  }
  func.func @transform_1(%arg0: i32, %arg1: i32, %arg2: i32) -> (i32, i32) {
    %c0_i32 = arith.constant 0 : i32
    return %arg2, %arg1 : i32, i32
  }
  func.func @transform_2(%arg0: i32, %arg1: i32, %arg2: i32) -> (i32, i32) {
    %c0_i32 = arith.constant 0 : i32
    %c0_i32_0 = arith.constant 0 : i32
    return %c0_i32, %arg1 : i32, i32
  }
  func.func @transform_3(%arg0: i32, %arg1: i32, %arg2: i32) -> (i32, i32) {
    %c0_i32 = arith.constant 0 : i32
    %c0_i32_0 = arith.constant 0 : i32
    %c0_i32_1 = arith.constant 0 : i32
    return %c0_i32, %c0_i32_0 : i32, i32
  }
  func.func @transform_4(%arg0: i32, %arg1: i32, %arg2: i32) -> (i32, i32) {
    %c0_i32 = arith.constant 0 : i32
    return %arg0, %arg1 : i32, i32
  }
  func.func @transform_5(%arg0: i32, %arg1: i32, %arg2: i32) -> (i32, i32) {
    %c0_i32 = arith.constant 0 : i32
    return %arg0, %arg1 : i32, i32
  }
  func.func @transform_6(%arg0: i32, %arg1: i32, %arg2: i32) -> (i32, i32) {
    %c0_i32 = arith.constant 0 : i32
    return %arg0, %arg1 : i32, i32
  }
}

module attributes {stable_mosaic.version = 11 : i64} {
  func.func @_fusion_three_kernel(%arg0: i32, %arg1: i32, %arg2: i32, %arg3: memref<1x8x16x256xbf16, #tpu.memory_space<vmem>>, %arg4: memref<1x1x16x256xbf16, #tpu.memory_space<vmem>>, %arg5: memref<1x1x16x256xbf16, #tpu.memory_space<vmem>>, %arg6: memref<3x3x256x256xbf16, #tpu.memory_space<vmem>>, %arg7: memref<1x256xf32, #tpu.memory_space<vmem>>, %arg8: memref<128x256xf32, #tpu.memory_space<vmem>>, %arg9: memref<10x18x256xbf16, #tpu.memory_space<vmem>>) attributes {dimension_semantics = [#tpu.dimension_semantics<parallel>, #tpu.dimension_semantics<parallel>, #tpu.dimension_semantics<arbitrary>], iteration_bounds = array<i64: 2, 2, 1>, scalar_prefetch = 0 : i64, scratch_operands = 1 : i64, tpu.core_type = #tpu.core_type<tc>, window_params = [{transform_indices = @transform_0, window_bounds = array<i64: 1, 8, 16, 256>}, {transform_indices = @transform_1, window_bounds = array<i64: 1, 1, 16, 256>}, {transform_indices = @transform_2, window_bounds = array<i64: 1, 1, 16, 256>}, {transform_indices = @transform_3, window_bounds = array<i64: 3, 3, 256, 256>}, {pipeline_mode = #tpu.pipeline_mode<synchronous>, transform_indices = @transform_4, window_bounds = array<i64: 1, 256>}, {transform_indices = @transform_5, window_bounds = array<i64: 128, 256>}]} {
    %cst = arith.constant 0.000000e+00 : bf16
    %0 = vector.broadcast %cst : bf16 to vector<10x1x256xbf16>
    %c0 = arith.constant 0 : index
    %c0_0 = arith.constant 0 : index
    %c0_1 = arith.constant 0 : index
    %1 = vector.load %arg9[%c0, %c0_0, %c0_1] : memref<10x18x256xbf16, #tpu.memory_space<vmem>>, vector<10x1x256xbf16>
    tpu.vector_store %arg9[%c0, %c0_0, %c0_1], %0 {strides = array<i32>} : memref<10x18x256xbf16, #tpu.memory_space<vmem>>, vector<10x1x256xbf16>,
    %c0_2 = arith.constant 0 : index
    %c17 = arith.constant 17 : index
    %c0_3 = arith.constant 0 : index
    %2 = vector.load %arg9[%c0_2, %c17, %c0_3] : memref<10x18x256xbf16, #tpu.memory_space<vmem>>, vector<10x1x256xbf16>
    tpu.vector_store %arg9[%c0_2, %c17, %c0_3], %0 {strides = array<i32>} : memref<10x18x256xbf16, #tpu.memory_space<vmem>>, vector<10x1x256xbf16>,
    %c0_4 = arith.constant 0 : index
    %c0_5 = arith.constant 0 : index
    %c0_6 = arith.constant 0 : index
    %c0_7 = arith.constant 0 : index
    %3 = vector.load %arg3[%c0_4, %c0_5, %c0_6, %c0_7] : memref<1x8x16x256xbf16, #tpu.memory_space<vmem>>, vector<1x8x16x256xbf16>
    %4 = vector.shape_cast %3 : vector<1x8x16x256xbf16> to vector<8x16x256xbf16>
    %c1 = arith.constant 1 : index
    %c1_8 = arith.constant 1 : index
    %c0_9 = arith.constant 0 : index
    %5 = vector.load %arg9[%c1, %c1_8, %c0_9] : memref<10x18x256xbf16, #tpu.memory_space<vmem>>, vector<8x16x256xbf16>
    tpu.vector_store %arg9[%c1, %c1_8, %c0_9], %4 {strides = array<i32>} : memref<10x18x256xbf16, #tpu.memory_space<vmem>>, vector<8x16x256xbf16>,
    %cst_10 = arith.constant 0.000000e+00 : bf16
    %6 = vector.broadcast %cst_10 : bf16 to vector<1x16x256xbf16>
    %c0_i32 = arith.constant 0 : i32
    %7 = arith.cmpi sgt, %arg1, %c0_i32 : i32
    %8 = arith.extui %7 : i1 to i32
    %c0_i32_11 = arith.constant 0 : i32
    %9 = arith.cmpi ne, %8, %c0_i32_11 : i32
    scf.if %9 {
      %c0_94 = arith.constant 0 : index
      %c0_95 = arith.constant 0 : index
      %c0_96 = arith.constant 0 : index
      %c0_97 = arith.constant 0 : index
      %81 = vector.load %arg4[%c0_94, %c0_95, %c0_96, %c0_97] : memref<1x1x16x256xbf16, #tpu.memory_space<vmem>>, vector<1x1x16x256xbf16>
      %82 = vector.shape_cast %81 : vector<1x1x16x256xbf16> to vector<1x16x256xbf16>
      %c0_98 = arith.constant 0 : index
      %c1_99 = arith.constant 1 : index
      %c0_100 = arith.constant 0 : index
      %83 = vector.load %arg9[%c0_98, %c1_99, %c0_100] : memref<10x18x256xbf16, #tpu.memory_space<vmem>>, vector<1x16x256xbf16>
      tpu.vector_store %arg9[%c0_98, %c1_99, %c0_100], %82 {strides = array<i32>} : memref<10x18x256xbf16, #tpu.memory_space<vmem>>, vector<1x16x256xbf16>,
    } else {
    }
    %c0_i32_12 = arith.constant 0 : i32
    %10 = arith.cmpi eq, %arg1, %c0_i32_12 : i32
    %11 = arith.extui %10 : i1 to i32
    %c0_i32_13 = arith.constant 0 : i32
    %12 = arith.cmpi ne, %11, %c0_i32_13 : i32
    scf.if %12 {
      %c0_94 = arith.constant 0 : index
      %c1_95 = arith.constant 1 : index
      %c0_96 = arith.constant 0 : index
      %81 = vector.load %arg9[%c0_94, %c1_95, %c0_96] : memref<10x18x256xbf16, #tpu.memory_space<vmem>>, vector<1x16x256xbf16>
      tpu.vector_store %arg9[%c0_94, %c1_95, %c0_96], %6 {strides = array<i32>} : memref<10x18x256xbf16, #tpu.memory_space<vmem>>, vector<1x16x256xbf16>,
    } else {
    }
    %c1_i32 = arith.constant 1 : i32
    %13 = arith.cmpi slt, %arg1, %c1_i32 : i32
    %14 = arith.extui %13 : i1 to i32
    %c0_i32_14 = arith.constant 0 : i32
    %15 = arith.cmpi ne, %14, %c0_i32_14 : i32
    scf.if %15 {
      %c0_94 = arith.constant 0 : index
      %c0_95 = arith.constant 0 : index
      %c0_96 = arith.constant 0 : index
      %c0_97 = arith.constant 0 : index
      %81 = vector.load %arg5[%c0_94, %c0_95, %c0_96, %c0_97] : memref<1x1x16x256xbf16, #tpu.memory_space<vmem>>, vector<1x1x16x256xbf16>
      %82 = vector.shape_cast %81 : vector<1x1x16x256xbf16> to vector<1x16x256xbf16>
      %c9 = arith.constant 9 : index
      %c1_98 = arith.constant 1 : index
      %c0_99 = arith.constant 0 : index
      %83 = vector.load %arg9[%c9, %c1_98, %c0_99] : memref<10x18x256xbf16, #tpu.memory_space<vmem>>, vector<1x16x256xbf16>
      tpu.vector_store %arg9[%c9, %c1_98, %c0_99], %82 {strides = array<i32>} : memref<10x18x256xbf16, #tpu.memory_space<vmem>>, vector<1x16x256xbf16>,
    } else {
    }
    %c1_i32_15 = arith.constant 1 : i32
    %16 = arith.cmpi eq, %arg1, %c1_i32_15 : i32
    %17 = arith.extui %16 : i1 to i32
    %c0_i32_16 = arith.constant 0 : i32
    %18 = arith.cmpi ne, %17, %c0_i32_16 : i32
    scf.if %18 {
      %c9 = arith.constant 9 : index
      %c1_94 = arith.constant 1 : index
      %c0_95 = arith.constant 0 : index
      %81 = vector.load %arg9[%c9, %c1_94, %c0_95] : memref<10x18x256xbf16, #tpu.memory_space<vmem>>, vector<1x16x256xbf16>
      tpu.vector_store %arg9[%c9, %c1_94, %c0_95], %6 {strides = array<i32>} : memref<10x18x256xbf16, #tpu.memory_space<vmem>>, vector<1x16x256xbf16>,
    } else {
    }
    %c0_17 = arith.constant 0 : index
    %c0_18 = arith.constant 0 : index
    %c0_19 = arith.constant 0 : index
    %19 = vector.load %arg9[%c0_17, %c0_18, %c0_19] : memref<10x18x256xbf16, #tpu.memory_space<vmem>>, vector<8x16x256xbf16>
    %20 = vector.shape_cast %19 : vector<8x16x256xbf16> to vector<128x256xbf16>
    %c0_20 = arith.constant 0 : index
    %c0_21 = arith.constant 0 : index
    %c0_22 = arith.constant 0 : index
    %c0_23 = arith.constant 0 : index
    %21 = vector.load %arg6[%c0_20, %c0_21, %c0_22, %c0_23] : memref<3x3x256x256xbf16, #tpu.memory_space<vmem>>, vector<1x1x256x256xbf16>
    %22 = vector.shape_cast %21 : vector<1x1x256x256xbf16> to vector<256x256xbf16>
    %cst_24 = arith.constant dense<0.000000e+00> : vector<128x256xf32>
    %23 = tpu.matmul %20, %22, %cst_24 {dimension_numbers = #tpu.dot_dimension_numbers<[1], [0], [0], [1], [0, 0, 1, 1], [], []>} : vector<128x256xbf16>, vector<256x256xbf16>, vector<128x256xf32> -> vector<128x256xf32>
    %c0_25 = arith.constant 0 : index
    %c1_26 = arith.constant 1 : index
    %c0_27 = arith.constant 0 : index
    %24 = vector.load %arg9[%c0_25, %c1_26, %c0_27] : memref<10x18x256xbf16, #tpu.memory_space<vmem>>, vector<8x16x256xbf16>
    %25 = vector.shape_cast %24 : vector<8x16x256xbf16> to vector<128x256xbf16>
    %c0_28 = arith.constant 0 : index
    %c1_29 = arith.constant 1 : index
    %c0_30 = arith.constant 0 : index
    %c0_31 = arith.constant 0 : index
    %26 = vector.load %arg6[%c0_28, %c1_29, %c0_30, %c0_31] : memref<3x3x256x256xbf16, #tpu.memory_space<vmem>>, vector<1x1x256x256xbf16>
    %27 = vector.shape_cast %26 : vector<1x1x256x256xbf16> to vector<256x256xbf16>
    %cst_32 = arith.constant dense<0.000000e+00> : vector<128x256xf32>
    %28 = tpu.matmul %25, %27, %cst_32 {dimension_numbers = #tpu.dot_dimension_numbers<[1], [0], [0], [1], [0, 0, 1, 1], [], []>} : vector<128x256xbf16>, vector<256x256xbf16>, vector<128x256xf32> -> vector<128x256xf32>
    %29 = arith.addf %23, %28 : vector<128x256xf32>
    %c0_33 = arith.constant 0 : index
    %c2 = arith.constant 2 : index
    %c0_34 = arith.constant 0 : index
    %30 = vector.load %arg9[%c0_33, %c2, %c0_34] : memref<10x18x256xbf16, #tpu.memory_space<vmem>>, vector<8x16x256xbf16>
    %31 = vector.shape_cast %30 : vector<8x16x256xbf16> to vector<128x256xbf16>
    %c0_35 = arith.constant 0 : index
    %c2_36 = arith.constant 2 : index
    %c0_37 = arith.constant 0 : index
    %c0_38 = arith.constant 0 : index
    %32 = vector.load %arg6[%c0_35, %c2_36, %c0_37, %c0_38] : memref<3x3x256x256xbf16, #tpu.memory_space<vmem>>, vector<1x1x256x256xbf16>
    %33 = vector.shape_cast %32 : vector<1x1x256x256xbf16> to vector<256x256xbf16>
    %cst_39 = arith.constant dense<0.000000e+00> : vector<128x256xf32>
    %34 = tpu.matmul %31, %33, %cst_39 {dimension_numbers = #tpu.dot_dimension_numbers<[1], [0], [0], [1], [0, 0, 1, 1], [], []>} : vector<128x256xbf16>, vector<256x256xbf16>, vector<128x256xf32> -> vector<128x256xf32>
    %35 = arith.addf %29, %34 : vector<128x256xf32>
    %c1_40 = arith.constant 1 : index
    %c0_41 = arith.constant 0 : index
    %c0_42 = arith.constant 0 : index
    %36 = vector.load %arg9[%c1_40, %c0_41, %c0_42] : memref<10x18x256xbf16, #tpu.memory_space<vmem>>, vector<8x16x256xbf16>
    %37 = vector.shape_cast %36 : vector<8x16x256xbf16> to vector<128x256xbf16>
    %c1_43 = arith.constant 1 : index
    %c0_44 = arith.constant 0 : index
    %c0_45 = arith.constant 0 : index
    %c0_46 = arith.constant 0 : index
    %38 = vector.load %arg6[%c1_43, %c0_44, %c0_45, %c0_46] : memref<3x3x256x256xbf16, #tpu.memory_space<vmem>>, vector<1x1x256x256xbf16>
    %39 = vector.shape_cast %38 : vector<1x1x256x256xbf16> to vector<256x256xbf16>
    %cst_47 = arith.constant dense<0.000000e+00> : vector<128x256xf32>
    %40 = tpu.matmul %37, %39, %cst_47 {dimension_numbers = #tpu.dot_dimension_numbers<[1], [0], [0], [1], [0, 0, 1, 1], [], []>} : vector<128x256xbf16>, vector<256x256xbf16>, vector<128x256xf32> -> vector<128x256xf32>
    %41 = arith.addf %35, %40 : vector<128x256xf32>
    %c1_48 = arith.constant 1 : index
    %c1_49 = arith.constant 1 : index
    %c0_50 = arith.constant 0 : index
    %42 = vector.load %arg9[%c1_48, %c1_49, %c0_50] : memref<10x18x256xbf16, #tpu.memory_space<vmem>>, vector<8x16x256xbf16>
    %43 = vector.shape_cast %42 : vector<8x16x256xbf16> to vector<128x256xbf16>
    %c1_51 = arith.constant 1 : index
    %c1_52 = arith.constant 1 : index
    %c0_53 = arith.constant 0 : index
    %c0_54 = arith.constant 0 : index
    %44 = vector.load %arg6[%c1_51, %c1_52, %c0_53, %c0_54] : memref<3x3x256x256xbf16, #tpu.memory_space<vmem>>, vector<1x1x256x256xbf16>
    %45 = vector.shape_cast %44 : vector<1x1x256x256xbf16> to vector<256x256xbf16>
    %cst_55 = arith.constant dense<0.000000e+00> : vector<128x256xf32>
    %46 = tpu.matmul %43, %45, %cst_55 {dimension_numbers = #tpu.dot_dimension_numbers<[1], [0], [0], [1], [0, 0, 1, 1], [], []>} : vector<128x256xbf16>, vector<256x256xbf16>, vector<128x256xf32> -> vector<128x256xf32>
    %47 = arith.addf %41, %46 : vector<128x256xf32>
    %c1_56 = arith.constant 1 : index
    %c2_57 = arith.constant 2 : index
    %c0_58 = arith.constant 0 : index
    %48 = vector.load %arg9[%c1_56, %c2_57, %c0_58] : memref<10x18x256xbf16, #tpu.memory_space<vmem>>, vector<8x16x256xbf16>
    %49 = vector.shape_cast %48 : vector<8x16x256xbf16> to vector<128x256xbf16>
    %c1_59 = arith.constant 1 : index
    %c2_60 = arith.constant 2 : index
    %c0_61 = arith.constant 0 : index
    %c0_62 = arith.constant 0 : index
    %50 = vector.load %arg6[%c1_59, %c2_60, %c0_61, %c0_62] : memref<3x3x256x256xbf16, #tpu.memory_space<vmem>>, vector<1x1x256x256xbf16>
    %51 = vector.shape_cast %50 : vector<1x1x256x256xbf16> to vector<256x256xbf16>
    %cst_63 = arith.constant dense<0.000000e+00> : vector<128x256xf32>
    %52 = tpu.matmul %49, %51, %cst_63 {dimension_numbers = #tpu.dot_dimension_numbers<[1], [0], [0], [1], [0, 0, 1, 1], [], []>} : vector<128x256xbf16>, vector<256x256xbf16>, vector<128x256xf32> -> vector<128x256xf32>
    %53 = arith.addf %47, %52 : vector<128x256xf32>
    %c2_64 = arith.constant 2 : index
    %c0_65 = arith.constant 0 : index
    %c0_66 = arith.constant 0 : index
    %54 = vector.load %arg9[%c2_64, %c0_65, %c0_66] : memref<10x18x256xbf16, #tpu.memory_space<vmem>>, vector<8x16x256xbf16>
    %55 = vector.shape_cast %54 : vector<8x16x256xbf16> to vector<128x256xbf16>
    %c2_67 = arith.constant 2 : index
    %c0_68 = arith.constant 0 : index
    %c0_69 = arith.constant 0 : index
    %c0_70 = arith.constant 0 : index
    %56 = vector.load %arg6[%c2_67, %c0_68, %c0_69, %c0_70] : memref<3x3x256x256xbf16, #tpu.memory_space<vmem>>, vector<1x1x256x256xbf16>
    %57 = vector.shape_cast %56 : vector<1x1x256x256xbf16> to vector<256x256xbf16>
    %cst_71 = arith.constant dense<0.000000e+00> : vector<128x256xf32>
    %58 = tpu.matmul %55, %57, %cst_71 {dimension_numbers = #tpu.dot_dimension_numbers<[1], [0], [0], [1], [0, 0, 1, 1], [], []>} : vector<128x256xbf16>, vector<256x256xbf16>, vector<128x256xf32> -> vector<128x256xf32>
    %59 = arith.addf %53, %58 : vector<128x256xf32>
    %c2_72 = arith.constant 2 : index
    %c1_73 = arith.constant 1 : index
    %c0_74 = arith.constant 0 : index
    %60 = vector.load %arg9[%c2_72, %c1_73, %c0_74] : memref<10x18x256xbf16, #tpu.memory_space<vmem>>, vector<8x16x256xbf16>
    %61 = vector.shape_cast %60 : vector<8x16x256xbf16> to vector<128x256xbf16>
    %c2_75 = arith.constant 2 : index
    %c1_76 = arith.constant 1 : index
    %c0_77 = arith.constant 0 : index
    %c0_78 = arith.constant 0 : index
    %62 = vector.load %arg6[%c2_75, %c1_76, %c0_77, %c0_78] : memref<3x3x256x256xbf16, #tpu.memory_space<vmem>>, vector<1x1x256x256xbf16>
    %63 = vector.shape_cast %62 : vector<1x1x256x256xbf16> to vector<256x256xbf16>
    %cst_79 = arith.constant dense<0.000000e+00> : vector<128x256xf32>
    %64 = tpu.matmul %61, %63, %cst_79 {dimension_numbers = #tpu.dot_dimension_numbers<[1], [0], [0], [1], [0, 0, 1, 1], [], []>} : vector<128x256xbf16>, vector<256x256xbf16>, vector<128x256xf32> -> vector<128x256xf32>
    %65 = arith.addf %59, %64 : vector<128x256xf32>
    %c2_80 = arith.constant 2 : index
    %c2_81 = arith.constant 2 : index
    %c0_82 = arith.constant 0 : index
    %66 = vector.load %arg9[%c2_80, %c2_81, %c0_82] : memref<10x18x256xbf16, #tpu.memory_space<vmem>>, vector<8x16x256xbf16>
    %67 = vector.shape_cast %66 : vector<8x16x256xbf16> to vector<128x256xbf16>
    %c2_83 = arith.constant 2 : index
    %c2_84 = arith.constant 2 : index
    %c0_85 = arith.constant 0 : index
    %c0_86 = arith.constant 0 : index
    %68 = vector.load %arg6[%c2_83, %c2_84, %c0_85, %c0_86] : memref<3x3x256x256xbf16, #tpu.memory_space<vmem>>, vector<1x1x256x256xbf16>
    %69 = vector.shape_cast %68 : vector<1x1x256x256xbf16> to vector<256x256xbf16>
    %cst_87 = arith.constant dense<0.000000e+00> : vector<128x256xf32>
    %70 = tpu.matmul %67, %69, %cst_87 {dimension_numbers = #tpu.dot_dimension_numbers<[1], [0], [0], [1], [0, 0, 1, 1], [], []>} : vector<128x256xbf16>, vector<256x256xbf16>, vector<128x256xf32> -> vector<128x256xf32>
    %71 = arith.addf %65, %70 : vector<128x256xf32>
    %c0_i32_88 = arith.constant 0 : i32
    %72 = arith.cmpi eq, %arg2, %c0_i32_88 : i32
    %73 = arith.extui %72 : i1 to i32
    %c0_i32_89 = arith.constant 0 : i32
    %74 = arith.cmpi ne, %73, %c0_i32_89 : i32
    scf.if %74 {
      %c0_94 = arith.constant 0 : index
      %c0_95 = arith.constant 0 : index
      %81 = vector.load %arg8[%c0_94, %c0_95] : memref<128x256xf32, #tpu.memory_space<vmem>>, vector<128x256xf32>
      tpu.vector_store %arg8[%c0_94, %c0_95], %71 {strides = array<i32>} : memref<128x256xf32, #tpu.memory_space<vmem>>, vector<128x256xf32>,
    } else {
    }
    %c0_i32_90 = arith.constant 0 : i32
    %75 = arith.cmpi sgt, %arg2, %c0_i32_90 : i32
    %76 = arith.extui %75 : i1 to i32
    %c0_i32_91 = arith.constant 0 : i32
    %77 = arith.cmpi ne, %76, %c0_i32_91 : i32
    scf.if %77 {
      %c0_94 = arith.constant 0 : index
      %c0_95 = arith.constant 0 : index
      %81 = vector.load %arg8[%c0_94, %c0_95] : memref<128x256xf32, #tpu.memory_space<vmem>>, vector<128x256xf32>
      %82 = arith.addf %81, %71 : vector<128x256xf32>
      %c0_96 = arith.constant 0 : index
      %c0_97 = arith.constant 0 : index
      %83 = vector.load %arg8[%c0_96, %c0_97] : memref<128x256xf32, #tpu.memory_space<vmem>>, vector<128x256xf32>
      tpu.vector_store %arg8[%c0_96, %c0_97], %82 {strides = array<i32>} : memref<128x256xf32, #tpu.memory_space<vmem>>, vector<128x256xf32>,
    } else {
    }
    %c0_i32_92 = arith.constant 0 : i32
    %78 = arith.cmpi eq, %arg2, %c0_i32_92 : i32
    %79 = arith.extui %78 : i1 to i32
    %c0_i32_93 = arith.constant 0 : i32
    %80 = arith.cmpi ne, %79, %c0_i32_93 : i32
    scf.if %80 {
      %c0_94 = arith.constant 0 : index
      %c0_95 = arith.constant 0 : index
      %81 = vector.load %arg8[%c0_94, %c0_95] : memref<128x256xf32, #tpu.memory_space<vmem>>, vector<128x256xf32>
      %c0_96 = arith.constant 0 : index
      %c0_97 = arith.constant 0 : index
      %82 = vector.load %arg7[%c0_96, %c0_97] : memref<1x256xf32, #tpu.memory_space<vmem>>, vector<1x256xf32>
      %83 = vector.broadcast %82 : vector<1x256xf32> to vector<128x256xf32>
      %84 = arith.addf %81, %83 : vector<128x256xf32>
      %cst_98 = arith.constant 0.000000e+00 : f32
      %85 = vector.broadcast %cst_98 : f32 to vector<128x256xf32>
      %86 = arith.maximumf %84, %85 : vector<128x256xf32>
      %c0_99 = arith.constant 0 : index
      %c0_100 = arith.constant 0 : index
      %87 = vector.load %arg8[%c0_99, %c0_100] : memref<128x256xf32, #tpu.memory_space<vmem>>, vector<128x256xf32>
      tpu.vector_store %arg8[%c0_99, %c0_100], %86 {strides = array<i32>} : memref<128x256xf32, #tpu.memory_space<vmem>>, vector<128x256xf32>,
    } else {
    }
    return
  }
  func.func @transform_0(%arg0: i32, %arg1: i32, %arg2: i32) -> (i32, i32, i32, i32) {
    %c0_i32 = arith.constant 0 : i32
    %c0_i32_0 = arith.constant 0 : i32
    return %arg0, %arg1, %c0_i32, %arg2 : i32, i32, i32, i32
  }
  func.func @transform_1(%arg0: i32, %arg1: i32, %arg2: i32) -> (i32, i32, i32, i32) {
    %c8_i32 = arith.constant 8 : i32
    %0 = arith.muli %arg1, %c8_i32 : i32
    %c1_i32 = arith.constant 1 : i32
    %1 = arith.subi %0, %c1_i32 : i32
    %c0_i32 = arith.constant 0 : i32
    %2 = arith.maxsi %1, %c0_i32 : i32
    %c0_i32_0 = arith.constant 0 : i32
    %c0_i32_1 = arith.constant 0 : i32
    return %arg0, %2, %c0_i32_0, %arg2 : i32, i32, i32, i32
  }
  func.func @transform_2(%arg0: i32, %arg1: i32, %arg2: i32) -> (i32, i32, i32, i32) {
    %c1_i32 = arith.constant 1 : i32
    %0 = arith.addi %arg1, %c1_i32 : i32
    %c8_i32 = arith.constant 8 : i32
    %1 = arith.muli %0, %c8_i32 : i32
    %c15_i32 = arith.constant 15 : i32
    %2 = arith.minsi %1, %c15_i32 : i32
    %c0_i32 = arith.constant 0 : i32
    %c0_i32_0 = arith.constant 0 : i32
    return %arg0, %2, %c0_i32, %arg2 : i32, i32, i32, i32
  }
  func.func @transform_3(%arg0: i32, %arg1: i32, %arg2: i32) -> (i32, i32, i32, i32) {
    %c0_i32 = arith.constant 0 : i32
    %c0_i32_0 = arith.constant 0 : i32
    %c0_i32_1 = arith.constant 0 : i32
    %c0_i32_2 = arith.constant 0 : i32
    return %c0_i32, %c0_i32_0, %arg2, %c0_i32_1 : i32, i32, i32, i32
  }
  func.func @transform_4(%arg0: i32, %arg1: i32, %arg2: i32) -> (i32, i32) {
    %c0_i32 = arith.constant 0 : i32
    %c0_i32_0 = arith.constant 0 : i32
    %c0_i32_1 = arith.constant 0 : i32
    return %c0_i32, %c0_i32_0 : i32, i32
  }
  func.func @transform_5(%arg0: i32, %arg1: i32, %arg2: i32) -> (i32, i32) {
    %c2_i32 = arith.constant 2 : i32
    %0 = arith.muli %arg0, %c2_i32 : i32
    %1 = arith.addi %0, %arg1 : i32
    %c0_i32 = arith.constant 0 : i32
    %c0_i32_0 = arith.constant 0 : i32
    return %1, %c0_i32 : i32, i32
  }
}

</mosaic_0001>

<bundles_post_ra>
// kernel: fpn_layer_forward.2
= control target key start
LH: loop header
LB: loop body
LE: loop exit
PB: predicated region body
PF: predicated region fallthrough
CT: control target
= control target key end

     0   :  { %s3524_s0 = inlined_call_operand.hbm [shape: bf16[512,128], index: 0, kind: input, shape index: {}]   ;;  %s3525_s1 = inlined_call_operand.hbm [shape: bf16[128,256], index: 1, kind: input, shape index: {}]   ;;  %s3526_s2 = inlined_call_operand.hbm [shape: f32[1,256], index: 2, kind: input, shape index: {}]   ;;  %s3527_s3 = inlined_call_operand.hbm [shape: bf16[256,64], index: 3, kind: input, shape index: {}]   ;;  %s3528_s4 = inlined_call_operand.hbm [shape: f32[128,256], index: 4, kind: input, shape index: {}]   ;;  %s3529_s5 = inlined_call_operand.hbm [shape: f32[512,256], index: 5, kind: output, shape index: {0}]   ;;  %s3530_s6 = inlined_call_operand.hbm [shape: bf16[512,256], index: 6, kind: output, shape index: {1}]  }
   0x1   :  { %3547 = sst [smem:[#allocation27_spill]] %s3524_s0 }
   0x2   :  { %3548 = sst [smem:[#allocation28_spill]] %s3525_s1 }
   0x3   :  { %12 = vsyncpa [#allocation3], 0 }
   0x4   :  { %14 = vsyncpa [#allocation3 + $0x1], 0 }
   0x5   :  { %15 = vsyncpa [#allocation6], 0 }
   0x6   :  { %16 = vsyncpa [#allocation9], 0 }
   0x7   :  { %17 = vsyncpa [#allocation4], 0 }
   0x8   :  { %19 = vsyncpa [#allocation4 + $0x1], 0 }
   0x9   :  { %20 = vsyncpa [#allocation13], 0 }
   0xa   :  { %22 = vsyncpa [#allocation13 + $0x1], 0  ;;  %s2927_s21 = smov 0   ;;  %s2929_s22 = smov 0  }
   0xb   :  { %s2931_s23 = smov 0   ;;  %s2933_s24 = smov 0  }
   0xc   :  { %s2935_s25 = smov 0   ;;  %s2937_s26 = smov 0  }
   0xd LB: > { %3549 = sst [smem:[#allocation20_spill]] %s2852_s21  ;;  %s2958_s27 = sadd.s32 4294967295, %s2872_s26   ;;  %s2872_s26 = sphi %s2937_s26, %s28_s26   ;;  %s2868_s25 = sphi %s2935_s25, %s3586_s25   ;;  %s2864_s24 = sphi %s2933_s24, %s3585_s24   ;;  %s2860_s23 = sphi %s2931_s23, %s3584_s23   ;;  %s2856_s22 = sphi %s2929_s22, %s3588_s22   ;;  %s2852_s21 = sphi %s2927_s21, %s3587_s21  }
   0xe   : > { %3550 = sst [smem:[#allocation21_spill]] %s2860_s23  ;;  %s2266_s28 = sadd.s32 4294967294, %s2872_s26  }
   0xf   : > { %3551 = sst [smem:[#allocation22_spill]] %s2868_s25  ;;  %p69_p0 = scmp.ne.s32.totalorder %s2856_s22, %s2852_s21 }
  0x10   : > { %3552 = sst [smem:[#allocation23_spill]] %s2872_s26  ;;  %p3531_p1 = scmp.eq.s32.totalorder %s2958_s27, 0 }
  0x11   : > { %p204_p3 = scmp.eq.s32.totalorder %s2266_s28, 1  ;;  %p2267_p5 = scmp.ge.s32.totalorder %s2872_s26, 1 }
  0x12   : > { %p2967_p4 = por %p3531_p1, %p69_p0  ;;  %p239_p7 = scmp.lt.s32.totalorder %s2872_s26, 3 }
  0x13   : > { %p2972_p6 = por %p204_p3, %p69_p0  ;;  %s2874_s8 = smov [#allocation5]  }
  0x14   : > { %s3553_s29 = scalar_select %p2967_p4, 1, 0 }
  0x15   : > { %s3554_s30 = scalar_select %p2972_p6, 1, 0 }
  0x16   : > { %p2977_p8 = pnand %p2267_p5, %p239_p7  ;;  %s257_s9 = sshll.u32 %s2874_s8, 4  ;;  %s258_s9 = int_to_ptr.vmem [resolvable:$true] %s257_s9 }
  0x17   : > { %3555 = sst [smem:[#allocation24_spill]] %s3554_s30  ;;  %s47_s11 = sadd.s32 1, %s2868_s25 }
  0x18   : > { %s3556_s7 = scalar_select %p2977_p8, 1, 0 }
  0x19   : > { %p2452_p9 = pneg %p2977_p8  ;;  %s3558_s1 = sld [smem:[#allocation28_spill]] }
  0x1b   : > { %p2986_p11 = pnand %p2452_p9, %p3531_p1 }
  0x1d   : > { %s3557_s10 = scalar_select %p2986_p11, 1, 0 }
  0x1e   : > { %p2999_p13 = pneg %p2986_p11 }
  0x1f   : > { %s2602_s14 = scalar_lea.hbm %s3558_s1, 2048 }
  0x20   : > { %p2603_p12 = scmp.ne.s32.totalorder %s3558_s1, %s2602_s14  ;;  %p2609_p5 = scmp.lt.u32.totalorder %s2602_s14, %s3558_s1 }
  0x22   : > { %p2605_p0 = pnand %p2999_p13, %p2603_p12 }
  0x24   : > { %p2606_p3 = pneg %p2605_p0 }
  0x26   : > { %p2611_p7 = pnand %p2609_p5, %p2606_p3 }
  0x28   : > { %2614 = shalt.err (!%p2611_p7)
}
  0x29   : > { %s2615_s20 = scalar_lea.vmem %s258_s9, 2048  ;;  %p2623_p2 = scmp.lt.s32.totalorder %s258_s9, %s258_s9 }
  0x2a   : > { %p2616_p9 = scmp.ne.s32.totalorder %s258_s9, %s2615_s20  ;;  %p2624_p6 = scmp.lt.s32.totalorder %s2615_s20, %s2615_s20 }
  0x2c   : > { %p2618_p10 = pnand %p2616_p9, %p2999_p13  ;;  %p2625_p4 = por %p2624_p6, %p2623_p2 }
  0x2e   : > { %p2619_p1 = pneg %p2618_p10 }
  0x30   : > { %p2626_p8 = pnand %p2625_p4, %p2619_p1 }
  0x32   : > { %2629 = shalt.err (!%p2626_p8)
}
  0x33   : > { %s2875_s28 = smov 128   ;;  %s2876_s8 = smov 8  }
  0x34   : > { %2455 = dma.hbm_to_vmem [thread:$0]  (!%p2986_p11), %s3558_s1, 2048, %s258_s9, [#allocation6], %s2875_s28, %s2875_s28, %s2876_s8  }
  0x35   : > { %p49_p1 = scmp.ge.s32.totalorder %s47_s11, 2  ;;  %s56_s14 = sadd.s32 1, %s2860_s23 }
  0x36   : > { %p63_p2 = scmp.ne.s32.totalorder %s2860_s23, %s2856_s22  ;;  %p64_p4 = scmp.eq.s32.totalorder %s2872_s26, 0 }
  0x37   : > { %s3590_s11 = smov (%p49_p1, %s47_s11), 0  ;;  %p3562_p8 = scmp.eq.s32.totalorder %s2958_s27, 1 }
  0x38   : > { %3560 = sst [smem:[#allocation25_spill]] %s3590_s11  ;;  %p3021_p6 = por %p64_p4, %p63_p2 }
  0x39   : > { %p3027_p10 = por %p3562_p8, %p63_p2  ;;  %s51_s18 = ssub.s32 %s2868_s25, %s3590_s11 }
  0x3a   : > { %p54_p12 = scmp.eq.s32.totalorder %s51_s18, 0  ;;  %p2479_p0 = scmp.lt.s32.totalorder %s2872_s26, 2 }
  0x3b   : > { %s3563_s16 = scalar_select %p3027_p10, 1, 0 }
  0x3c   : > { %s298_s9 = sand.u32 1, %s2872_s26   ;;  %s300_s20 = sand.u32 1, %s2860_s23  }
  0x3d   : > { %s3036_s19 = scalar_select %p54_p12, %s2860_s23, %s56_s14  }
  0x3e   : > { %s3039_s28 = sshll.u32 %s300_s20, 7  ;;  %s2393_s8 = sshll.u32 %s2868_s25, 11 }
  0x3f   : > { %3564 = sst [smem:[#allocation26_spill]] %s3036_s19  ;;  %s3565_s0 = sld [smem:[#allocation27_spill]] }
  0x40   : > { %s302_s11 = scalar_lea.vmem [#allocation2], %s3039_s28  ;;  %p3050_p3 = pnand %p2479_p0, %p3021_p6 }
  0x41   : > { %s310_s18 = sshll.u32 %s302_s11, 4  ;;  %s3059_s12 = scalar_lea.hbm %s3528_s4, %s2393_s8  ;;  %s3054_s18 = int_to_ptr.vmem [resolvable:$true] %s310_s18 }
  0x42   : > { %s3566_s14 = scalar_select %p3050_p3, 1, 0 }
  0x43   : > { %s3061_s13 = scalar_lea.sflag [#allocation3], %s298_s9  ;;  %p3544_p7 = pneg %p3050_p3 }
  0x45   : > { %s3045_s1 = scalar_lea.hbm %s3565_s0, %s2393_s8  ;;  %s2635_s23 = scalar_lea.hbm %s3565_s0, 4096 }
  0x46   : > { %s2630_s19 = scalar_lea.hbm %s3045_s1, 2048  ;;  %p2636_p2 = scmp.lt.u32.totalorder %s3045_s1, %s3565_s0 }
  0x47   : > { %p2631_p5 = scmp.ne.s32.totalorder %s3045_s1, %s2630_s19  ;;  %p2637_p4 = scmp.lt.u32.totalorder %s2635_s23, %s2630_s19 }
  0x48   : > { %p2639_p8 = scmp.lt.u32.totalorder %s2630_s19, %s3045_s1 }
  0x49   : > { %p2633_p9 = pnand %p3544_p7, %p2631_p5  ;;  %p2638_p6 = por %p2637_p4, %p2636_p2 }
  0x4b   : > { %p2634_p1 = pneg %p2633_p9  ;;  %p2640_p12 = por %p2639_p8, %p2638_p6 }
  0x4d   : > { %p2641_p0 = pnand %p2640_p12, %p2634_p1 }
  0x4f   : > { %2644 = shalt.err (!%p2641_p0)
}
  0x50   : > { %s2645_s25 = scalar_lea.vmem %s3054_s18, 2048  ;;  %s2877_s9 = smov [#allocation2]  }
  0x51   : > { %p2646_p5 = scmp.ne.s32.totalorder %s3054_s18, %s2645_s25  ;;  %s2650_s8 = sshll.u32 %s2877_s9, 4  ;;  %s2651_s8 = int_to_ptr.vmem [resolvable:$false] %s2650_s8 }
  0x52   : > { %s2652_s26 = scalar_lea.vmem %s2651_s8, 4096  ;;  %p2653_p11 = scmp.lt.s32.totalorder %s3054_s18, %s2651_s8 }
  0x53   : > { %p2648_p9 = pnand %p2646_p5, %p3544_p7  ;;  %p2654_p2 = scmp.lt.s32.totalorder %s2652_s26, %s2645_s25 }
  0x55   : > { %p2649_p10 = pneg %p2648_p9  ;;  %p2655_p4 = por %p2654_p2, %p2653_p11 }
  0x57   : > { %p2656_p6 = pnand %p2655_p4, %p2649_p10 }
  0x59   : > { %2659 = shalt.err (!%p2656_p6)
}
  0x5a   : > { %s2878_s23 = smov 64   ;;  %s2879_s30 = smov 4  }
  0x5b   : > { %2465 = dma.hbm_to_vmem [thread:$0]  (!%p3050_p3), %s3045_s1, 2048, %s3054_s18, %s3061_s13, %s2878_s23, %s2878_s23, %s2879_s30  }
  0x5c   : > { %s324_s19 = scalar_lea.vmem [#allocation10], %s3039_s28  ;;  %s2880_s11 = smov [#allocation7]  }
  0x5d   : > { %s334_s20 = sshll.u32 %s324_s19, 4  ;;  %s274_s15 = sshll.u32 %s2880_s11, 4  ;;  %s3093_s20 = int_to_ptr.vmem [resolvable:$true] %s334_s20  ;;  %s275_s15 = int_to_ptr.vmem [resolvable:$true] %s274_s15 }
  0x5e   : > { %s2660_s8 = scalar_lea.hbm %s3526_s2, 32 }
  0x5f   : > { %p2661_p11 = scmp.ne.s32.totalorder %s3526_s2, %s2660_s8  ;;  %p2667_p8 = scmp.lt.u32.totalorder %s2660_s8, %s3526_s2 }
  0x61   : > { %p2663_p10 = pnand %p2661_p11, %p2999_p13 }
  0x63   : > { %p2664_p1 = pneg %p2663_p10 }
  0x65   : > { %p2669_p12 = pnand %p2667_p8, %p2664_p1 }
  0x67   : > { %2672 = shalt.err (!%p2669_p12)
}
  0x68   : > { %s2673_s28 = scalar_lea.vmem %s275_s15, 32  ;;  %p2681_p2 = scmp.lt.s32.totalorder %s275_s15, %s275_s15 }
  0x69   : > { %p2674_p0 = scmp.ne.s32.totalorder %s275_s15, %s2673_s28  ;;  %p2682_p4 = scmp.lt.s32.totalorder %s2673_s28, %s2673_s28 }
  0x6b   : > { %p2676_p5 = pnand %p2674_p0, %p2999_p13  ;;  %p2683_p6 = por %p2682_p4, %p2681_p2 }
  0x6d   : > { %p2677_p9 = pneg %p2676_p5 }
  0x6f   : > { %p2684_p7 = pnand %p2683_p6, %p2677_p9 }
  0x71   : > { %2687 = shalt.err (!%p2684_p7)
}
  0x72   : > { %p3567_p11 = scmp.ne.s32.totalorder %s3557_s10, 0  ;;  %s2881_s21 = smov [#allocation8]  }
  0x73   : > { %s284_s19 = sshll.u32 %s2881_s21, 4  ;;  %s2688_s9 = scalar_lea.hbm %s3527_s3, 2048  ;;  %s285_s19 = int_to_ptr.vmem [resolvable:$true] %s284_s19 }
  0x74   : > { %2458 = dma.hbm_to_vmem [thread:$0]  (!%p3567_p11), %s3526_s2, 32, %s275_s15, [#allocation6]  }
  0x75   : > { %p2689_p10 = scmp.ne.s32.totalorder %s3527_s3, %s2688_s9  ;;  %p2695_p8 = scmp.lt.u32.totalorder %s2688_s9, %s3527_s3 }
  0x77   : > { %p2691_p7 = pnand %p2689_p10, %p2999_p13 }
  0x79   : > { %p2692_p1 = pneg %p2691_p7 }
  0x7b   : > { %p2697_p12 = pnand %p2695_p8, %p2692_p1 }
  0x7d   : > { %2700 = shalt.err (!%p2697_p12)
}
  0x7e   : > { %s2701_s15 = scalar_lea.vmem %s285_s19, 2048  ;;  %p2709_p2 = scmp.lt.s32.totalorder %s285_s19, %s285_s19 }
  0x7f   : > { %p2702_p0 = scmp.ne.s32.totalorder %s285_s19, %s2701_s15  ;;  %p2710_p4 = scmp.lt.s32.totalorder %s2701_s15, %s2701_s15 }
  0x81   : > { %p2704_p5 = pnand %p2702_p0, %p2999_p13  ;;  %p2711_p6 = por %p2710_p4, %p2709_p2 }
  0x83   : > { %p2705_p9 = pneg %p2704_p5 }
  0x85   : > { %p2712_p3 = pnand %p2711_p6, %p2705_p9 }
  0x87   : > { %2715 = shalt.err (!%p2712_p3)
}
  0x88   : > { %2461 = dma.hbm_to_vmem [thread:$0]  (!%p3567_p11), %s3527_s3, 2048, %s285_s19, [#allocation9], %s2878_s23, %s2878_s23, %s2879_s30  }
  0x89   : > { %s2716_s17 = scalar_lea.hbm %s3059_s12, 2048  ;;  %p3568_p10 = scmp.ne.s32.totalorder %s3566_s14, 0 }
  0x8a   : > { %p2717_p13 = scmp.ne.s32.totalorder %s3059_s12, %s2716_s17  ;;  %s2721_s11 = scalar_lea.hbm %s3528_s4, 4096 }
  0x8b   : > { %p3569_p7 = pneg %p3568_p10  ;;  %p2722_p8 = scmp.lt.u32.totalorder %s3059_s12, %s3528_s4 }
  0x8c   : > { %p2723_p12 = scmp.lt.u32.totalorder %s2721_s11, %s2716_s17  ;;  %p2725_p5 = scmp.lt.u32.totalorder %s2716_s17, %s3059_s12 }
  0x8d   : > { %p2719_p1 = pnand %p2717_p13, %p3569_p7 }
  0x8e   : > { %p2724_p0 = por %p2723_p12, %p2722_p8 }
  0x8f   : > { %p2720_p3 = pneg %p2719_p1 }
  0x90   : > { %p2726_p9 = por %p2725_p5, %p2724_p0 }
  0x92   : > { %p2727_p2 = pnand %p2726_p9, %p2720_p3 }
  0x94   : > { %2730 = shalt.err (!%p2727_p2)
}
  0x95   : > { %s2731_s23 = scalar_lea.vmem %s3093_s20, 2048  ;;  %p3570_p4 = pmov %p3569_p7 }
  0x96   : > { %p2732_p11 = scmp.ne.s32.totalorder %s3093_s20, %s2731_s23  ;;  %s2882_s30 = smov [#allocation10]  }
  0x97   : > { %s2736_s19 = sshll.u32 %s2882_s30, 4  ;;  %s2737_s19 = int_to_ptr.vmem [resolvable:$false] %s2736_s19 }
  0x98   : > { %p2734_p6 = pnand %p2732_p11, %p3570_p4  ;;  %s2738_s8 = scalar_lea.vmem %s2737_s19, 4096 }
  0x99   : > { %p2739_p7 = scmp.lt.s32.totalorder %s3093_s20, %s2737_s19  ;;  %p2740_p1 = scmp.lt.s32.totalorder %s2738_s8, %s2731_s23 }
  0x9a   : > { %p2735_p13 = pneg %p2734_p6 }
  0x9b   : > { %p2741_p8 = por %p2740_p1, %p2739_p7 }
  0x9d   : > { %p2742_p12 = pnand %p2741_p8, %p2735_p13 }
  0x9f   : > { %2745 = shalt.err (!%p2742_p12)
}
  0xa0   : > { %s2883_s26 = smov 256   ;;  %s2884_s1 = smov 16  }
  0xa1   : > { %2468 = dma.hbm_to_vmem [thread:$0]  (!%p3568_p10), %s3059_s12, 2048, %s3093_s20, %s3061_s13, %s2883_s26, %s2883_s26, %s2884_s1  }
  0xa2   : > { %p3571_p3 = scmp.ne.s32.totalorder %s3556_s7, 0 }
  0xa3   : > { %s348_s28 = sand.u32 (!%p3571_p3), 1, %s2958_s27   ;;  %s3162_s15 = sand.u32 (!%p3571_p3), 1, %s2856_s22  }
  0xa4   : > { %346 = sbr.rel (%p3571_p3) target bundleno = 595 (0x253), region = 40  ;;  %s2280_s0 = sshll.u32 (!%p3571_p3), %s3162_s15, 7 }
  0xa5   : > { %s349_s18 = scalar_lea.sflag (!%p3571_p3), [#allocation3], %s348_s28  ;;  %s3165_s17 = scalar_lea.vmem (!%p3571_p3), [#allocation2], %s2280_s0 }
  0xa6   : > { %p3572_p0 = scmp.ne.s32.totalorder (!%p3571_p3), %s3553_s29, 0 }
  0xab   : > { %2827 = dma.done.wait (%p3572_p0), %s349_s18, 2048  }
  0xac   : > { %2829 = vsyncadd (%p3572_p0), %s349_s18, 4294965248  ;;  %p3573_p10 = scmp.eq.s32.totalorder %s2958_s27, 0 }
  0xae   : > { %2831 = dma.done.wait (%p3573_p10), [#allocation6], 2080   ;;  %p3574_p5 = pmov %p3573_p10 }
  0xb0   : > { %2833 = vsyncadd (%p3574_p5), [#allocation6], 4294965216  ;;  %p3575_p9 = pmov %p3574_p5 }
  0xb1   : > { %p3576_p2 = pmov %p3574_p5 }
  0xb2   : > { %2835 = dma.done.wait (%p3575_p9), [#allocation9], 2048  }
  0xb3   : > { %2837 = vsyncadd (%p3576_p2), [#allocation9], 4294965248  ;;  %s3179_s7 = scalar_lea.vmem [#allocation10], %s2280_s0 }
  0xb4   : > { %2839 = dma.done.wait (%p3572_p0), %s349_s18, 2048  }
  0xb5   : > { %2841 = vsyncadd (%p3572_p0), %s349_s18, 4294965248  ;;  %v2885_v0 = vmov 0   ;;  %v2546_v1 = vld [vmem:[#allocation5 + $0x4] ss:$8 sps:$4 sm:$0xff]   ;;  %v2548_v2 = vld [vmem:[#allocation5] ss:$8 sps:$4 sm:$0xff]  }
  0xb6   : > { %679 = vmatprep.mubr.bf16.mxu0 %v2885_v0  ;;  %1528 = vmatprep.mubr.bf16.mxu1 %v2885_v0  ;;  %v2549_v3 = vld [vmem:[#allocation5 + $0x14] ss:$8 sps:$4 sm:$0xff]   ;;  %v2551_v4 = vld [vmem:[#allocation5 + $0x10] ss:$8 sps:$4 sm:$0xff]   ;;  %v2552_v5 = vld [vmem:[#allocation5 + $0x24] ss:$8 sps:$4 sm:$0xff]  }
  0xb7   : > { %647 = vmatprep.subr.bf16.mxu0 %v2546_v1  ;;  %v2554_v6 = vld [vmem:[#allocation5 + $0x20] ss:$8 sps:$4 sm:$0xff]   ;;  %v2555_v7 = vld [vmem:[#allocation5 + $0x34] ss:$8 sps:$4 sm:$0xff]   ;;  %v2557_v13 = vld [vmem:[#allocation5 + $0x30] ss:$8 sps:$4 sm:$0xff]  }
  0xb8   : > { %648 = vmatpush1.bf16.msra.mxu0 %v2548_v2  ;;  %v1344_v8 = vld [vmem:[%s3179_s7 + $0x8] sm:$0xff]  ;;  %v1346_v9 = vld [vmem:[%s3179_s7 + $0x18] sm:$0xff]  ;;  %v1343_v11 = vld [vmem:[%s3179_s7] sm:$0xff]  ;;  %vm1447_vm0 = vcmask 523264   ;;  %s2285_s27 = sshll.u32 %s3162_s15, 9  ;;  %s2286_s29 = sshll.u32 %s3162_s15, 8 }
  0xb9   : > { %649 = vmatprep.subr.bf16.mxu0 %v2549_v3  ;;  %v1360_v10 = vpack.c.bf16 %v1346_v9, %v1344_v8  ;;  %v1345_v12 = vld [vmem:[%s3179_s7 + $0x10] sm:$0xff]  ;;  %v2558_v14 = vld [vmem:[#allocation5 + $0x44] ss:$8 sps:$4 sm:$0xff]   ;;  %v1350_v17 = vld [vmem:[%s3179_s7 + $0x38] sm:$0xff]  ;;  %s3275_s14 = scalar_lea.vmem [#allocation11], %s2285_s27  ;;  %s3281_s12 = scalar_lea.vmem [#allocation12], %s2286_s29 }
  0xba   : > { %v1359_v15 = vpack.c.bf16 %v1345_v12, %v1343_v11  ;;  %v1348_v16 = vld [vmem:[%s3179_s7 + $0x28] sm:$0xff]  ;;  %v1347_v18 = vld [vmem:[%s3179_s7 + $0x20] sm:$0xff]  ;;  %v1349_v20 = vld [vmem:[%s3179_s7 + $0x30] sm:$0xff]  ;;  %s2429_s13 = sshll.u32 %s2864_s24, 13  ;;  %s2063_s20 = sshll.u32 %s3275_s14, 4  ;;  %s3439_s20 = int_to_ptr.vmem [resolvable:$true] %s2063_s20 }
  0xbb   : > { %1496 = vmatprep.subr.bf16.mxu1 %v1360_v10  ;;  %v1362_v19 = vpack.c.bf16 %v1350_v17, %v1348_v16  ;;  %v2560_v21 = vld [vmem:[#allocation5 + $0x40] ss:$8 sps:$4 sm:$0xff]   ;;  %v1361_v22 = vpack.c.bf16 %v1349_v20, %v1347_v18  ;;  %v1353_v27 = vld [vmem:[%s3179_s7 + $0x50] sm:$0xff]  ;;  %v2564_v36 = vld [vmem:[#allocation5 + $0x64] ss:$8 sps:$4 sm:$0xff]   ;;  %v1173_v10 = vlaneseq  ;;  %s3434_s11 = scalar_lea.hbm %s3529_s5, %s2429_s13  ;;  %s2431_s25 = sshll.u32 %s2864_s24, 12 }
  0xbc   : > { %650 = vmatpush1.bf16.msra.mxu0 %v2551_v4  ;;  %1497 = vmatpush1.bf16.msra.mxu1 %v1359_v15  ;;  %v1352_v23 = vld [vmem:[%s3179_s7 + $0x48] sm:$0xff]  ;;  %v1354_v24 = vld [vmem:[%s3179_s7 + $0x58] sm:$0xff]  ;;  %v1351_v26 = vld [vmem:[%s3179_s7 + $0x40] sm:$0xff]  ;;  %s2082_s9 = sshll.u32 %s3281_s12, 4  ;;  %s3446_s19 = scalar_lea.hbm %s3530_s6, %s2431_s25  ;;  %s3448_s9 = int_to_ptr.vmem [resolvable:$true] %s2082_s9 }
  0xbd   : > { %651 = vmatprep.subr.bf16.mxu0 %v2552_v5  ;;  %1498 = vmatprep.subr.bf16.mxu1 %v1362_v19  ;;  %v1364_v25 = vpack.c.bf16 %v1354_v24, %v1352_v23  ;;  %v1356_v28 = vld [vmem:[%s3179_s7 + $0x68] sm:$0xff]  ;;  %v2561_v29 = vld [vmem:[#allocation5 + $0x54] ss:$8 sps:$4 sm:$0xff]   ;;  %v1363_v31 = vpack.c.bf16 %v1353_v27, %v1351_v26  ;;  %v1355_v32 = vld [vmem:[%s3179_s7 + $0x60] sm:$0xff]  ;;  %v1174_v11 = vshrl.u32 %v1173_v10, 7  ;;  %s2042_s24 = scalar_lea.sflag [#allocation4], %s3162_s15 }
  0xbe   : > { %v1358_v30 = vld [vmem:[%s3179_s7 + $0x78] sm:$0xff]  ;;  %v1357_v34 = vld [vmem:[%s3179_s7 + $0x70] sm:$0xff]  ;;  %v2572_v40 = vld [vmem:[#allocation8] sm:$0xff]   ;;  %s2746_s8 = scalar_lea.vmem %s3439_s20, 8192  ;;  %p3577_p4 = scmp.ne.s32.totalorder %s3563_s16, 0 }
  0xbf   : > { %v1366_v33 = vpack.c.bf16 %v1358_v30, %v1356_v28  ;;  %v2563_v35 = vld [vmem:[#allocation5 + $0x50] ss:$8 sps:$4 sm:$0xff]   ;;  %v1365_v37 = vpack.c.bf16 %v1357_v34, %v1355_v32  ;;  %v2566_v38 = vld [vmem:[#allocation5 + $0x60] ss:$8 sps:$4 sm:$0xff]   ;;  %v2567_v39 = vld [vmem:[#allocation5 + $0x74] ss:$8 sps:$4 sm:$0xff]   ;;  %p2747_p11 = scmp.ne.s32.totalorder %s3439_s20, %s2746_s8 }
  0xc0   : > { %652 = vmatpush1.bf16.msra.mxu0 %v2554_v6  ;;  %1499 = vmatpush1.bf16.msra.mxu1 %v1361_v22  ;;  %v2569_v41 = vld [vmem:[#allocation5 + $0x70] ss:$8 sps:$4 sm:$0xff]   ;;  %v2570_v42 = vld [vmem:[%s3165_s17] sm:$0xff]   ;;  %v2571_v44 = vld [vmem:[%s3165_s17 + $0x8] sm:$0xff]   ;;  %v1175_v12 = vsub.s32 0, %v1174_v11  ;;  %v1179_v15 = vsub.s32 1, %v1174_v11 }
  0xc1   : > { %653 = vmatprep.subr.bf16.mxu0 %v2555_v7  ;;  %1500 = vmatprep.subr.bf16.mxu1 %v1364_v25  ;;  %v2574_v43 = vld [vmem:[#allocation8 + $0x8] sm:$0xff]   ;;  %v2576_v45 = vld [vmem:[#allocation8 + $0x10] sm:$0xff]   ;;  %v2578_v47 = vld [vmem:[#allocation8 + $0x18] sm:$0xff]   ;;  %p2748_p6 = pnand %p2747_p11, %p3577_p4  ;;  %s2886_s26 = smov [#allocation11]  }
  0xc2   : > { %v2573_v46 = vld [vmem:[%s3165_s17 + $0x10] sm:$0xff]   ;;  %v2575_v48 = vld [vmem:[%s3165_s17 + $0x18] sm:$0xff]   ;;  %v2580_v49 = vld [vmem:[#allocation8 + $0x20] sm:$0xff]   ;;  %s2750_s1 = sshll.u32 %s2886_s26, 4  ;;  %s2751_s1 = int_to_ptr.vmem [resolvable:$false] %s2750_s1 }
  0xc3   : > { %v2577_v50 = vld [vmem:[%s3165_s17 + $0x20] sm:$0xff]   ;;  %v2582_v51 = vld [vmem:[#allocation8 + $0x28] sm:$0xff]   ;;  %v2584_v53 = vld [vmem:[#allocation8 + $0x30] sm:$0xff]   ;;  %p2749_p13 = pneg %p2748_p6  ;;  %s2752_s28 = scalar_lea.vmem %s2751_s1, 16384 }
  0xc4   : > { %654 = vmatpush1.bf16.msra.mxu0 %v2557_v13  ;;  %1501 = vmatpush1.bf16.msra.mxu1 %v1363_v31  ;;  %v2579_v52 = vld [vmem:[%s3165_s17 + $0x28] sm:$0xff]   ;;  %v2581_v54 = vld [vmem:[%s3165_s17 + $0x30] sm:$0xff]   ;;  %v2586_v55 = vld [vmem:[#allocation8 + $0x38] sm:$0xff]   ;;  %p2753_p7 = scmp.lt.s32.totalorder %s3439_s20, %s2751_s1  ;;  %p2754_p1 = scmp.lt.s32.totalorder %s2752_s28, %s2746_s8 }
  0xc5   : > { %655 = vmatprep.subr.bf16.mxu0 %v2558_v14  ;;  %1502 = vmatprep.subr.bf16.mxu1 %v1366_v33  ;;  %v2583_v56 = vld [vmem:[%s3165_s17 + $0x38] sm:$0xff]   ;;  %v2588_v57 = vld [vmem:[#allocation8 + $0x40] sm:$0xff]   ;;  %v2590_v59 = vld [vmem:[#allocation8 + $0x48] sm:$0xff]  }
  0xc6   : > { %v2585_v58 = vld [vmem:[%s3165_s17 + $0x40] sm:$0xff]   ;;  %v2587_v60 = vld [vmem:[%s3165_s17 + $0x48] sm:$0xff]   ;;  %v2592_v61 = vld [vmem:[#allocation8 + $0x50] sm:$0xff]   ;;  %p2755_p8 = por %p2754_p1, %p2753_p7 }
  0xc7   : > { %v2589_v62 = vld [vmem:[%s3165_s17 + $0x50] sm:$0xff]   ;;  %v2594_v63 = vld [vmem:[#allocation8 + $0x58] sm:$0xff]   ;;  %v2596_v2 = vld [vmem:[#allocation8 + $0x60] sm:$0xff]  }
  0xc8   : > { %656 = vmatpush1.bf16.msra.mxu0 %v2560_v21  ;;  %1503 = vmatpush1.bf16.msra.mxu1 %v1365_v37  ;;  %v2591_v1 = vld [vmem:[%s3165_s17 + $0x58] sm:$0xff]   ;;  %v2593_v3 = vld [vmem:[%s3165_s17 + $0x60] sm:$0xff]   ;;  %v2598_v4 = vld [vmem:[#allocation8 + $0x68] sm:$0xff]   ;;  %p2756_p12 = pnand %p2755_p8, %p2749_p13 }
  0xc9   : > { %657 = vmatprep.subr.bf16.mxu0 %v2561_v29  ;;  %v2595_v5 = vld [vmem:[%s3165_s17 + $0x68] sm:$0xff]   ;;  %v2600_v6 = vld [vmem:[#allocation8 + $0x70] sm:$0xff]   ;;  %v2601_v8 = vld [vmem:[#allocation8 + $0x78] sm:$0xff]  }
  0xca   : > { %v2597_v7 = vld [vmem:[%s3165_s17 + $0x70] sm:$0xff]   ;;  %v2599_v9 = vld [vmem:[%s3165_s17 + $0x78] sm:$0xff]   ;;  %v1171_v13 = vld [vmem:[#allocation7] sm:$0x3] }
  0xcb   : > { %2335 = vmatmul.mubr.msk.bf16.vlgmr.msra.gmra.mrb[0].mxu1 %vm1447_vm0, %v2572_v40  ;;  %v3265_v18 = vrot.slane %v1171_v13, %v1175_v12  ;;  %v3267_v20 = vrot.slane %v1171_v13, %v1179_v15 }
  0xcc   : > { %658 = vmatpush1.bf16.msra.mxu0 %v2563_v35  ;;  %1538 = vmatprep.mubr.bf16.mxu1 %v2885_v0 }
  0xcd   : > { %659 = vmatprep.subr.bf16.mxu0 %v2564_v36 }
  0xd0   : > { %660 = vmatpush1.bf16.msra.mxu0 %v2566_v38 }
  0xd1   : > { %661 = vmatprep.subr.bf16.mxu0 %v2567_v39 }
  0xd3   : > { %2336 = vmatmul.mubr.msk.bf16.gmra.mrb[4].mxu1 %vm1447_vm0, %v2574_v43 }
  0xd4   : > { %662 = vmatpush1.bf16.msra.mxu0 %v2569_v41  ;;  %1548 = vmatprep.mubr.bf16.mxu1 %v2885_v0 }
  0xd7   : > { %680 = vmatmul.mubr.bf16.vlgmr.msra.gmra.mrb[0].mxu0 %v2570_v42 }
  0xd8   : > { %689 = vmatprep.mubr.bf16.mxu0 %v2885_v0 }
  0xdb   : > { %2337 = vmatmul.mubr.msk.bf16.gmra.mrb[8].mxu1 %vm1447_vm0, %v2576_v45 }
  0xdc   : > { %1558 = vmatprep.mubr.bf16.mxu1 %v2885_v0 }
  0xdf   : > { %690 = vmatmul.mubr.bf16.gmra.mrb[4].mxu0 %v2571_v44 }
  0xe0   : > { %699 = vmatprep.mubr.bf16.mxu0 %v2885_v0 }
  0xe3   : > { %2338 = vmatmul.mubr.msk.bf16.gmra.mrb[12].mxu1 %vm1447_vm0, %v2578_v47 }
  0xe4   : > { %1568 = vmatprep.mubr.bf16.mxu1 %v2885_v0 }
  0xe7   : > { %700 = vmatmul.mubr.bf16.gmra.mrb[8].mxu0 %v2573_v46 }
  0xe8   : > { %709 = vmatprep.mubr.bf16.mxu0 %v2885_v0 }
  0xeb   : > { %2339 = vmatmul.mubr.msk.bf16.gmra.mrb[16].mxu1 %vm1447_vm0, %v2580_v49 }
  0xec   : > { %1578 = vmatprep.mubr.bf16.mxu1 %v2885_v0 }
  0xef   : > { %710 = vmatmul.mubr.bf16.gmra.mrb[12].mxu0 %v2575_v48 }
  0xf0   : > { %719 = vmatprep.mubr.bf16.mxu0 %v2885_v0 }
  0xf3   : > { %2340 = vmatmul.mubr.msk.bf16.gmra.mrb[20].mxu1 %vm1447_vm0, %v2582_v51 }
  0xf4   : > { %1588 = vmatprep.mubr.bf16.mxu1 %v2885_v0 }
  0xf7   : > { %720 = vmatmul.mubr.bf16.gmra.mrb[16].mxu0 %v2577_v50 }
  0xf8   : > { %729 = vmatprep.mubr.bf16.mxu0 %v2885_v0 }
  0xfb   : > { %2341 = vmatmul.mubr.msk.bf16.gmra.mrb[24].mxu1 %vm1447_vm0, %v2584_v53 }
  0xfc   : > { %1598 = vmatprep.mubr.bf16.mxu1 %v2885_v0 }
  0xff   : > { %730 = vmatmul.mubr.bf16.gmra.mrb[20].mxu0 %v2579_v52 }
 0x100   : > { %739 = vmatprep.mubr.bf16.mxu0 %v2885_v0 }
 0x103   : > { %2342 = vmatmul.mubr.msk.bf16.gmra.mrb[28].mxu1 %vm1447_vm0, %v2586_v55 }
 0x104   : > { %1608 = vmatprep.mubr.bf16.mxu1 %v2885_v0 }
 0x107   : > { %740 = vmatmul.mubr.bf16.gmra.mrb[24].mxu0 %v2581_v54 }
 0x108   : > { %749 = vmatprep.mubr.bf16.mxu0 %v2885_v0 }
 0x10b   : > { %2343 = vmatmul.mubr.msk.bf16.gmra.mrb[32].mxu1 %vm1447_vm0, %v2588_v57 }
 0x10c   : > { %1618 = vmatprep.mubr.bf16.mxu1 %v2885_v0 }
 0x10f   : > { %750 = vmatmul.mubr.bf16.gmra.mrb[28].mxu0 %v2583_v56 }
 0x110   : > { %759 = vmatprep.mubr.bf16.mxu0 %v2885_v0 }
 0x113   : > { %2344 = vmatmul.mubr.msk.bf16.gmra.mrb[36].mxu1 %vm1447_vm0, %v2590_v59 }
 0x114   : > { %1628 = vmatprep.mubr.bf16.mxu1 %v2885_v0 }
 0x117   : > { %760 = vmatmul.mubr.bf16.gmra.mrb[32].mxu0 %v2585_v58 }
 0x118   : > { %769 = vmatprep.mubr.bf16.mxu0 %v2885_v0 }
 0x11b   : > { %2345 = vmatmul.mubr.msk.bf16.gmra.mrb[40].mxu1 %vm1447_vm0, %v2592_v61 }
 0x11c   : > { %1638 = vmatprep.mubr.bf16.mxu1 %v2885_v0 }
 0x11f   : > { %770 = vmatmul.mubr.bf16.gmra.mrb[36].mxu0 %v2587_v60 }
 0x120   : > { %779 = vmatprep.mubr.bf16.mxu0 %v2885_v0 }
 0x123   : > { %2346 = vmatmul.mubr.msk.bf16.gmra.mrb[44].mxu1 %vm1447_vm0, %v2594_v63 }
 0x124   : > { %1648 = vmatprep.mubr.bf16.mxu1 %v2885_v0 }
 0x127   : > { %780 = vmatmul.mubr.bf16.gmra.mrb[40].mxu0 %v2589_v62 }
 0x128   : > { %789 = vmatprep.mubr.bf16.mxu0 %v2885_v0 }
 0x12b   : > { %2347 = vmatmul.mubr.msk.bf16.gmra.mrb[48].mxu1 %vm1447_vm0, %v2596_v2 }
 0x12c   : > { %1658 = vmatprep.mubr.bf16.mxu1 %v2885_v0 }
 0x12f   : > { %790 = vmatmul.mubr.bf16.gmra.mrb[44].mxu0 %v2591_v1 }
 0x130   : > { %799 = vmatprep.mubr.bf16.mxu0 %v2885_v0 }
 0x133   : > { %2348 = vmatmul.mubr.msk.bf16.gmra.mrb[52].mxu1 %vm1447_vm0, %v2598_v4 }
 0x134   : > { %1668 = vmatprep.mubr.bf16.mxu1 %v2885_v0 }
 0x137   : > { %800 = vmatmul.mubr.bf16.gmra.mrb[48].mxu0 %v2593_v3 }
 0x138   : > { %809 = vmatprep.mubr.bf16.mxu0 %v2885_v0 }
 0x13b   : > { %2349 = vmatmul.mubr.msk.bf16.gmra.mrb[56].mxu1 %vm1447_vm0, %v2600_v6 }
 0x13c   : > { %1678 = vmatprep.mubr.bf16.mxu1 %v2885_v0 }
 0x13f   : > { %810 = vmatmul.mubr.bf16.gmra.mrb[52].mxu0 %v2595_v5 }
 0x140   : > { %819 = vmatprep.mubr.bf16.mxu0 %v2885_v0 }
 0x143   : > { %2350 = vmatmul.mubr.msk.bf16.gmra.mrb[60].mxu1 %vm1447_vm0, %v2601_v8 }
 0x147   : > { %820 = vmatmul.mubr.bf16.gmra.mrb[56].mxu0 %v2597_v7 }
 0x148   : > { %829 = vmatprep.mubr.bf16.mxu0 %v2885_v0 }
 0x14f   : > { %830 = vmatmul.mubr.bf16.gmra.mrb[60].mxu0 %v2599_v9 }
 0x19e   : > { %v1530_v14 = vpop.f32.mrb[0].mxu1 }
 0x19f   : > { %v1532_v16 = vpop.f32.mrb[1].mxu1 }
 0x1a0   : > { %v1534_v17 = vpop.f32.mrb[2].mxu1 }
 0x1a1   : > { %v1536_v19 = vpop.f32.mrb[3].mxu1 }
 0x1a6   : > { %v1540_v25 = vpop.f32.mrb[4].mxu1 }
 0x1a7   : > { %v1542_v29 = vpop.f32.mrb[5].mxu1 }
 0x1a8   : > { %v1544_v32 = vpop.f32.mrb[6].mxu1 }
 0x1a9   : > { %v1546_v35 = vpop.f32.mrb[7].mxu1 }
 0x1aa   : > { %v681_v0 = vpop.f32.mrb[0].mxu0 }
 0x1ab   : > { %v683_v21 = vpop.f32.mrb[1].mxu0  ;;  %v1183_v22 = vadd.f32 %v3265_v18, %v681_v0 }
 0x1ac   : > { %v685_v23 = vpop.f32.mrb[2].mxu0  ;;  %v1184_v24 = vadd.f32 %v3267_v20, %v683_v21 }
 0x1ad   : > { %v687_v26 = vpop.f32.mrb[3].mxu0  ;;  %v1247_v27 = vmax.f32 %v1183_v22, 0.0  ;;  %v1185_v28 = vadd.f32 %v3265_v18, %v685_v23 }
 0x1ae   : > { %v1248_v30 = vmax.f32 %v1184_v24, 0.0  ;;  %v1186_v31 = vadd.f32 %v3267_v20, %v687_v26  ;;  %v1550_v47 = vpop.f32.mrb[8].mxu1 }
 0x1af   : > { %v1689_v33 = vadd.f32 %v1530_v14, %v1247_v27  ;;  %v1249_v34 = vmax.f32 %v1185_v28, 0.0  ;;  %v1552_v51 = vpop.f32.mrb[9].mxu1 }
 0x1b0   : > { %v1690_v36 = vadd.f32 %v1532_v16, %v1248_v30  ;;  %v1250_v37 = vmax.f32 %v1186_v31, 0.0  ;;  %v1554_v54 = vpop.f32.mrb[10].mxu1 }
 0x1b1   : > { %1753 = vst [vmem:[%s3275_s14] sm:$0xff] %v1689_v33  ;;  %v1691_v38 = vadd.f32 %v1534_v17, %v1249_v34  ;;  %v1556_v57 = vpop.f32.mrb[11].mxu1 }
 0x1b2   : > { %v691_v39 = vpop.f32.mrb[4].mxu0  ;;  %1754 = vst [vmem:[%s3275_s14 + $0x8] sm:$0xff] %v1690_v36  ;;  %v2396_v40 = vpack.c.bf16 %v1690_v36, %v1689_v33  ;;  %v1692_v41 = vadd.f32 %v1536_v19, %v1250_v37 }
 0x1b3   : > { %v693_v42 = vpop.f32.mrb[5].mxu0  ;;  %1755 = vst [vmem:[%s3275_s14 + $0x10] sm:$0xff] %v1691_v38  ;;  %v1187_v43 = vadd.f32 %v3265_v18, %v691_v39 }
 0x1b4   : > { %v695_v44 = vpop.f32.mrb[6].mxu0  ;;  %2009 = vst [vmem:[%s3281_s12] sm:$0xff] %v2396_v40  ;;  %1756 = vst [vmem:[%s3275_s14 + $0x18] sm:$0xff] %v1692_v41  ;;  %v2397_v45 = vpack.c.bf16 %v1692_v41, %v1691_v38  ;;  %v1188_v46 = vadd.f32 %v3267_v20, %v693_v42 }
 0x1b5   : > { %v697_v48 = vpop.f32.mrb[7].mxu0  ;;  %v1251_v49 = vmax.f32 %v1187_v43, 0.0  ;;  %v1189_v50 = vadd.f32 %v3265_v18, %v695_v44 }
 0x1b6   : > { %2010 = vst [vmem:[%s3281_s12 + $0x8] sm:$0xff] %v2397_v45  ;;  %v1252_v52 = vmax.f32 %v1188_v46, 0.0  ;;  %v1190_v53 = vadd.f32 %v3267_v20, %v697_v48  ;;  %v1560_v6 = vpop.f32.mrb[12].mxu1 }
 0x1b7   : > { %v1693_v55 = vadd.f32 %v1540_v25, %v1251_v49  ;;  %v1253_v56 = vmax.f32 %v1189_v50, 0.0  ;;  %v1562_v10 = vpop.f32.mrb[13].mxu1 }
 0x1b8   : > { %v1694_v58 = vadd.f32 %v1542_v29, %v1252_v52  ;;  %v1254_v59 = vmax.f32 %v1190_v53, 0.0  ;;  %v1564_v13 = vpop.f32.mrb[14].mxu1 }
 0x1b9   : > { %1757 = vst [vmem:[%s3275_s14 + $0x20] sm:$0xff] %v1693_v55  ;;  %v1695_v60 = vadd.f32 %v1544_v32, %v1253_v56  ;;  %v1566_v16 = vpop.f32.mrb[15].mxu1 }
 0x1ba   : > { %v701_v61 = vpop.f32.mrb[8].mxu0  ;;  %1758 = vst [vmem:[%s3275_s14 + $0x28] sm:$0xff] %v1694_v58  ;;  %v2398_v62 = vpack.c.bf16 %v1694_v58, %v1693_v55  ;;  %v1696_v63 = vadd.f32 %v1546_v35, %v1254_v59 }
 0x1bb   : > { %v703_v1 = vpop.f32.mrb[9].mxu0  ;;  %1759 = vst [vmem:[%s3275_s14 + $0x30] sm:$0xff] %v1695_v60  ;;  %v1191_v2 = vadd.f32 %v3265_v18, %v701_v61 }
 0x1bc   : > { %v705_v3 = vpop.f32.mrb[10].mxu0  ;;  %2011 = vst [vmem:[%s3281_s12 + $0x10] sm:$0xff] %v2398_v62  ;;  %1760 = vst [vmem:[%s3275_s14 + $0x38] sm:$0xff] %v1696_v63  ;;  %v2399_v4 = vpack.c.bf16 %v1696_v63, %v1695_v60  ;;  %v1192_v5 = vadd.f32 %v3267_v20, %v703_v1 }
 0x1bd   : > { %v707_v7 = vpop.f32.mrb[11].mxu0  ;;  %v1255_v8 = vmax.f32 %v1191_v2, 0.0  ;;  %v1193_v9 = vadd.f32 %v3265_v18, %v705_v3 }
 0x1be   : > { %2012 = vst [vmem:[%s3281_s12 + $0x18] sm:$0xff] %v2399_v4  ;;  %v1256_v11 = vmax.f32 %v1192_v5, 0.0  ;;  %v1194_v12 = vadd.f32 %v3267_v20, %v707_v7  ;;  %v1570_v29 = vpop.f32.mrb[16].mxu1 }
 0x1bf   : > { %v1697_v14 = vadd.f32 %v1550_v47, %v1255_v8  ;;  %v1257_v15 = vmax.f32 %v1193_v9, 0.0  ;;  %v1572_v33 = vpop.f32.mrb[17].mxu1 }
 0x1c0   : > { %v1698_v17 = vadd.f32 %v1552_v51, %v1256_v11  ;;  %v1258_v19 = vmax.f32 %v1194_v12, 0.0  ;;  %v1574_v36 = vpop.f32.mrb[18].mxu1 }
 0x1c1   : > { %1761 = vst [vmem:[%s3275_s14 + $0x40] sm:$0xff] %v1697_v14  ;;  %v1699_v0 = vadd.f32 %v1554_v54, %v1257_v15  ;;  %v1576_v39 = vpop.f32.mrb[19].mxu1 }
 0x1c2   : > { %v711_v21 = vpop.f32.mrb[12].mxu0  ;;  %1762 = vst [vmem:[%s3275_s14 + $0x48] sm:$0xff] %v1698_v17  ;;  %v2400_v22 = vpack.c.bf16 %v1698_v17, %v1697_v14  ;;  %v1700_v23 = vadd.f32 %v1556_v57, %v1258_v19 }
 0x1c3   : > { %v713_v24 = vpop.f32.mrb[13].mxu0  ;;  %1763 = vst [vmem:[%s3275_s14 + $0x50] sm:$0xff] %v1699_v0  ;;  %v1195_v25 = vadd.f32 %v3265_v18, %v711_v21 }
 0x1c4   : > { %v715_v26 = vpop.f32.mrb[14].mxu0  ;;  %2013 = vst [vmem:[%s3281_s12 + $0x20] sm:$0xff] %v2400_v22  ;;  %1764 = vst [vmem:[%s3275_s14 + $0x58] sm:$0xff] %v1700_v23  ;;  %v2401_v27 = vpack.c.bf16 %v1700_v23, %v1699_v0  ;;  %v1196_v28 = vadd.f32 %v3267_v20, %v713_v24 }
 0x1c5   : > { %v717_v30 = vpop.f32.mrb[15].mxu0  ;;  %v1259_v31 = vmax.f32 %v1195_v25, 0.0  ;;  %v1197_v32 = vadd.f32 %v3265_v18, %v715_v26 }
 0x1c6   : > { %2014 = vst [vmem:[%s3281_s12 + $0x28] sm:$0xff] %v2401_v27  ;;  %v1260_v34 = vmax.f32 %v1196_v28, 0.0  ;;  %v1198_v35 = vadd.f32 %v3267_v20, %v717_v30  ;;  %v1580_v51 = vpop.f32.mrb[20].mxu1 }
 0x1c7   : > { %v1701_v37 = vadd.f32 %v1560_v6, %v1259_v31  ;;  %v1261_v38 = vmax.f32 %v1197_v32, 0.0  ;;  %v1582_v55 = vpop.f32.mrb[21].mxu1 }
 0x1c8   : > { %v1702_v40 = vadd.f32 %v1562_v10, %v1260_v34  ;;  %v1262_v41 = vmax.f32 %v1198_v35, 0.0  ;;  %v1584_v58 = vpop.f32.mrb[22].mxu1 }
 0x1c9   : > { %1765 = vst [vmem:[%s3275_s14 + $0x60] sm:$0xff] %v1701_v37  ;;  %v1703_v42 = vadd.f32 %v1564_v13, %v1261_v38  ;;  %v1586_v61 = vpop.f32.mrb[23].mxu1 }
 0x1ca   : > { %v721_v43 = vpop.f32.mrb[16].mxu0  ;;  %1766 = vst [vmem:[%s3275_s14 + $0x68] sm:$0xff] %v1702_v40  ;;  %v2402_v44 = vpack.c.bf16 %v1702_v40, %v1701_v37  ;;  %v1704_v45 = vadd.f32 %v1566_v16, %v1262_v41 }
 0x1cb   : > { %v723_v46 = vpop.f32.mrb[17].mxu0  ;;  %1767 = vst [vmem:[%s3275_s14 + $0x70] sm:$0xff] %v1703_v42  ;;  %v1199_v47 = vadd.f32 %v3265_v18, %v721_v43 }
 0x1cc   : > { %v725_v48 = vpop.f32.mrb[18].mxu0  ;;  %2015 = vst [vmem:[%s3281_s12 + $0x30] sm:$0xff] %v2402_v44  ;;  %1768 = vst [vmem:[%s3275_s14 + $0x78] sm:$0xff] %v1704_v45  ;;  %v2403_v49 = vpack.c.bf16 %v1704_v45, %v1703_v42  ;;  %v1200_v50 = vadd.f32 %v3267_v20, %v723_v46 }
 0x1cd   : > { %v727_v52 = vpop.f32.mrb[19].mxu0  ;;  %v1263_v53 = vmax.f32 %v1199_v47, 0.0  ;;  %v1201_v54 = vadd.f32 %v3265_v18, %v725_v48 }
 0x1ce   : > { %2016 = vst [vmem:[%s3281_s12 + $0x38] sm:$0xff] %v2403_v49  ;;  %v1264_v56 = vmax.f32 %v1200_v50, 0.0  ;;  %v1202_v57 = vadd.f32 %v3267_v20, %v727_v52  ;;  %v1590_v10 = vpop.f32.mrb[24].mxu1 }
 0x1cf   : > { %v1705_v59 = vadd.f32 %v1570_v29, %v1263_v53  ;;  %v1265_v60 = vmax.f32 %v1201_v54, 0.0  ;;  %v1592_v14 = vpop.f32.mrb[25].mxu1 }
 0x1d0   : > { %v1706_v62 = vadd.f32 %v1572_v33, %v1264_v56  ;;  %v1266_v63 = vmax.f32 %v1202_v57, 0.0  ;;  %v1594_v17 = vpop.f32.mrb[26].mxu1 }
 0x1d1   : > { %1769 = vst [vmem:[%s3275_s14 + $0x80] sm:$0xff] %v1705_v59  ;;  %v1707_v1 = vadd.f32 %v1574_v36, %v1265_v60  ;;  %v1596_v21 = vpop.f32.mrb[27].mxu1 }
 0x1d2   : > { %v731_v2 = vpop.f32.mrb[20].mxu0  ;;  %1770 = vst [vmem:[%s3275_s14 + $0x88] sm:$0xff] %v1706_v62  ;;  %v2404_v3 = vpack.c.bf16 %v1706_v62, %v1705_v59  ;;  %v1708_v4 = vadd.f32 %v1576_v39, %v1266_v63 }
 0x1d3   : > { %v733_v5 = vpop.f32.mrb[21].mxu0  ;;  %1771 = vst [vmem:[%s3275_s14 + $0x90] sm:$0xff] %v1707_v1  ;;  %v1203_v6 = vadd.f32 %v3265_v18, %v731_v2 }
 0x1d4   : > { %v735_v7 = vpop.f32.mrb[22].mxu0  ;;  %2017 = vst [vmem:[%s3281_s12 + $0x40] sm:$0xff] %v2404_v3  ;;  %1772 = vst [vmem:[%s3275_s14 + $0x98] sm:$0xff] %v1708_v4  ;;  %v2405_v8 = vpack.c.bf16 %v1708_v4, %v1707_v1  ;;  %v1204_v9 = vadd.f32 %v3267_v20, %v733_v5 }
 0x1d5   : > { %v737_v11 = vpop.f32.mrb[23].mxu0  ;;  %v1267_v12 = vmax.f32 %v1203_v6, 0.0  ;;  %v1205_v13 = vadd.f32 %v3265_v18, %v735_v7 }
 0x1d6   : > { %2018 = vst [vmem:[%s3281_s12 + $0x48] sm:$0xff] %v2405_v8  ;;  %v1268_v15 = vmax.f32 %v1204_v9, 0.0  ;;  %v1206_v16 = vadd.f32 %v3267_v20, %v737_v11  ;;  %v1600_v33 = vpop.f32.mrb[28].mxu1 }
 0x1d7   : > { %v1709_v19 = vadd.f32 %v1580_v51, %v1267_v12  ;;  %v1269_v0 = vmax.f32 %v1205_v13, 0.0  ;;  %v1602_v37 = vpop.f32.mrb[29].mxu1 }
 0x1d8   : > { %v1710_v22 = vadd.f32 %v1582_v55, %v1268_v15  ;;  %v1270_v23 = vmax.f32 %v1206_v16, 0.0  ;;  %v1604_v40 = vpop.f32.mrb[30].mxu1 }
 0x1d9   : > { %1773 = vst [vmem:[%s3275_s14 + $0xa0] sm:$0xff] %v1709_v19  ;;  %v1711_v24 = vadd.f32 %v1584_v58, %v1269_v0  ;;  %v1606_v43 = vpop.f32.mrb[31].mxu1 }
 0x1da   : > { %v741_v25 = vpop.f32.mrb[24].mxu0  ;;  %1774 = vst [vmem:[%s3275_s14 + $0xa8] sm:$0xff] %v1710_v22  ;;  %v2406_v26 = vpack.c.bf16 %v1710_v22, %v1709_v19  ;;  %v1712_v27 = vadd.f32 %v1586_v61, %v1270_v23 }
 0x1db   : > { %v743_v28 = vpop.f32.mrb[25].mxu0  ;;  %1775 = vst [vmem:[%s3275_s14 + $0xb0] sm:$0xff] %v1711_v24  ;;  %v1207_v29 = vadd.f32 %v3265_v18, %v741_v25 }
 0x1dc   : > { %v745_v30 = vpop.f32.mrb[26].mxu0  ;;  %2019 = vst [vmem:[%s3281_s12 + $0x50] sm:$0xff] %v2406_v26  ;;  %1776 = vst [vmem:[%s3275_s14 + $0xb8] sm:$0xff] %v1712_v27  ;;  %v2407_v31 = vpack.c.bf16 %v1712_v27, %v1711_v24  ;;  %v1208_v32 = vadd.f32 %v3267_v20, %v743_v28 }
 0x1dd   : > { %v747_v34 = vpop.f32.mrb[27].mxu0  ;;  %v1271_v35 = vmax.f32 %v1207_v29, 0.0  ;;  %v1209_v36 = vadd.f32 %v3265_v18, %v745_v30 }
 0x1de   : > { %2020 = vst [vmem:[%s3281_s12 + $0x58] sm:$0xff] %v2407_v31  ;;  %v1272_v38 = vmax.f32 %v1208_v32, 0.0  ;;  %v1210_v39 = vadd.f32 %v3267_v20, %v747_v34  ;;  %v1610_v55 = vpop.f32.mrb[32].mxu1 }
 0x1df   : > { %v1713_v41 = vadd.f32 %v1590_v10, %v1271_v35  ;;  %v1273_v42 = vmax.f32 %v1209_v36, 0.0  ;;  %v1612_v59 = vpop.f32.mrb[33].mxu1 }
 0x1e0   : > { %v1714_v44 = vadd.f32 %v1592_v14, %v1272_v38  ;;  %v1274_v45 = vmax.f32 %v1210_v39, 0.0  ;;  %v1614_v62 = vpop.f32.mrb[34].mxu1 }
 0x1e1   : > { %1777 = vst [vmem:[%s3275_s14 + $0xc0] sm:$0xff] %v1713_v41  ;;  %v1715_v46 = vadd.f32 %v1594_v17, %v1273_v42  ;;  %v1616_v2 = vpop.f32.mrb[35].mxu1 }
 0x1e2   : > { %v751_v47 = vpop.f32.mrb[28].mxu0  ;;  %1778 = vst [vmem:[%s3275_s14 + $0xc8] sm:$0xff] %v1714_v44  ;;  %v2408_v48 = vpack.c.bf16 %v1714_v44, %v1713_v41  ;;  %v1716_v49 = vadd.f32 %v1596_v21, %v1274_v45 }
 0x1e3   : > { %v753_v50 = vpop.f32.mrb[29].mxu0  ;;  %1779 = vst [vmem:[%s3275_s14 + $0xd0] sm:$0xff] %v1715_v46  ;;  %v1211_v51 = vadd.f32 %v3265_v18, %v751_v47 }
 0x1e4   : > { %v755_v52 = vpop.f32.mrb[30].mxu0  ;;  %2021 = vst [vmem:[%s3281_s12 + $0x60] sm:$0xff] %v2408_v48  ;;  %1780 = vst [vmem:[%s3275_s14 + $0xd8] sm:$0xff] %v1716_v49  ;;  %v2409_v53 = vpack.c.bf16 %v1716_v49, %v1715_v46  ;;  %v1212_v54 = vadd.f32 %v3267_v20, %v753_v50 }
 0x1e5   : > { %v757_v56 = vpop.f32.mrb[31].mxu0  ;;  %v1275_v57 = vmax.f32 %v1211_v51, 0.0  ;;  %v1213_v58 = vadd.f32 %v3265_v18, %v755_v52 }
 0x1e6   : > { %2022 = vst [vmem:[%s3281_s12 + $0x68] sm:$0xff] %v2409_v53  ;;  %v1276_v60 = vmax.f32 %v1212_v54, 0.0  ;;  %v1214_v61 = vadd.f32 %v3267_v20, %v757_v56  ;;  %v1620_v14 = vpop.f32.mrb[36].mxu1 }
 0x1e7   : > { %v1717_v63 = vadd.f32 %v1600_v33, %v1275_v57  ;;  %v1277_v1 = vmax.f32 %v1213_v58, 0.0  ;;  %v1622_v19 = vpop.f32.mrb[37].mxu1 }
 0x1e8   : > { %v1718_v3 = vadd.f32 %v1602_v37, %v1276_v60  ;;  %v1278_v4 = vmax.f32 %v1214_v61, 0.0  ;;  %v1624_v22 = vpop.f32.mrb[38].mxu1 }
 0x1e9   : > { %1781 = vst [vmem:[%s3275_s14 + $0xe0] sm:$0xff] %v1717_v63  ;;  %v1719_v5 = vadd.f32 %v1604_v40, %v1277_v1  ;;  %v1626_v25 = vpop.f32.mrb[39].mxu1 }
 0x1ea   : > { %v761_v6 = vpop.f32.mrb[32].mxu0  ;;  %1782 = vst [vmem:[%s3275_s14 + $0xe8] sm:$0xff] %v1718_v3  ;;  %v2410_v7 = vpack.c.bf16 %v1718_v3, %v1717_v63  ;;  %v1720_v8 = vadd.f32 %v1606_v43, %v1278_v4 }
 0x1eb   : > { %v763_v9 = vpop.f32.mrb[33].mxu0  ;;  %1783 = vst [vmem:[%s3275_s14 + $0xf0] sm:$0xff] %v1719_v5  ;;  %v1215_v10 = vadd.f32 %v3265_v18, %v761_v6 }
 0x1ec   : > { %v765_v11 = vpop.f32.mrb[34].mxu0  ;;  %2023 = vst [vmem:[%s3281_s12 + $0x70] sm:$0xff] %v2410_v7  ;;  %1784 = vst [vmem:[%s3275_s14 + $0xf8] sm:$0xff] %v1720_v8  ;;  %v2411_v12 = vpack.c.bf16 %v1720_v8, %v1719_v5  ;;  %v1216_v13 = vadd.f32 %v3267_v20, %v763_v9 }
 0x1ed   : > { %v767_v15 = vpop.f32.mrb[35].mxu0  ;;  %v1279_v16 = vmax.f32 %v1215_v10, 0.0  ;;  %v1217_v17 = vadd.f32 %v3265_v18, %v765_v11 }
 0x1ee   : > { %2024 = vst [vmem:[%s3281_s12 + $0x78] sm:$0xff] %v2411_v12  ;;  %v1280_v0 = vmax.f32 %v1216_v13, 0.0  ;;  %v1218_v21 = vadd.f32 %v3267_v20, %v767_v15  ;;  %v1630_v37 = vpop.f32.mrb[40].mxu1 }
 0x1ef   : > { %v1721_v23 = vadd.f32 %v1610_v55, %v1279_v16  ;;  %v1281_v24 = vmax.f32 %v1217_v17, 0.0  ;;  %v1632_v41 = vpop.f32.mrb[41].mxu1 }
 0x1f0   : > { %v1722_v26 = vadd.f32 %v1612_v59, %v1280_v0  ;;  %v1282_v27 = vmax.f32 %v1218_v21, 0.0  ;;  %v1634_v44 = vpop.f32.mrb[42].mxu1 }
 0x1f1   : > { %1785 = vst [vmem:[%s3275_s14 + $0x100] sm:$0xff] %v1721_v23  ;;  %v1723_v28 = vadd.f32 %v1614_v62, %v1281_v24  ;;  %v1636_v47 = vpop.f32.mrb[43].mxu1 }
 0x1f2   : > { %v771_v29 = vpop.f32.mrb[36].mxu0  ;;  %1786 = vst [vmem:[%s3275_s14 + $0x108] sm:$0xff] %v1722_v26  ;;  %v2412_v30 = vpack.c.bf16 %v1722_v26, %v1721_v23  ;;  %v1724_v31 = vadd.f32 %v1616_v2, %v1282_v27 }
 0x1f3   : > { %v773_v32 = vpop.f32.mrb[37].mxu0  ;;  %1787 = vst [vmem:[%s3275_s14 + $0x110] sm:$0xff] %v1723_v28  ;;  %v1219_v33 = vadd.f32 %v3265_v18, %v771_v29 }
 0x1f4   : > { %v775_v34 = vpop.f32.mrb[38].mxu0  ;;  %2025 = vst [vmem:[%s3281_s12 + $0x80] sm:$0xff] %v2412_v30  ;;  %1788 = vst [vmem:[%s3275_s14 + $0x118] sm:$0xff] %v1724_v31  ;;  %v2413_v35 = vpack.c.bf16 %v1724_v31, %v1723_v28  ;;  %v1220_v36 = vadd.f32 %v3267_v20, %v773_v32 }
 0x1f5   : > { %v777_v38 = vpop.f32.mrb[39].mxu0  ;;  %v1283_v39 = vmax.f32 %v1219_v33, 0.0  ;;  %v1221_v40 = vadd.f32 %v3265_v18, %v775_v34 }
 0x1f6   : > { %2026 = vst [vmem:[%s3281_s12 + $0x88] sm:$0xff] %v2413_v35  ;;  %v1284_v42 = vmax.f32 %v1220_v36, 0.0  ;;  %v1222_v43 = vadd.f32 %v3267_v20, %v777_v38  ;;  %v1640_v59 = vpop.f32.mrb[44].mxu1 }
 0x1f7   : > { %v1725_v45 = vadd.f32 %v1620_v14, %v1283_v39  ;;  %v1285_v46 = vmax.f32 %v1221_v40, 0.0  ;;  %v1642_v63 = vpop.f32.mrb[45].mxu1 }
 0x1f8   : > { %v1726_v48 = vadd.f32 %v1622_v19, %v1284_v42  ;;  %v1286_v49 = vmax.f32 %v1222_v43, 0.0  ;;  %v1644_v3 = vpop.f32.mrb[46].mxu1 }
 0x1f9   : > { %1789 = vst [vmem:[%s3275_s14 + $0x120] sm:$0xff] %v1725_v45  ;;  %v1727_v50 = vadd.f32 %v1624_v22, %v1285_v46  ;;  %v1646_v6 = vpop.f32.mrb[47].mxu1 }
 0x1fa   : > { %v781_v51 = vpop.f32.mrb[40].mxu0  ;;  %1790 = vst [vmem:[%s3275_s14 + $0x128] sm:$0xff] %v1726_v48  ;;  %v2414_v52 = vpack.c.bf16 %v1726_v48, %v1725_v45  ;;  %v1728_v53 = vadd.f32 %v1626_v25, %v1286_v49 }
 0x1fb   : > { %v783_v54 = vpop.f32.mrb[41].mxu0  ;;  %1791 = vst [vmem:[%s3275_s14 + $0x130] sm:$0xff] %v1727_v50  ;;  %v1223_v55 = vadd.f32 %v3265_v18, %v781_v51 }
 0x1fc   : > { %v785_v56 = vpop.f32.mrb[42].mxu0  ;;  %2027 = vst [vmem:[%s3281_s12 + $0x90] sm:$0xff] %v2414_v52  ;;  %1792 = vst [vmem:[%s3275_s14 + $0x138] sm:$0xff] %v1728_v53  ;;  %v2415_v57 = vpack.c.bf16 %v1728_v53, %v1727_v50  ;;  %v1224_v58 = vadd.f32 %v3267_v20, %v783_v54 }
 0x1fd   : > { %v787_v60 = vpop.f32.mrb[43].mxu0  ;;  %v1287_v61 = vmax.f32 %v1223_v55, 0.0  ;;  %v1225_v62 = vadd.f32 %v3265_v18, %v785_v56 }
 0x1fe   : > { %2028 = vst [vmem:[%s3281_s12 + $0x98] sm:$0xff] %v2415_v57  ;;  %v1288_v1 = vmax.f32 %v1224_v58, 0.0  ;;  %v1226_v2 = vadd.f32 %v3267_v20, %v787_v60  ;;  %v1650_v19 = vpop.f32.mrb[48].mxu1 }
 0x1ff   : > { %v1729_v4 = vadd.f32 %v1630_v37, %v1287_v61  ;;  %v1289_v5 = vmax.f32 %v1225_v62, 0.0  ;;  %v1652_v23 = vpop.f32.mrb[49].mxu1 }
 0x200   : > { %v1730_v7 = vadd.f32 %v1632_v41, %v1288_v1  ;;  %v1290_v8 = vmax.f32 %v1226_v2, 0.0  ;;  %v1654_v26 = vpop.f32.mrb[50].mxu1 }
 0x201   : > { %1793 = vst [vmem:[%s3275_s14 + $0x140] sm:$0xff] %v1729_v4  ;;  %v1731_v9 = vadd.f32 %v1634_v44, %v1289_v5  ;;  %v1656_v29 = vpop.f32.mrb[51].mxu1 }
 0x202   : > { %v791_v10 = vpop.f32.mrb[44].mxu0  ;;  %1794 = vst [vmem:[%s3275_s14 + $0x148] sm:$0xff] %v1730_v7  ;;  %v2416_v11 = vpack.c.bf16 %v1730_v7, %v1729_v4  ;;  %v1732_v12 = vadd.f32 %v1636_v47, %v1290_v8 }
 0x203   : > { %v793_v13 = vpop.f32.mrb[45].mxu0  ;;  %1795 = vst [vmem:[%s3275_s14 + $0x150] sm:$0xff] %v1731_v9  ;;  %v1227_v14 = vadd.f32 %v3265_v18, %v791_v10 }
 0x204   : > { %v795_v15 = vpop.f32.mrb[46].mxu0  ;;  %2029 = vst [vmem:[%s3281_s12 + $0xa0] sm:$0xff] %v2416_v11  ;;  %1796 = vst [vmem:[%s3275_s14 + $0x158] sm:$0xff] %v1732_v12  ;;  %v2417_v16 = vpack.c.bf16 %v1732_v12, %v1731_v9  ;;  %v1228_v17 = vadd.f32 %v3267_v20, %v793_v13 }
 0x205   : > { %v797_v0 = vpop.f32.mrb[47].mxu0  ;;  %v1291_v21 = vmax.f32 %v1227_v14, 0.0  ;;  %v1229_v22 = vadd.f32 %v3265_v18, %v795_v15 }
 0x206   : > { %2030 = vst [vmem:[%s3281_s12 + $0xa8] sm:$0xff] %v2417_v16  ;;  %v1292_v24 = vmax.f32 %v1228_v17, 0.0  ;;  %v1230_v25 = vadd.f32 %v3267_v20, %v797_v0  ;;  %v1660_v41 = vpop.f32.mrb[52].mxu1 }
 0x207   : > { %v1733_v27 = vadd.f32 %v1640_v59, %v1291_v21  ;;  %v1293_v28 = vmax.f32 %v1229_v22, 0.0  ;;  %v1662_v45 = vpop.f32.mrb[53].mxu1 }
 0x208   : > { %v1734_v30 = vadd.f32 %v1642_v63, %v1292_v24  ;;  %v1294_v31 = vmax.f32 %v1230_v25, 0.0  ;;  %v1664_v48 = vpop.f32.mrb[54].mxu1 }
 0x209   : > { %1797 = vst [vmem:[%s3275_s14 + $0x160] sm:$0xff] %v1733_v27  ;;  %v1735_v32 = vadd.f32 %v1644_v3, %v1293_v28  ;;  %v1666_v51 = vpop.f32.mrb[55].mxu1 }
 0x20a   : > { %v801_v33 = vpop.f32.mrb[48].mxu0  ;;  %1798 = vst [vmem:[%s3275_s14 + $0x168] sm:$0xff] %v1734_v30  ;;  %v2418_v34 = vpack.c.bf16 %v1734_v30, %v1733_v27  ;;  %v1736_v35 = vadd.f32 %v1646_v6, %v1294_v31 }
 0x20b   : > { %v803_v36 = vpop.f32.mrb[49].mxu0  ;;  %1799 = vst [vmem:[%s3275_s14 + $0x170] sm:$0xff] %v1735_v32  ;;  %v1231_v37 = vadd.f32 %v3265_v18, %v801_v33 }
 0x20c   : > { %v805_v38 = vpop.f32.mrb[50].mxu0  ;;  %2031 = vst [vmem:[%s3281_s12 + $0xb0] sm:$0xff] %v2418_v34  ;;  %1800 = vst [vmem:[%s3275_s14 + $0x178] sm:$0xff] %v1736_v35  ;;  %v2419_v39 = vpack.c.bf16 %v1736_v35, %v1735_v32  ;;  %v1232_v40 = vadd.f32 %v3267_v20, %v803_v36 }
 0x20d   : > { %v807_v42 = vpop.f32.mrb[51].mxu0  ;;  %v1295_v43 = vmax.f32 %v1231_v37, 0.0  ;;  %v1233_v44 = vadd.f32 %v3265_v18, %v805_v38 }
 0x20e   : > { %2032 = vst [vmem:[%s3281_s12 + $0xb8] sm:$0xff] %v2419_v39  ;;  %v1296_v46 = vmax.f32 %v1232_v40, 0.0  ;;  %v1234_v47 = vadd.f32 %v3267_v20, %v807_v42  ;;  %v1670_v63 = vpop.f32.mrb[56].mxu1 }
 0x20f   : > { %v1737_v49 = vadd.f32 %v1650_v19, %v1295_v43  ;;  %v1297_v50 = vmax.f32 %v1233_v44, 0.0  ;;  %v1672_v4 = vpop.f32.mrb[57].mxu1 }
 0x210   : > { %v1738_v52 = vadd.f32 %v1652_v23, %v1296_v46  ;;  %v1298_v53 = vmax.f32 %v1234_v47, 0.0  ;;  %v1674_v7 = vpop.f32.mrb[58].mxu1 }
 0x211   : > { %1801 = vst [vmem:[%s3275_s14 + $0x180] sm:$0xff] %v1737_v49  ;;  %v1739_v54 = vadd.f32 %v1654_v26, %v1297_v50  ;;  %v1676_v10 = vpop.f32.mrb[59].mxu1 }
 0x212   : > { %v811_v55 = vpop.f32.mrb[52].mxu0  ;;  %1802 = vst [vmem:[%s3275_s14 + $0x188] sm:$0xff] %v1738_v52  ;;  %v2420_v56 = vpack.c.bf16 %v1738_v52, %v1737_v49  ;;  %v1740_v57 = vadd.f32 %v1656_v29, %v1298_v53 }
 0x213   : > { %v813_v58 = vpop.f32.mrb[53].mxu0  ;;  %1803 = vst [vmem:[%s3275_s14 + $0x190] sm:$0xff] %v1739_v54  ;;  %v1235_v59 = vadd.f32 %v3265_v18, %v811_v55 }
 0x214   : > { %v815_v60 = vpop.f32.mrb[54].mxu0  ;;  %2033 = vst [vmem:[%s3281_s12 + $0xc0] sm:$0xff] %v2420_v56  ;;  %1804 = vst [vmem:[%s3275_s14 + $0x198] sm:$0xff] %v1740_v57  ;;  %v2421_v61 = vpack.c.bf16 %v1740_v57, %v1739_v54  ;;  %v1236_v62 = vadd.f32 %v3267_v20, %v813_v58 }
 0x215   : > { %v817_v1 = vpop.f32.mrb[55].mxu0  ;;  %v1299_v2 = vmax.f32 %v1235_v59, 0.0  ;;  %v1237_v3 = vadd.f32 %v3265_v18, %v815_v60 }
 0x216   : > { %2034 = vst [vmem:[%s3281_s12 + $0xc8] sm:$0xff] %v2421_v61  ;;  %v1300_v5 = vmax.f32 %v1236_v62, 0.0  ;;  %v1238_v6 = vadd.f32 %v3267_v20, %v817_v1  ;;  %v1680_v23 = vpop.f32.mrb[60].mxu1 }
 0x217   : > { %v1741_v8 = vadd.f32 %v1660_v41, %v1299_v2  ;;  %v1301_v9 = vmax.f32 %v1237_v3, 0.0  ;;  %v1682_v27 = vpop.f32.mrb[61].mxu1 }
 0x218   : > { %v1742_v11 = vadd.f32 %v1662_v45, %v1300_v5  ;;  %v1302_v12 = vmax.f32 %v1238_v6, 0.0  ;;  %v1684_v30 = vpop.f32.mrb[62].mxu1 }
 0x219   : > { %1805 = vst [vmem:[%s3275_s14 + $0x1a0] sm:$0xff] %v1741_v8  ;;  %v1743_v13 = vadd.f32 %v1664_v48, %v1301_v9  ;;  %v1686_v33 = vpop.f32.mrb[63].mxu1 }
 0x21a   : > { %v821_v14 = vpop.f32.mrb[56].mxu0  ;;  %1806 = vst [vmem:[%s3275_s14 + $0x1a8] sm:$0xff] %v1742_v11  ;;  %v2422_v15 = vpack.c.bf16 %v1742_v11, %v1741_v8  ;;  %v1744_v16 = vadd.f32 %v1666_v51, %v1302_v12 }
 0x21b   : > { %v823_v17 = vpop.f32.mrb[57].mxu0  ;;  %1807 = vst [vmem:[%s3275_s14 + $0x1b0] sm:$0xff] %v1743_v13  ;;  %v1239_v19 = vadd.f32 %v3265_v18, %v821_v14 }
 0x21c   : > { %v825_v0 = vpop.f32.mrb[58].mxu0  ;;  %2035 = vst [vmem:[%s3281_s12 + $0xd0] sm:$0xff] %v2422_v15  ;;  %1808 = vst [vmem:[%s3275_s14 + $0x1b8] sm:$0xff] %v1744_v16  ;;  %v2423_v21 = vpack.c.bf16 %v1744_v16, %v1743_v13  ;;  %v1240_v22 = vadd.f32 %v3267_v20, %v823_v17 }
 0x21d   : > { %v827_v24 = vpop.f32.mrb[59].mxu0  ;;  %v1303_v25 = vmax.f32 %v1239_v19, 0.0  ;;  %v1241_v26 = vadd.f32 %v3265_v18, %v825_v0 }
 0x21e   : > { %2036 = vst [vmem:[%s3281_s12 + $0xd8] sm:$0xff] %v2423_v21  ;;  %v1304_v28 = vmax.f32 %v1240_v22, 0.0  ;;  %v1242_v29 = vadd.f32 %v3267_v20, %v827_v24 }
 0x21f   : > { %v1745_v31 = vadd.f32 %v1670_v63, %v1303_v25  ;;  %v1305_v32 = vmax.f32 %v1241_v26, 0.0 }
 0x220   : > { %v1746_v34 = vadd.f32 %v1672_v4, %v1304_v28  ;;  %v1306_v35 = vmax.f32 %v1242_v29, 0.0 }
 0x221   : > { %1809 = vst [vmem:[%s3275_s14 + $0x1c0] sm:$0xff] %v1745_v31  ;;  %v1747_v36 = vadd.f32 %v1674_v7, %v1305_v32 }
 0x222   : > { %v831_v37 = vpop.f32.mrb[60].mxu0  ;;  %1810 = vst [vmem:[%s3275_s14 + $0x1c8] sm:$0xff] %v1746_v34  ;;  %v2424_v38 = vpack.c.bf16 %v1746_v34, %v1745_v31  ;;  %v1748_v39 = vadd.f32 %v1676_v10, %v1306_v35 }
 0x223   : > { %v833_v40 = vpop.f32.mrb[61].mxu0  ;;  %1811 = vst [vmem:[%s3275_s14 + $0x1d0] sm:$0xff] %v1747_v36  ;;  %v1243_v41 = vadd.f32 %v3265_v18, %v831_v37 }
 0x224   : > { %v835_v42 = vpop.f32.mrb[62].mxu0  ;;  %2037 = vst [vmem:[%s3281_s12 + $0xe0] sm:$0xff] %v2424_v38  ;;  %1812 = vst [vmem:[%s3275_s14 + $0x1d8] sm:$0xff] %v1748_v39  ;;  %v2425_v43 = vpack.c.bf16 %v1748_v39, %v1747_v36  ;;  %v1244_v44 = vadd.f32 %v3267_v20, %v833_v40 }
 0x225   : > { %v837_v45 = vpop.f32.mrb[63].mxu0  ;;  %v1307_v46 = vmax.f32 %v1243_v41, 0.0  ;;  %v1245_v47 = vadd.f32 %v3265_v18, %v835_v42 }
 0x226   : > { %2038 = vst [vmem:[%s3281_s12 + $0xe8] sm:$0xff] %v2425_v43  ;;  %v1308_v48 = vmax.f32 %v1244_v44, 0.0  ;;  %v1246_v49 = vadd.f32 %v3267_v20, %v837_v45 }
 0x227   : > { %v1749_v50 = vadd.f32 %v1680_v23, %v1307_v46  ;;  %v1309_v51 = vmax.f32 %v1245_v47, 0.0 }
 0x228   : > { %v1750_v52 = vadd.f32 %v1682_v27, %v1308_v48  ;;  %v1310_v53 = vmax.f32 %v1246_v49, 0.0 }
 0x229   : > { %1813 = vst [vmem:[%s3275_s14 + $0x1e0] sm:$0xff] %v1749_v50  ;;  %v1751_v18 = vadd.f32 %v1684_v30, %v1309_v51 }
 0x22a   : > { %1814 = vst [vmem:[%s3275_s14 + $0x1e8] sm:$0xff] %v1750_v52  ;;  %v2426_v20 = vpack.c.bf16 %v1750_v52, %v1749_v50  ;;  %v1752_v54 = vadd.f32 %v1686_v33, %v1310_v53 }
 0x22b   : > { %1815 = vst [vmem:[%s3275_s14 + $0x1f0] sm:$0xff] %v1751_v18 }
 0x22c   : > { %2039 = vst [vmem:[%s3281_s12 + $0xf0] sm:$0xff] %v2426_v20  ;;  %1816 = vst [vmem:[%s3275_s14 + $0x1f8] sm:$0xff] %v1752_v54  ;;  %v2427_v55 = vpack.c.bf16 %v1752_v54, %v1751_v18 }
 0x22d   : > { %2759 = shalt.err (!%p2756_p12)
}
 0x22e   : > { %s2760_s0 = scalar_lea.hbm %s3434_s11, 8192  ;;  %s2764_s7 = scalar_lea.hbm %s3529_s5, 16384 }
 0x22f   : > { %p2761_p3 = scmp.ne.s32.totalorder %s3434_s11, %s2760_s0  ;;  %p2765_p5 = scmp.lt.u32.totalorder %s3434_s11, %s3529_s5 }
 0x230   : > { %p2766_p9 = scmp.lt.u32.totalorder %s2764_s7, %s2760_s0  ;;  %p2768_p11 = scmp.lt.u32.totalorder %s2760_s0, %s3434_s11 }
 0x231   : > { %p2762_p0 = pnand %p2761_p3, %p3577_p4 }
 0x232   : > { %p2767_p2 = por %p2766_p9, %p2765_p5 }
 0x233   : > { %p2763_p10 = pneg %p2762_p0 }
 0x234   : > { %p2769_p6 = por %p2768_p11, %p2767_p2 }
 0x236   : > { %p2770_p13 = pnand %p2769_p6, %p2763_p10 }
 0x238   : > { %2773 = shalt.err (!%p2770_p13)
}
 0x239   : > { %s2887_s14 = smov 256   ;;  %s2888_s13 = smov 16   ;;  %2040 = vst [vmem:[%s3281_s12 + $0xf8] sm:$0xff] %v2427_v55 }
 0x23a   : > { %2448 = dma.vmem_to_hbm [thread:$0]  (%p3577_p4), %s3439_s20, 8192, %s3434_s11, %s2042_s24, %s2887_s14, %s2887_s14, %s2888_s13  }
 0x23b   : > { %s2047_s21 = scalar_lea.sflag [#allocation13], %s3162_s15  ;;  %s2774_s10 = scalar_lea.vmem %s3448_s9, 4096 }
 0x23c   : > { %p2775_p7 = scmp.ne.s32.totalorder %s3448_s9, %s2774_s10  ;;  %s2889_s25 = smov [#allocation12]  }
 0x23d   : > { %s2778_s23 = sshll.u32 %s2889_s25, 4  ;;  %s2779_s23 = int_to_ptr.vmem [resolvable:$false] %s2778_s23 }
 0x23e   : > { %p2776_p1 = pnand %p2775_p7, %p3577_p4  ;;  %s2780_s30 = scalar_lea.vmem %s2779_s23, 8192 }
 0x23f   : > { %p2781_p12 = scmp.lt.s32.totalorder %s3448_s9, %s2779_s23  ;;  %p2782_p3 = scmp.lt.s32.totalorder %s2780_s30, %s2774_s10 }
 0x240   : > { %p2777_p8 = pneg %p2776_p1 }
 0x241   : > { %p2783_p0 = por %p2782_p3, %p2781_p12 }
 0x243   : > { %p2784_p10 = pnand %p2783_p0, %p2777_p8 }
 0x245   : > { %2787 = shalt.err (!%p2784_p10)
}
 0x246   : > { %s2788_s12 = scalar_lea.hbm %s3446_s19, 4096  ;;  %s2792_s24 = scalar_lea.hbm %s3530_s6, 8192 }
 0x247   : > { %p2789_p5 = scmp.ne.s32.totalorder %s3446_s19, %s2788_s12  ;;  %p2793_p11 = scmp.lt.u32.totalorder %s3446_s19, %s3530_s6 }
 0x248   : > { %p2794_p6 = scmp.lt.u32.totalorder %s2792_s24, %s2788_s12  ;;  %p2796_p7 = scmp.lt.u32.totalorder %s2788_s12, %s3446_s19 }
 0x249   : > { %p2790_p9 = pnand %p2789_p5, %p3577_p4 }
 0x24a   : > { %p2795_p13 = por %p2794_p6, %p2793_p11 }
 0x24b   : > { %p2791_p2 = pneg %p2790_p9 }
 0x24c   : > { %p2797_p1 = por %p2796_p7, %p2795_p13 }
 0x24e   : > { %p2798_p8 = pnand %p2797_p1, %p2791_p2 }
 0x250   : > { %2801 = shalt.err (!%p2798_p8)
}
 0x251   : > { %s2890_s1 = smov 128   ;;  %s2891_s28 = smov 8  }
 0x252   : > { %2449 = dma.vmem_to_hbm [thread:$0]  (%p3577_p4), %s3448_s9, 4096, %s3446_s19, %s2047_s21, %s2890_s1, %s2890_s1, %s2891_s28  }
 0x253 PF: > { %s3578_s0 = sld [smem:[#allocation20_spill]]  ;;  %s3579_s18 = sld [smem:[#allocation24_spill]] }
 0x254   : > { %s3580_s17 = sld [smem:[#allocation23_spill]] }
 0x259   : > { %s2097_s7 = sand.u32 1, %s3578_s0   ;;  %p3581_p12 = scmp.ne.s32.totalorder %s3579_s18, 0 }
 0x25a   : > { %p3582_p3 = scmp.ge.s32.totalorder %s3580_s17, 2  ;;  %s2098_s27 = scalar_lea.sflag [#allocation4], %s2097_s7 }
 0x25c   : > { %p2470_p0 = pnand %p3582_p3, %p3581_p12 }
 0x25e   : > { %2843 = dma.done.wait (!%p2470_p0), %s2098_s27, 8192  }
 0x25f   : > { %2845 = vsyncadd (!%p2470_p0), %s2098_s27, 4294959104  ;;  %s2107_s29 = scalar_lea.sflag [#allocation13], %s2097_s7 }
 0x260   : > { %2847 = dma.done.wait (!%p2470_p0), %s2107_s29, 4096  }
 0x261   : > { %2849 = vsyncadd (!%p2470_p0), %s2107_s29, 4294963200  ;;  %s28_s26 = sadd.s32 1, %s3580_s17   ;;  %s3583_s16 = sld [smem:[#allocation21_spill]] }
 0x262   : > { %p25_p10 = scmp.ge.s32.totalorder %s28_s26, 4   ;;  %s3584_s23 = sld [smem:[#allocation26_spill]] }
 0x263   : > { %s3585_s24 = sld [smem:[#allocation22_spill]]  ;;  %s3586_s25 = sld [smem:[#allocation25_spill]] }
 0x264   : > { %s3587_s21 = smov %s2856_s22  ;;  %27 = sbr.rel (!%p25_p10) target bundleno = 13 (0xd), region = 139 }
 0x267   : > { %s3588_s22 = smov %s3583_s16 }
 0x26b   :  { %2112 = vsyncpa [#allocation3], 1 }
 0x26c   :  { %2114 = vsyncpa [#allocation3 + $0x1], 1 }
 0x26d   :  { %2115 = vsyncpa [#allocation6], 1 }
 0x26e   :  { %2116 = vsyncpa [#allocation9], 1 }
 0x26f   :  { %2117 = vsyncpa [#allocation4], 1 }
 0x270   :  { %2119 = vsyncpa [#allocation4 + $0x1], 1 }
 0x271   :  { %2120 = vsyncpa [#allocation13], 1 }
 0x272   :  { %2122 = vsyncpa [#allocation13 + $0x1], 1 }

// kernel: fpn_layer_forward.3
= control target key start
LH: loop header
LB: loop body
LE: loop exit
PB: predicated region body
PF: predicated region fallthrough
CT: control target
= control target key end

     0   :  { %s9404_s0 = inlined_call_operand.hbm [shape: bf16[2,16,16,256], index: 0, kind: input, shape index: {}, may-alias: {0,1,2}]   ;;  %s9405_s1 = inlined_call_operand.hbm [shape: bf16[2,16,16,256], index: 1, kind: input, shape index: {}, may-alias: {0,1,2}]   ;;  %s9406_s2 = inlined_call_operand.hbm [shape: bf16[2,16,16,256], index: 2, kind: input, shape index: {}, may-alias: {0,1,2}]   ;;  %s9407_s3 = inlined_call_operand.hbm [shape: bf16[3,3,256,256], index: 3, kind: input, shape index: {}]   ;;  %s9408_s4 = inlined_call_operand.hbm [shape: f32[1,256], index: 4, kind: input, shape index: {}]   ;;  %s9409_s5 = inlined_call_operand.hbm [shape: f32[512,256], index: 5, kind: output, shape index: {}]  }
   0x1   :  { %9451 = sst [smem:[#allocation39_spill]] %s9404_s0 }
   0x2   :  { %9452 = sst [smem:[#allocation40_spill]] %s9405_s1 }
   0x3   :  { %9453 = sst [smem:[#allocation41_spill]] %s9406_s2 }
   0x4   :  { %9454 = sst [smem:[#allocation42_spill]] %s9407_s3 }
   0x5   :  { %9455 = sst [smem:[#allocation43_spill]] %s9408_s4 }
   0x6   :  { %9456 = sst [smem:[#allocation44_spill]] %s9409_s5 }
   0x7   :  { %10 = vsyncpa [#allocation4], 0 }
   0x8   :  { %12 = vsyncpa [#allocation4 + $0x1], 0 }
   0x9   :  { %13 = vsyncpa [#allocation7], 0 }
   0xa   :  { %15 = vsyncpa [#allocation7 + $0x1], 0 }
   0xb   :  { %16 = vsyncpa [#allocation10], 0 }
   0xc   :  { %17 = vsyncpa [#allocation5], 0 }
   0xd   :  { %19 = vsyncpa [#allocation5 + $0x1], 0  ;;  %s7689_s18 = smov 0   ;;  %s7691_s19 = smov 0  }
   0xe   :  { %s7693_s20 = smov 0   ;;  %s7695_s21 = smov 0  }
   0xf   :  { %s7697_s22 = smov 0   ;;  %s7699_s23 = smov 0  }
  0x10   :  { %s7701_s24 = smov 0   ;;  %s7703_s25 = smov 0  }
  0x11   :  { %s7705_s26 = smov 0   ;;  %s7707_s27 = smov 0  }
  0x12   :  { %s7709_s28 = smov 0   ;;  %s7711_s29 = smov 0  }
  0x13   :  { %s7713_s30 = smov 0   ;;  %s7715_s6 = smov 0  }
  0x14   :  { %s7717_s7 = smov 0   ;;  %s7719_s8 = smov 0  }
  0x15   :  { %s7721_s9 = smov 0  }
  0x16 LB: > { %9457 = sst [smem:[#allocation18_spill]] %s7581_s18  ;;  %s7775_s10 = sadd.s32 4294967295, %s7645_s9   ;;  %s7645_s9 = sphi %s7721_s9, %s25_s9   ;;  %s7641_s8 = sphi %s7719_s8, %s9585_s8   ;;  %s7637_s7 = sphi %s7717_s7, %s9598_s7   ;;  %s7633_s6 = sphi %s7715_s6, %s9583_s6   ;;  %s7629_s30 = sphi %s7713_s30, %s9597_s30   ;;  %s7625_s29 = sphi %s7711_s29, %s9596_s29   ;;  %s7621_s28 = sphi %s7709_s28, %s9595_s28   ;;  %s7617_s27 = sphi %s7707_s27, %s9594_s27   ;;  %s7613_s26 = sphi %s7705_s26, %s9593_s26   ;;  %s7609_s25 = sphi %s7703_s25, %s9592_s25   ;;  %s7605_s24 = sphi %s7701_s24, %s9591_s24   ;;  %s7601_s23 = sphi %s7699_s23, %s9590_s23   ;;  %s7597_s22 = sphi %s7697_s22, %s9579_s22   ;;  %s7593_s21 = sphi %s7695_s21, %s9589_s21   ;;  %s7589_s20 = sphi %s7693_s20, %s9588_s20   ;;  %s7585_s19 = sphi %s7691_s19, %s9586_s19   ;;  %s7581_s18 = sphi %s7689_s18, %s9577_s18  }
  0x17   : > { %9458 = sst [smem:[#allocation19_spill]] %s7585_s19  ;;  %s5856_s11 = sadd.s32 4294967294, %s7645_s9  }
  0x18   : > { %9459 = sst [smem:[#allocation20_spill]] %s7593_s21  ;;  %p9415_p0 = scmp.eq.s32.totalorder %s7775_s10, 0 }
  0x19   : > { %9460 = sst [smem:[#allocation21_spill]] %s7597_s22  ;;  %p218_p1 = scmp.ne.s32.totalorder %s7589_s20, %s7585_s19 }
  0x1a   : > { %9461 = sst [smem:[#allocation22_spill]] %s7601_s23  ;;  %p219_p2 = scmp.eq.s32.totalorder %s7775_s10, 3 }
  0x1b   : > { %9462 = sst [smem:[#allocation23_spill]] %s7609_s25  ;;  %p224_p3 = scmp.ne.s32.totalorder %s7585_s19, %s7581_s18 }
  0x1c   : > { %9463 = sst [smem:[#allocation24_spill]] %s7629_s30  ;;  %p225_p4 = scmp.eq.s32.totalorder %s5856_s11, 3 }
  0x1d   : > { %9464 = sst [smem:[#allocation25_spill]] %s7633_s6  ;;  %p7785_p5 = por %p219_p2, %p218_p1 }
  0x1e   : > { %9465 = sst [smem:[#allocation26_spill]] %s7641_s8  ;;  %p5865_p6 = scmp.ge.s32.totalorder %s7645_s9, 1 }
  0x1f   : > { %9466 = sst [smem:[#allocation27_spill]] %s7775_s10  ;;  %p7790_p7 = por %p225_p4, %p224_p3 }
  0x20   : > { %s9467_s13 = scalar_select %p7785_p5, 1, 0 }
  0x21   : > { %s9469_s14 = scalar_select %p7790_p7, 1, 0 }
  0x22   : > { %9468 = sst [smem:[#allocation28_spill]] %s9467_s13  ;;  %p232_p8 = scmp.lt.s32.totalorder %s7645_s9, 5 }
  0x23   : > { %9470 = sst [smem:[#allocation29_spill]] %s9469_s14  ;;  %s7647_s16 = smov [#allocation9]  }
  0x24   : > { %p7795_p9 = pnand %p5865_p6, %p232_p8  ;;  %s248_s17 = sshll.u32 %s7647_s16, 4  ;;  %s249_s17 = int_to_ptr.vmem [resolvable:$true] %s248_s17 }
  0x25   : > { %s9474_s3 = sld [smem:[#allocation42_spill]] }
  0x26   : > { %s9471_s15 = scalar_select %p7795_p9, 1, 0 }
  0x27   : > { %p6672_p10 = pneg %p7795_p9 }
  0x28   : > { %9472 = sst [smem:[#allocation30_spill]] %s9471_s15 }
  0x29   : > { %p7803_p11 = pnand %p6672_p10, %p9415_p0 }
  0x2b   : > { %s7317_s14 = scalar_lea.hbm %s9474_s3, 36864  ;;  %p9443_p13 = pneg %p7803_p11 }
  0x2c   : > { %p7318_p12 = scmp.ne.s32.totalorder %s9474_s3, %s7317_s14  ;;  %p7324_p3 = scmp.lt.u32.totalorder %s7317_s14, %s9474_s3 }
  0x2e   : > { %p7320_p1 = pnand %p9443_p13, %p7318_p12 }
  0x30   : > { %p7321_p2 = pneg %p7320_p1 }
  0x32   : > { %p7326_p4 = pnand %p7324_p3, %p7321_p2 }
  0x34   : > { %7329 = shalt.err (!%p7326_p4)
}
  0x35   : > { %s7330_s18 = scalar_lea.vmem %s249_s17, 36864  ;;  %p7338_p0 = scmp.lt.s32.totalorder %s249_s17, %s249_s17 }
  0x36   : > { %p7331_p6 = scmp.ne.s32.totalorder %s249_s17, %s7330_s18  ;;  %p7339_p7 = scmp.lt.s32.totalorder %s7330_s18, %s7330_s18 }
  0x38   : > { %p7333_p8 = pnand %p7331_p6, %p9443_p13  ;;  %p7340_p5 = por %p7339_p7, %p7338_p0 }
  0x3a   : > { %p7334_p10 = pneg %p7333_p8 }
  0x3c   : > { %p7341_p9 = pnand %p7340_p5, %p7334_p10 }
  0x3e   : > { %7344 = shalt.err (!%p7341_p9)
}
  0x3f   : > { %s9420_s5 = smov 128   ;;  %s9422_s6 = smov 8  }
  0x40   : > { %6675 = dma.hbm_to_vmem [thread:$0]  (!%p7803_p11), %s9474_s3, 36864, %s249_s17, [#allocation10], %s9420_s5, %s9420_s5, %s9422_s6  }
  0x41   : > { %s40_s14 = sadd.s32 1, %s7637_s7  ;;  %s44_s16 = sadd.s32 1, %s7641_s8 }
  0x42   : > { %p42_p0 = scmp.ge.s32.totalorder %s40_s14, 2  ;;  %p9442_p5 = scmp.eq.s32.totalorder %s7645_s9, 0 }
  0x43   : > { %s5857_s18 = sshll.u32 %s7637_s7, 3  ;;  %s93_s12 = sadd.s32 1, %s7613_s26 }
  0x44   : > { %s9600_s14 = smov (%p42_p0, %s40_s14), 0  ;;  %s9602_s16 = smov (!%p42_p0, %s44_s16), %s7641_s8 }
  0x45   : > { %9475 = sst [smem:[#allocation31_spill]] %s9600_s14  ;;  %s49_s30 = ssub.s32 %s7637_s7, %s9600_s14 }
  0x46   : > { %s5858_s19 = sadd.s32 4294967295, %s5857_s18  ;;  %p46_p7 = scmp.ge.s32.totalorder %s9602_s16, 2 }
  0x47   : > { %p80_p9 = scmp.gt.s32.totalorder %s5858_s19, 0  ;;  %s5859_s17 = sshll.u32 %s9600_s14, 3 }
  0x48   : > { %s9604_s16 = smov (%p46_p7, %s9602_s16), 0  ;;  %s5860_s5 = sadd.s32 4294967295, %s5859_s17 }
  0x49   : > { %9476 = sst [smem:[#allocation32_spill]] %s9604_s16  ;;  %s9606_s19 = smov (!%p80_p9, %s5858_s19), 0 }
  0x4a   : > { %s7849_s13 = ssub.s32 %s7641_s8, %s9604_s16  ;;  %p84_p12 = scmp.gt.s32.totalorder %s5860_s5, 0 }
  0x4b   : > { %9477 = sst [smem:[#allocation33_spill]] %s7849_s13  ;;  %s7852_s6 = sor.u32 %s49_s30, %s7849_s13 }
  0x4c   : > { %p100_p2 = scmp.ne.s32.totalorder %s7613_s26, %s7609_s25  ;;  %s9608_s5 = smov (!%p84_p12, %s5860_s5), 0 }
  0x4d   : > { %p106_p4 = scmp.ne.s32.totalorder %s7609_s25, %s7605_s24  ;;  %s87_s15 = ssub.s32 %s9606_s19, %s9608_s5 }
  0x4e   : > { %p7859_p3 = por %p100_p2, %p9442_p5  ;;  %s7866_s30 = sadd.s32 8, %s5857_s18 }
  0x4f   : > { %9479 = sst [smem:[#allocation34_spill]] %s7866_s30  ;;  %s88_s2 = sor.u32 %s87_s15, %s7849_s13 }
  0x50   : > { %p9480_p6 = scmp.eq.s32.totalorder %s7775_s10, 0  ;;  %p91_p10 = scmp.eq.s32.totalorder %s88_s2, 0 }
  0x51   : > { %s7876_s22 = sadd.s32 8, %s5859_s17  ;;  %s5863_s24 = sshll.u32 %s7641_s8, 1 }
  0x52   : > { %p7871_p8 = por %p106_p4, %p9480_p6  ;;  %9483 = sst [smem:[#allocation36_spill]] %s7876_s22 }
  0x53   : > { %s7880_s5 = scalar_select %p91_p10, %s7613_s26, %s93_s12  }
  0x54   : > { %s9481_s21 = scalar_select %p7871_p8, 1, 0 }
  0x55   : > { %9484 = sst [smem:[#allocation37_spill]] %s7880_s5  ;;  %s202_s18 = sadd.s32 %s7637_s7, %s5863_s24 }
  0x56   : > { %9482 = sst [smem:[#allocation35_spill]] %s9481_s21  ;;  %s5864_s15 = sshll.u32 %s9604_s16, 1 }
  0x57   : > { %p9441_p9 = scmp.lt.s32.totalorder %s7645_s9, 4  ;;  %s204_s25 = sadd.s32 %s5864_s15, %s9600_s14 }
  0x58   : > { %s7888_s13 = sshll.u32 %s7641_s8, 6  ;;  %s205_s2 = ssub.s32 %s202_s18, %s204_s25 }
  0x59   : > { %s299_s21 = sand.u32 1, %s7645_s9   ;;  %p206_p12 = scmp.eq.s32.totalorder %s205_s2, 0 }
  0x5a   : > { %s301_s30 = sand.u32 1, %s7613_s26   ;;  %s5877_s17 = sshll.u32 %s9606_s19, 2 }
  0x5b   : > { %s9485_s23 = sadd.s32 1, %s7589_s20  ;;  %s5874_s12 = sshll.u32 %s301_s30, 4 }
  0x5c   : > { %s7896_s0 = scalar_select %p206_p12, %s7589_s20, %s9485_s23  }
  0x5d   : > { %s315_s5 = sadd.s32 %s5877_s17, %s7888_s13  ;;  %s9486_s1 = sld [smem:[#allocation40_spill]] }
  0x5e   : > { %s5879_s22 = sshll.u32 %s315_s5, 6  ;;  %s303_s15 = scalar_lea.vmem [#allocation6], %s5874_s12 }
  0x5f   : > { %s318_s25 = sshll.u32 %s303_s15, 4  ;;  %p7910_p2 = pnand %p9441_p9, %p7859_p3  ;;  %s7904_s25 = int_to_ptr.vmem [resolvable:$true] %s318_s25 }
  0x60   : > { %s7650_s23 = smov [#allocation11]  }
  0x61   : > { %s7914_s16 = sshll.u32 %s7650_s23, 4  ;;  %p7347_p6 = pneg %p7910_p2  ;;  %s263_s16 = int_to_ptr.vmem [resolvable:$true] %s7914_s16 }
  0x63   : > { %s7902_s10 = scalar_lea.hbm %s9486_s1, %s5879_s22  ;;  %s7916_s22 = scalar_lea.sflag [#allocation7], %s299_s21 }
  0x64   : > { %s7345_s30 = scalar_lea.hbm %s7902_s10, 256  ;;  %s7350_s18 = scalar_lea.hbm %s9486_s1, 8192 }
  0x65   : > { %p7346_p4 = scmp.ne.s32.totalorder %s7902_s10, %s7345_s30  ;;  %p7351_p3 = scmp.lt.u32.totalorder %s7902_s10, %s9486_s1 }
  0x66   : > { %p7352_p7 = scmp.lt.u32.totalorder %s7350_s18, %s7345_s30  ;;  %p7354_p9 = scmp.lt.u32.totalorder %s7345_s30, %s7902_s10 }
  0x67   : > { %p7348_p10 = pnand %p7347_p6, %p7346_p4 }
  0x68   : > { %p7353_p0 = por %p7352_p7, %p7351_p3 }
  0x69   : > { %p7349_p12 = pneg %p7348_p10 }
  0x6a   : > { %p7355_p5 = por %p7354_p9, %p7353_p0 }
  0x6c   : > { %p7356_p1 = pnand %p7355_p5, %p7349_p12 }
  0x6e   : > { %7359 = shalt.err (!%p7356_p1)
}
  0x6f   : > { %s7360_s21 = scalar_lea.vmem %s7904_s25, 256  ;;  %s7651_s12 = smov [#allocation6]  }
  0x70   : > { %p7361_p4 = scmp.ne.s32.totalorder %s7904_s25, %s7360_s21  ;;  %s7365_s24 = sshll.u32 %s7651_s12, 4  ;;  %s7366_s24 = int_to_ptr.vmem [resolvable:$false] %s7365_s24 }
  0x71   : > { %s7367_s15 = scalar_lea.vmem %s7366_s24, 512  ;;  %p7368_p8 = scmp.lt.s32.totalorder %s7904_s25, %s7366_s24 }
  0x72   : > { %p7363_p10 = pnand %p7361_p4, %p7347_p6  ;;  %p7369_p7 = scmp.lt.s32.totalorder %s7367_s15, %s7360_s21 }
  0x74   : > { %p7364_p13 = pneg %p7363_p10  ;;  %p7370_p3 = por %p7369_p7, %p7368_p8 }
  0x76   : > { %p7371_p0 = pnand %p7370_p3, %p7364_p13 }
  0x78   : > { %7374 = shalt.err (!%p7371_p0)
}
  0x79   : > { %s9488_s23 = smov 8   ;;  %s9489_s30 = smov 128  }
  0x7a   : > { %6685 = dma.hbm_to_vmem [thread:$0]  (!%p7910_p2), %s7902_s10, 256, %s7904_s25, %s7916_s22, %s9489_s30, %s9489_s30, %s9488_s23  }
  0x7b   : > { %s9490_s4 = sld [smem:[#allocation43_spill]]  ;;  %p9491_p5 = pneg %p7803_p11 }
  0x81   : > { %s7375_s18 = scalar_lea.hbm %s9490_s4, 32 }
  0x82   : > { %p7376_p13 = scmp.ne.s32.totalorder %s9490_s4, %s7375_s18  ;;  %p7382_p9 = scmp.lt.u32.totalorder %s7375_s18, %s9490_s4 }
  0x84   : > { %p7378_p1 = pnand %p7376_p13, %p9491_p5 }
  0x86   : > { %p7379_p8 = pneg %p7378_p1 }
  0x88   : > { %p7384_p6 = pnand %p7382_p9, %p7379_p8 }
  0x8a   : > { %7387 = shalt.err (!%p7384_p6)
}
  0x8b   : > { %s7388_s10 = scalar_lea.vmem %s263_s16, 32  ;;  %p9492_p12 = pmov %p9491_p5 }
  0x8c   : > { %p7389_p2 = scmp.ne.s32.totalorder %s263_s16, %s7388_s10  ;;  %p7396_p7 = scmp.lt.s32.totalorder %s263_s16, %s263_s16 }
  0x8d   : > { %p7397_p3 = scmp.lt.s32.totalorder %s7388_s10, %s7388_s10 }
  0x8e   : > { %p7391_p4 = pnand %p7389_p2, %p9492_p12 }
  0x8f   : > { %p7398_p0 = por %p7397_p3, %p7396_p7 }
  0x90   : > { %p7392_p10 = pneg %p7391_p4 }
  0x92   : > { %p7399_p5 = pnand %p7398_p0, %p7392_p10 }
  0x94   : > { %7402 = shalt.err (!%p7399_p5)
}
  0x95   : > { %s9493_s24 = sld [smem:[#allocation27_spill]]  ;;  %s55_s15 = sadd.s32 1, %s7625_s29 }
  0x96   : > { %6678 = dma.hbm_to_vmem [thread:$0]  (!%p7803_p11), %s9490_s4, 32, %s263_s16, [#allocation10]  }
  0x97   : > { %p62_p13 = scmp.ne.s32.totalorder %s7625_s29, %s7621_s28  ;;  %p9494_p1 = scmp.eq.s32.totalorder %s7852_s6, 0 }
  0x98   : > { %p9496_p8 = scmp.eq.s32.totalorder %s7645_s9, 0  ;;  %p68_p6 = scmp.ne.s32.totalorder %s7621_s28, %s7617_s27 }
  0x99   : > { %s7974_s11 = scalar_select %p9494_p1, %s7625_s29, %s55_s15  }
  0x9a   : > { %p64_p9 = por %p9496_p8, %p62_p13  ;;  %s273_s3 = sand.u32 1, %s7625_s29  }
  0x9b   : > { %9495 = sst [smem:[#allocation38_spill]] %s7974_s11  ;;  %s6363_s5 = sshll.u32 %s7637_s7, 5 }
  0x9c   : > { %p9497_p2 = scmp.eq.s32.totalorder %s9493_s24, 0  ;;  %s5869_s2 = sshll.u32 %s273_s3, 7 }
  0x9d   : > { %s286_s17 = sadd.s32 %s6363_s5, %s7888_s13  ;;  %s9499_s10 = sld [smem:[#allocation39_spill]] }
  0x9e   : > { %p7984_p12 = por %p9497_p2, %p68_p6  ;;  %s5873_s19 = sshll.u32 %s286_s17, 6 }
  0x9f   : > { %s277_s27 = scalar_lea.vmem [#allocation3], %s5869_s2  ;;  %p9500_p11 = scmp.lt.s32.totalorder %s7645_s9, 4 }
  0xa0   : > { %s289_s6 = sshll.u32 %s277_s27, 4  ;;  %s8002_s15 = scalar_lea.sflag [#allocation4], %s273_s3  ;;  %s7994_s6 = int_to_ptr.vmem [resolvable:$true] %s289_s6 }
  0xa1   : > { %p7998_p4 = pnand %p9500_p11, %p64_p9 }
  0xa3   : > { %s7992_s25 = scalar_lea.hbm %s9499_s10, %s5873_s19  ;;  %p7405_p7 = pneg %p7998_p4 }
  0xa4   : > { %s7403_s5 = scalar_lea.hbm %s7992_s25, 2048  ;;  %s7408_s19 = scalar_lea.hbm %s9499_s10, 8192 }
  0xa5   : > { %p7404_p10 = scmp.ne.s32.totalorder %s7992_s25, %s7403_s5  ;;  %p7409_p5 = scmp.lt.u32.totalorder %s7992_s25, %s9499_s10 }
  0xa6   : > { %p7410_p13 = scmp.lt.u32.totalorder %s7408_s19, %s7403_s5  ;;  %p7412_p8 = scmp.lt.u32.totalorder %s7403_s5, %s7992_s25 }
  0xa7   : > { %p7406_p3 = pnand %p7405_p7, %p7404_p10 }
  0xa8   : > { %p7411_p1 = por %p7410_p13, %p7409_p5 }
  0xa9   : > { %p7407_p0 = pneg %p7406_p3 }
  0xaa   : > { %p7413_p9 = por %p7412_p8, %p7411_p1 }
  0xac   : > { %p7414_p6 = pnand %p7413_p9, %p7407_p0 }
  0xae   : > { %7417 = shalt.err (!%p7414_p6)
}
  0xaf   : > { %s7418_s3 = scalar_lea.vmem %s7994_s6, 2048  ;;  %s7652_s27 = smov [#allocation3]  }
  0xb0   : > { %p7419_p2 = scmp.ne.s32.totalorder %s7994_s6, %s7418_s3  ;;  %s7423_s2 = sshll.u32 %s7652_s27, 4  ;;  %s7424_s2 = int_to_ptr.vmem [resolvable:$false] %s7423_s2 }
  0xb1   : > { %s7425_s17 = scalar_lea.vmem %s7424_s2, 4096  ;;  %p7426_p3 = scmp.lt.s32.totalorder %s7994_s6, %s7424_s2 }
  0xb2   : > { %p7421_p11 = pnand %p7419_p2, %p7405_p7  ;;  %p7427_p5 = scmp.lt.s32.totalorder %s7425_s17, %s7418_s3 }
  0xb4   : > { %p7422_p10 = pneg %p7421_p11  ;;  %p7428_p13 = por %p7427_p5, %p7426_p3 }
  0xb6   : > { %p7429_p1 = pnand %p7428_p13, %p7422_p10 }
  0xb8   : > { %7432 = shalt.err (!%p7429_p1)
}
  0xb9   : > { %s9502_s5 = sld [smem:[#allocation22_spill]]  ;;  %s9504_s16 = sld [smem:[#allocation36_spill]] }
  0xba   : > { %s9503_s19 = sld [smem:[#allocation34_spill]]  ;;  %s9505_s21 = sld [smem:[#allocation21_spill]] }
  0xbb   : > { %s9506_s27 = sld [smem:[#allocation20_spill]]  ;;  %s9507_s3 = sld [smem:[#allocation33_spill]] }
  0xbc   : > { %6682 = dma.hbm_to_vmem [thread:$0]  (!%p7998_p4), %s7992_s25, 2048, %s7994_s6, %s8002_s15, %s9489_s30, %s9489_s30, %s9488_s23  }
  0xbd   : > { %p9510_p6 = scmp.eq.s32.totalorder %s7645_s9, 0  ;;  %p9511_p10 = scmp.eq.s32.totalorder %s9493_s24, 0 }
  0xbe   : > { %s9513_s8 = sld [smem:[#allocation41_spill]]  ;;  %p9515_p4 = scmp.lt.s32.totalorder %s7645_s9, 4 }
  0xbf   : > { %s131_s12 = sadd.s32 1, %s9502_s5  ;;  %p9509_p0 = scmp.lt.s32.totalorder %s9504_s16, 15 }
  0xc0   : > { %p9508_p7 = scmp.lt.s32.totalorder %s9503_s19, 15  ;;  %p138_p8 = scmp.ne.s32.totalorder %s9502_s5, %s9505_s21 }
  0xc1   : > { %s9612_s16 = smov (!%p9509_p0, %s9504_s16), 15  ;;  %p144_p9 = scmp.ne.s32.totalorder %s9505_s21, %s9506_s27 }
  0xc2   : > { %s9610_s19 = smov (!%p9508_p7, %s9503_s19), 15  ;;  %s330_s17 = sand.u32 1, %s9502_s5  }
  0xc3   : > { %s125_s2 = ssub.s32 %s9610_s19, %s9612_s16  ;;  %p140_p2 = por %p138_p8, %p9510_p6 }
  0xc4   : > { %s126_s1 = sor.u32 %s125_s2, %s9507_s3  ;;  %p8050_p3 = por %p144_p9, %p9511_p10 }
  0xc5   : > { %p129_p11 = scmp.eq.s32.totalorder %s126_s1, 0  ;;  %s5880_s25 = sshll.u32 %s330_s17, 4 }
  0xc6   : > { %s9512_s4 = scalar_select %p8050_p3, 1, 0 }
  0xc7   : > { %s5882_s6 = sshll.u32 %s9610_s19, 2  ;;  %s9614_s5 = smov (!%p129_p11, %s9502_s5), %s131_s12 }
  0xc8   : > { %s344_s15 = sadd.s32 %s5882_s6, %s7888_s13  ;;  %s332_s14 = scalar_lea.vmem [#allocation8], %s5880_s25 }
  0xc9   : > { %s5884_s10 = sshll.u32 %s344_s15, 6  ;;  %s347_s21 = sshll.u32 %s332_s14, 4  ;;  %s8063_s21 = int_to_ptr.vmem [resolvable:$true] %s347_s21 }
  0xca   : > { %s9514_s11 = smov %s9513_s8  ;;  %s8061_s3 = scalar_lea.hbm %s9513_s8, %s5884_s10 }
  0xcb   : > { %p8067_p5 = pnand %p9515_p4, %p140_p2  ;;  %s7433_s13 = scalar_lea.hbm %s8061_s3, 256 }
  0xcc   : > { %p7434_p13 = scmp.ne.s32.totalorder %s8061_s3, %s7433_s13  ;;  %s7438_s24 = scalar_lea.hbm %s9514_s11, 8192 }
  0xcd   : > { %p7435_p1 = pneg %p8067_p5  ;;  %p7439_p8 = scmp.lt.u32.totalorder %s8061_s3, %s9514_s11 }
  0xce   : > { %p7440_p9 = scmp.lt.u32.totalorder %s7438_s24, %s7433_s13  ;;  %p7442_p2 = scmp.lt.u32.totalorder %s7433_s13, %s8061_s3 }
  0xcf   : > { %p7436_p7 = pnand %p7435_p1, %p7434_p13 }
  0xd0   : > { %p7441_p6 = por %p7440_p9, %p7439_p8 }
  0xd1   : > { %p7437_p0 = pneg %p7436_p7 }
  0xd2   : > { %p7443_p11 = por %p7442_p2, %p7441_p6 }
  0xd4   : > { %p7444_p10 = pnand %p7443_p11, %p7437_p0 }
  0xd6   : > { %7447 = shalt.err (!%p7444_p10)
}
  0xd7   : > { %s7448_s12 = scalar_lea.vmem %s8063_s21, 256  ;;  %s7653_s2 = smov [#allocation8]  }
  0xd8   : > { %p7449_p4 = scmp.ne.s32.totalorder %s8063_s21, %s7448_s12  ;;  %s7453_s17 = sshll.u32 %s7653_s2, 4  ;;  %s7454_s17 = int_to_ptr.vmem [resolvable:$false] %s7453_s17 }
  0xd9   : > { %s7455_s25 = scalar_lea.vmem %s7454_s17, 512  ;;  %p7456_p3 = scmp.lt.s32.totalorder %s8063_s21, %s7454_s17 }
  0xda   : > { %p7451_p13 = pnand %p7449_p4, %p7435_p1  ;;  %p7457_p8 = scmp.lt.s32.totalorder %s7455_s25, %s7448_s12 }
  0xdc   : > { %p7452_p7 = pneg %p7451_p13  ;;  %p7458_p9 = por %p7457_p8, %p7456_p3 }
  0xde   : > { %p7459_p6 = pnand %p7458_p9, %p7452_p7 }
  0xe0   : > { %7462 = shalt.err (!%p7459_p6)
}
  0xe1   : > { %6688 = dma.hbm_to_vmem [thread:$0]  (!%p8067_p5), %s8061_s3, 256, %s8063_s21, %s7916_s22, %s9489_s30, %s9489_s30, %s9488_s23  }
  0xe2   : > { %s9517_s6 = sld [smem:[#allocation30_spill]] }
  0xe8   : > { %p9518_p1 = scmp.ne.s32.totalorder %s9517_s6, 0 }
  0xe9   : > { %s361_s15 = sand.u32 (!%p9518_p1), 1, %s7621_s28  }
  0xea   : > { %359 = sbr.rel (%p9518_p1) target bundleno = 948 (0x3b4), region = 40  ;;  %s5886_s27 = sshll.u32 (!%p9518_p1), %s361_s15, 7 }
  0xeb   : > { %s362_s16 = scalar_lea.sflag (!%p9518_p1), [#allocation4], %s361_s15  ;;  %s8103_s13 = scalar_lea.vmem (!%p9518_p1), [#allocation3], %s5886_s27 }
  0xf1   : > { %7560 = dma.done.wait (%p7984_p12), %s362_s16, 2048  }
  0xf2   : > { %7562 = vsyncadd (%p7984_p12), %s362_s16, 4294965248  ;;  %s9519_s1 = sld [smem:[#allocation27_spill]]  ;;  %s9520_s8 = sld [smem:[#allocation23_spill]] }
  0xf3   : > { %s9521_s14 = sld [smem:[#allocation35_spill]] }
  0xf8   : > { %s370_s24 = sand.u32 1, %s9519_s1   ;;  %s372_s22 = sand.u32 1, %s9520_s8  }
  0xf9   : > { %s8111_s23 = sshll.u32 %s372_s22, 4  ;;  %s371_s30 = scalar_lea.sflag [#allocation7], %s370_s24 }
  0xfa   : > { %s374_s21 = scalar_lea.vmem [#allocation6], %s8111_s23  ;;  %p9522_p3 = scmp.ne.s32.totalorder %s9521_s14, 0 }
  0xfc   : > { %7564 = dma.done.wait (%p9522_p3), %s371_s30, 256  }
  0xfd   : > { %7566 = vsyncadd (%p9522_p3), %s371_s30, 4294967040  ;;  %s9523_s3 = sld [smem:[#allocation21_spill]]  ;;  %p9524_p12 = scmp.ne.s32.totalorder %s9512_s4, 0 }
 0x103   : > { %s381_s10 = sand.u32 1, %s9523_s3  }
 0x104   : > { %s8119_s18 = sshll.u32 %s381_s10, 4 }
 0x105   : > { %s383_s19 = scalar_lea.vmem [#allocation8], %s8119_s18 }
 0x106   : > { %7568 = dma.done.wait (%p9524_p12), %s371_s30, 256  }
 0x107   : > { %7570 = vsyncadd (%p9524_p12), %s371_s30, 4294967040  ;;  %p9525_p5 = scmp.eq.s32.totalorder %s9519_s1, 0 }
 0x109   : > { %7572 = dma.done.wait (%p9525_p5), [#allocation10], 36896   ;;  %p9526_p0 = pmov %p9525_p5 }
 0x10a   : > { %s9527_s12 = sld [smem:[#allocation19_spill]]  ;;  %vm445_vm0 = vcmask 1040384   ;;  %vm446_vm1 = vsmask.f32 256  ;;  %vm448_vm2 = vcmask 1044484   ;;  %vm696_vm11 = vcmask 1043456  }
 0x10b   : > { %7574 = vsyncadd (%p9526_p0), [#allocation10], 4294930400  ;;  %vm449_vm4 = vsmask.f32 4352  ;;  %vm482_vm6 = vsmask.f32 7938 }
 0x10c   : > { %vm447_vm3 = vmand %vm445_vm0, %vm446_vm1  ;;  %vm484_vm7 = vsmask.f32 7954  ;;  %vm698_vm12 = vcmask 1047556   ;;  %v455_v3 = vld [vmem:[#allocation2 + $0x18] sm:$0x11]  ;;  %v8157_v10 = vld [vmem:[%s8103_s13] sm:$0xff] }
 0x10d   : > { %vm450_vm5 = vmand %vm448_vm2, %vm449_vm4  ;;  %v458_v4 = vld [vmem:[#allocation2 + $0x30] sm:$0x11]  ;;  %v461_v5 = vld [vmem:[#allocation2 + $0x48] sm:$0x11]  ;;  %v536_v15 = vshrl.u32 %v8157_v10, 16  ;;  %v539_v49 = vshll.u32 %v8157_v10, 16 }
 0x10e   : > { %vm8136_vm8 = vmor %vm450_vm5, %vm447_vm3  ;;  %v464_v9 = vld [vmem:[#allocation2 + $0x60] sm:$0x11]  ;;  %v467_v12 = vld [vmem:[#allocation2 + $0x78] sm:$0x11]  ;;  %vm533_vm14 = vsmask.f32 4368 }
 0x10f   : > { %vm8141_vm9 = vmand %vm445_vm0, %vm482_vm6  ;;  %v456_v6 = vsel %vm8136_vm8, 0, %v455_v3  ;;  %v459_v7 = vsel %vm8136_vm8, 0, %v458_v4  ;;  %v462_v8 = vsel %vm8136_vm8, 0, %v461_v5  ;;  %v465_v11 = vsel %vm8136_vm8, 0, %v464_v9  ;;  %v470_v13 = vld [vmem:[#allocation2 + $0x90] sm:$0x11] }
 0x110   : > { %s425_s2 = sand.u32 1, %s9527_s12   ;;  %vm8146_vm10 = vmand %vm448_vm2, %vm484_vm7  ;;  %457 = vst [vmem:[#allocation2 + $0x18] sm:$0x11] %v456_v6  ;;  %v468_v16 = vsel %vm8136_vm8, 0, %v467_v12  ;;  %v471_v17 = vsel %vm8136_vm8, 0, %v470_v13  ;;  %v538_v48 = vrot.slane %v536_v15, 7 }
 0x111   : > { %s8134_s4 = sshll.u32 %s425_s2, 8  ;;  %460 = vst [vmem:[#allocation2 + $0x30] sm:$0x11] %v459_v7  ;;  %463 = vst [vmem:[#allocation2 + $0x48] sm:$0x11] %v462_v8  ;;  %v518_v51 = vld [vmem:[%s8103_s13 + $0x8] sm:$0xff] }
 0x112   : > { %vm8165_vm13 = vmor %vm8146_vm10, %vm8141_vm9  ;;  %466 = vst [vmem:[#allocation2 + $0x60] sm:$0x11] %v465_v11  ;;  %v473_v18 = vld [vmem:[#allocation2 + $0xa8] sm:$0x11]  ;;  %v476_v19 = vld [vmem:[#allocation2 + $0xc0] sm:$0x11]  ;;  %v541_v57 = vor.u32 %v539_v49, %v538_v48 }
 0x113   : > { %469 = vst [vmem:[#allocation2 + $0x78] sm:$0x11] %v468_v16  ;;  %472 = vst [vmem:[#allocation2 + $0x90] sm:$0x11] %v471_v17  ;;  %v474_v20 = vsel %vm8136_vm8, 0, %v473_v18  ;;  %v477_v21 = vsel %vm8136_vm8, 0, %v476_v19 }
 0x114   : > { %v490_v22 = vld [vmem:[#allocation2 + $0x28] sm:$0x11]  ;;  %v493_v23 = vld [vmem:[#allocation2 + $0x40] sm:$0x11]  ;;  %475 = vst [vmem:[#allocation2 + $0xa8] sm:$0x11] %v474_v20  ;;  %vm8188_vm15 = vmand %vm696_vm11, %vm482_vm6 }
 0x115   : > { %478 = vst [vmem:[#allocation2 + $0xc0] sm:$0x11] %v477_v21  ;;  %v491_v24 = vsel %vm8165_vm13, 0, %v490_v22  ;;  %v494_v25 = vsel %vm8165_vm13, 0, %v493_v23  ;;  %v496_v26 = vld [vmem:[#allocation2 + $0x58] sm:$0x11]  ;;  %vm8198_vm0 = vmand %vm698_vm12, %vm484_vm7 }
 0x116   : > { %v499_v27 = vld [vmem:[#allocation2 + $0x70] sm:$0x11]  ;;  %492 = vst [vmem:[#allocation2 + $0x28] sm:$0x11] %v491_v24  ;;  %495 = vst [vmem:[#allocation2 + $0x40] sm:$0x11] %v494_v25 }
 0x117   : > { %v497_v28 = vsel %vm8165_vm13, 0, %v496_v26  ;;  %v500_v29 = vsel %vm8165_vm13, 0, %v499_v27  ;;  %v502_v30 = vld [vmem:[#allocation2 + $0x88] sm:$0x11]  ;;  %v505_v31 = vld [vmem:[#allocation2 + $0xa0] sm:$0x11]  ;;  %vm8219_vm2 = vmor %vm8198_vm0, %vm8188_vm15 }
 0x118   : > { %498 = vst [vmem:[#allocation2 + $0x58] sm:$0x11] %v497_v28  ;;  %501 = vst [vmem:[#allocation2 + $0x70] sm:$0x11] %v500_v29  ;;  %v503_v33 = vsel %vm8165_vm13, 0, %v502_v30  ;;  %v506_v34 = vsel %vm8165_vm13, 0, %v505_v31 }
 0x119   : > { %v508_v35 = vld [vmem:[#allocation2 + $0xb8] sm:$0x11]  ;;  %v511_v36 = vld [vmem:[#allocation2 + $0xd0] sm:$0x11]  ;;  %504 = vst [vmem:[#allocation2 + $0x88] sm:$0x11] %v503_v33  ;;  %vm8232_vm3 = vmor %vm446_vm1, %vm533_vm14 }
 0x11a   : > { %507 = vst [vmem:[#allocation2 + $0xa0] sm:$0x11] %v506_v34  ;;  %v509_v38 = vsel %vm8165_vm13, 0, %v508_v35  ;;  %v512_v39 = vsel %vm8165_vm13, 0, %v511_v36  ;;  %v452_v40 = vld [vmem:[#allocation2] sm:$0x11] }
 0x11b   : > { %v479_v41 = vld [vmem:[#allocation2 + $0xd8] sm:$0x11]  ;;  %510 = vst [vmem:[#allocation2 + $0xb8] sm:$0x11] %v509_v38  ;;  %513 = vst [vmem:[#allocation2 + $0xd0] sm:$0x11] %v512_v39 }
 0x11c   : > { %v453_v42 = vsel %vm8136_vm8, 0, %v452_v40  ;;  %v480_v43 = vsel %vm8136_vm8, 0, %v479_v41  ;;  %v487_v44 = vld [vmem:[#allocation2 + $0x10] sm:$0x11]  ;;  %v514_v45 = vld [vmem:[#allocation2 + $0xe8] sm:$0x11] }
 0x11d   : > { %454 = vst [vmem:[#allocation2] sm:$0x11] %v453_v42  ;;  %481 = vst [vmem:[#allocation2 + $0xd8] sm:$0x11] %v480_v43  ;;  %v488_v46 = vsel %vm8165_vm13, 0, %v487_v44  ;;  %v515_v47 = vsel %vm8165_vm13, 0, %v514_v45 }
 0x11e   : > { %489 = vst [vmem:[#allocation2 + $0x10] sm:$0x11] %v488_v46  ;;  %516 = vst [vmem:[#allocation2 + $0xe8] sm:$0x11] %v515_v47  ;;  %v701_v52 = vld [vmem:[#allocation2 + $0x18] sm:$0xff]  ;;  %v544_v53 = vshrl.u32 %v518_v51, 16 }
 0x11f   : > { %v547_v54 = vshll.u32 %v518_v51, 16  ;;  %v519_v55 = vld [vmem:[%s8103_s13 + $0x10] sm:$0xff]  ;;  %v520_v56 = vld [vmem:[%s8103_s13 + $0x18] sm:$0xff]  ;;  %v542_v58 = vrot.slane %v538_v48, 4  ;;  %v521_v61 = vld [vmem:[%s8103_s13 + $0x20] sm:$0xff]  ;;  %v702_v4 = vsel %vm8219_vm2, %v541_v57, %v701_v52  ;;  %s8293_s17 = scalar_lea.vmem [#allocation12], %s8134_s4 }
 0x120   : > { %v553_v59 = vshrl.u32 %v519_v55, 16  ;;  %v556_v60 = vshll.u32 %v519_v55, 16  ;;  %v522_v62 = vld [vmem:[%s8103_s13 + $0x28] sm:$0xff]  ;;  %v546_v63 = vrot.slane %v544_v53, 7  ;;  %v561_v1 = vshrl.u32 %v520_v56, 16  ;;  %703 = vst [vmem:[#allocation2 + $0x18] sm:$0xff] %v702_v4 }
 0x121   : > { %v564_v2 = vshll.u32 %v520_v56, 16  ;;  %v570_v3 = vshrl.u32 %v521_v61, 16  ;;  %v705_v6 = vld [vmem:[#allocation2 + $0x28] sm:$0x11]  ;;  %v573_v8 = vshll.u32 %v521_v61, 16  ;;  %v578_v9 = vshrl.u32 %v522_v62, 16 }
 0x122   : > { %v555_v7 = vrot.slane %v553_v59, 7  ;;  %v549_v10 = vor.u32 %v547_v54, %v546_v63  ;;  %v551_v11 = vrot.slane %v546_v63, 4  ;;  %v708_v12 = vld [vmem:[#allocation2 + $0x30] sm:$0xff]  ;;  %v563_v13 = vrot.slane %v561_v1, 7  ;;  %v712_v17 = vld [vmem:[#allocation2 + $0x40] sm:$0x11] }
 0x123   : > { %v572_v14 = vrot.slane %v570_v3, 7  ;;  %v580_v18 = vrot.slane %v578_v9, 7  ;;  %v581_v19 = vshll.u32 %v522_v62, 16  ;;  %v523_v20 = vld [vmem:[%s8103_s13 + $0x30] sm:$0xff]  ;;  %v715_v25 = vld [vmem:[#allocation2 + $0x48] sm:$0xff]  ;;  %v525_v32 = vld [vmem:[%s8103_s13 + $0x40] sm:$0xff] }
 0x124   : > { %v558_v15 = vor.u32 %v556_v60, %v555_v7  ;;  %v559_v16 = vrot.slane %v555_v7, 4  ;;  %v550_v21 = vsel %vm8232_vm3, %v542_v58, %v549_v10  ;;  %v706_v22 = vsel %vm8136_vm8, %v551_v11, %v705_v6  ;;  %v524_v26 = vld [vmem:[%s8103_s13 + $0x38] sm:$0xff]  ;;  %v719_v31 = vld [vmem:[#allocation2 + $0x58] sm:$0x11]  ;;  %v527_v42 = vld [vmem:[%s8103_s13 + $0x50] sm:$0xff]  ;;  %s9544_s25 = sld [smem:[#allocation24_spill]] }
 0x125   : > { %v566_v23 = vor.u32 %v564_v2, %v563_v13  ;;  %v568_v24 = vrot.slane %v563_v13, 4  ;;  %704 = vst [vmem:[#allocation2 + $0x20] sm:$0xff] %v550_v21  ;;  %707 = vst [vmem:[#allocation2 + $0x28] sm:$0x11] %v706_v22  ;;  %v575_v28 = vor.u32 %v573_v8, %v572_v14  ;;  %v576_v29 = vrot.slane %v572_v14, 4  ;;  %v526_v37 = vld [vmem:[%s8103_s13 + $0x48] sm:$0xff] }
 0x126   : > { %v709_v27 = vsel %vm8219_vm2, %v558_v15, %v708_v12  ;;  %v583_v30 = vor.u32 %v581_v19, %v580_v18  ;;  %v585_v35 = vrot.slane %v580_v18, 4  ;;  %v587_v36 = vshrl.u32 %v523_v20, 16  ;;  %v722_v47 = vld [vmem:[#allocation2 + $0x60] sm:$0xff]  ;;  %v726_v55 = vld [vmem:[#allocation2 + $0x70] sm:$0x11]  ;;  %v729_v60 = vld [vmem:[#allocation2 + $0x78] sm:$0xff] }
 0x127   : > { %710 = vst [vmem:[#allocation2 + $0x30] sm:$0xff] %v709_v27  ;;  %v567_v33 = vsel %vm8232_vm3, %v559_v16, %v566_v23  ;;  %v713_v34 = vsel %vm8136_vm8, %v568_v24, %v712_v17  ;;  %v716_v38 = vsel %vm8219_vm2, %v575_v28, %v715_v25  ;;  %v590_v40 = vshll.u32 %v523_v20, 16  ;;  %v528_v63 = vld [vmem:[%s8103_s13 + $0x58] sm:$0xff]  ;;  %v529_v7 = vld [vmem:[%s8103_s13 + $0x60] sm:$0xff]  ;;  %v530_v13 = vld [vmem:[%s8103_s13 + $0x68] sm:$0xff] }
 0x128   : > { %711 = vst [vmem:[#allocation2 + $0x38] sm:$0xff] %v567_v33  ;;  %714 = vst [vmem:[#allocation2 + $0x40] sm:$0x11] %v713_v34  ;;  %v584_v39 = vsel %vm8232_vm3, %v576_v29, %v583_v30  ;;  %v595_v41 = vshrl.u32 %v524_v26, 16  ;;  %v720_v43 = vsel %vm8136_vm8, %v585_v35, %v719_v31  ;;  %v589_v44 = vrot.slane %v587_v36, 7  ;;  %v736_v12 = vld [vmem:[#allocation2 + $0x90] sm:$0xff] }
 0x129   : > { %717 = vst [vmem:[#allocation2 + $0x48] sm:$0xff] %v716_v38  ;;  %718 = vst [vmem:[#allocation2 + $0x50] sm:$0xff] %v584_v39  ;;  %v598_v45 = vshll.u32 %v524_v26, 16  ;;  %v604_v46 = vshrl.u32 %v525_v32, 16  ;;  %v607_v49 = vshll.u32 %v525_v32, 16  ;;  %v612_v51 = vshrl.u32 %v526_v37, 16 }
 0x12a   : > { %721 = vst [vmem:[#allocation2 + $0x58] sm:$0x11] %v720_v43  ;;  %v597_v48 = vrot.slane %v595_v41, 7  ;;  %v615_v52 = vshll.u32 %v526_v37, 16  ;;  %v592_v53 = vor.u32 %v590_v40, %v589_v44  ;;  %v593_v54 = vrot.slane %v589_v44, 4  ;;  %v531_v18 = vld [vmem:[%s8103_s13 + $0x70] sm:$0xff] }
 0x12b   : > { %v606_v56 = vrot.slane %v604_v46, 7  ;;  %v621_v57 = vshrl.u32 %v527_v42, 16  ;;  %v614_v61 = vrot.slane %v612_v51, 7  ;;  %v624_v62 = vshll.u32 %v527_v42, 16  ;;  %v733_v4 = vld [vmem:[#allocation2 + $0x88] sm:$0x11] }
 0x12c   : > { %v600_v58 = vor.u32 %v598_v45, %v597_v48  ;;  %v602_v59 = vrot.slane %v597_v48, 4  ;;  %v723_v1 = vsel %vm8219_vm2, %v592_v53, %v722_v47  ;;  %v629_v17 = vshrl.u32 %v528_v63, 16  ;;  %v532_v23 = vld [vmem:[%s8103_s13 + $0x78] sm:$0xff]  ;;  %v740_v28 = vld [vmem:[#allocation2 + $0xa0] sm:$0x11]  ;;  %p5892_p2 = scmp.le.s32.totalorder %s9544_s25, 0 }
 0x12d   : > { %v609_v2 = vor.u32 %v607_v49, %v606_v56  ;;  %v610_v3 = vrot.slane %v606_v56, 4  ;;  %v623_v6 = vrot.slane %v621_v57, 7  ;;  %724 = vst [vmem:[#allocation2 + $0x60] sm:$0xff] %v723_v1  ;;  %v617_v10 = vor.u32 %v615_v52, %v614_v61  ;;  %v743_v35 = vld [vmem:[#allocation2 + $0xa8] sm:$0xff]  ;;  %v747_v40 = vld [vmem:[#allocation2 + $0xb8] sm:$0x11] }
 0x12e   : > { %v601_v8 = vsel %vm8232_vm3, %v593_v54, %v600_v58  ;;  %v727_v9 = vsel %vm8136_vm8, %v602_v59, %v726_v55  ;;  %v619_v11 = vrot.slane %v614_v61, 4  ;;  %v632_v21 = vshll.u32 %v528_v63, 16  ;;  %v750_v47 = vld [vmem:[#allocation2 + $0xc0] sm:$0xff]  ;;  %v754_v55 = vld [vmem:[#allocation2 + $0xd0] sm:$0x11] }
 0x12f   : > { %725 = vst [vmem:[#allocation2 + $0x68] sm:$0xff] %v601_v8  ;;  %728 = vst [vmem:[#allocation2 + $0x70] sm:$0x11] %v727_v9  ;;  %v730_v14 = vsel %vm8219_vm2, %v609_v2, %v729_v60  ;;  %v626_v15 = vor.u32 %v624_v62, %v623_v6  ;;  %v627_v16 = vrot.slane %v623_v6, 4  ;;  %v618_v19 = vsel %vm8232_vm3, %v610_v3, %v617_v10  ;;  %v761_v61 = vld [vmem:[%s374_s21] sm:$0xff] (!%p5892_p2)  ;;  %v762_v62 = vld [vmem:[%s374_s21 + $0x8] sm:$0xff] (!%p5892_p2) }
 0x130   : > { %731 = vst [vmem:[#allocation2 + $0x78] sm:$0xff] %v730_v14  ;;  %v734_v20 = vsel %vm8136_vm8, %v619_v11, %v733_v4  ;;  %v638_v22 = vshrl.u32 %v529_v7, 16  ;;  %732 = vst [vmem:[#allocation2 + $0x80] sm:$0xff] %v618_v19  ;;  %v631_v25 = vrot.slane %v629_v17, 7  ;;  %v641_v26 = vshll.u32 %v529_v7, 16  ;;  %v783_v7 = vld [vmem:[#allocation2] sm:$0xff] (!%p5892_p2) }
 0x131   : > { %735 = vst [vmem:[#allocation2 + $0x88] sm:$0x11] %v734_v20  ;;  %v737_v24 = vsel %vm8219_vm2, %v626_v15, %v736_v12  ;;  %v646_v27 = vshrl.u32 %v530_v13, 16  ;;  %v649_v30 = vshll.u32 %v530_v13, 16  ;;  %v655_v31 = vshrl.u32 %v531_v18, 16 }
 0x132   : > { %738 = vst [vmem:[#allocation2 + $0x90] sm:$0xff] %v737_v24  ;;  %v640_v29 = vrot.slane %v638_v22, 7  ;;  %v658_v32 = vshll.u32 %v531_v18, 16  ;;  %v634_v33 = vor.u32 %v632_v21, %v631_v25  ;;  %v636_v34 = vrot.slane %v631_v25, 4  ;;  %v787_v8 = vld [vmem:[#allocation2 + $0x10] sm:$0x11] (!%p5892_p2) }
 0x133   : > { %v648_v36 = vrot.slane %v646_v27, 7  ;;  %v663_v37 = vshrl.u32 %v532_v23, 16  ;;  %v657_v41 = vrot.slane %v655_v31, 7  ;;  %v666_v42 = vshll.u32 %v532_v23, 16 }
 0x134   : > { %v643_v38 = vor.u32 %v641_v26, %v640_v29  ;;  %v644_v39 = vrot.slane %v640_v29, 4  ;;  %v635_v43 = vsel %vm8232_vm3, %v627_v16, %v634_v33  ;;  %v741_v44 = vsel %vm8136_vm8, %v636_v34, %v740_v28 }
 0x135   : > { %v651_v45 = vor.u32 %v649_v30, %v648_v36  ;;  %v653_v46 = vrot.slane %v648_v36, 4  ;;  %739 = vst [vmem:[#allocation2 + $0x98] sm:$0xff] %v635_v43  ;;  %742 = vst [vmem:[#allocation2 + $0xa0] sm:$0x11] %v741_v44  ;;  %v660_v49 = vor.u32 %v658_v32, %v657_v41  ;;  %v661_v51 = vrot.slane %v657_v41, 4  ;;  %760 = sbr.rel (%p5892_p2) target bundleno = 319 (0x13f), region = 64 }
 0x136   : > { %v744_v48 = vsel %vm8219_vm2, %v643_v38, %v743_v35  ;;  %v665_v52 = vrot.slane %v663_v37, 7  ;;  %v764_v63 = vshrl.u32 (!%p5892_p2), %v761_v61, 16  ;;  %v767_v1 = vshll.u32 (!%p5892_p2), %v761_v61, 16 }
 0x137   : > { %745 = vst [vmem:[#allocation2 + $0xa8] sm:$0xff] %v744_v48  ;;  %v652_v53 = vsel %vm8232_vm3, %v644_v39, %v651_v45  ;;  %v748_v54 = vsel %vm8136_vm8, %v653_v46, %v747_v40  ;;  %v751_v56 = vsel %vm8219_vm2, %v660_v49, %v750_v47  ;;  %v772_v2 = vshrl.u32 (!%p5892_p2), %v762_v62, 16 }
 0x138   : > { %746 = vst [vmem:[#allocation2 + $0xb0] sm:$0xff] %v652_v53  ;;  %749 = vst [vmem:[#allocation2 + $0xb8] sm:$0x11] %v748_v54  ;;  %v668_v57 = vor.u32 %v666_v42, %v665_v52  ;;  %v670_v58 = vrot.slane %v665_v52, 4  ;;  %v775_v3 = vshll.u32 (!%p5892_p2), %v762_v62, 16  ;;  %v766_v4 = vrot.slane (!%p5892_p2), %v764_v63, 7 }
 0x139   : > { %752 = vst [vmem:[#allocation2 + $0xc0] sm:$0xff] %v751_v56  ;;  %v774_v6 = vrot.slane (!%p5892_p2), %v772_v2, 7 }
 0x13a   : > { %v669_v59 = vsel %vm8232_vm3, %v661_v51, %v668_v57  ;;  %v755_v60 = vsel %vm8136_vm8, %v670_v58, %v754_v55  ;;  %v769_v9 = vor.u32 (!%p5892_p2), %v767_v1, %v766_v4  ;;  %v770_v10 = vrot.slane (!%p5892_p2), %v766_v4, 4 }
 0x13b   : > { %753 = vst [vmem:[#allocation2 + $0xc8] sm:$0xff] %v669_v59  ;;  %756 = vst [vmem:[#allocation2 + $0xd0] sm:$0x11] %v755_v60  ;;  %v777_v11 = vor.u32 (!%p5892_p2), %v775_v3, %v774_v6  ;;  %v779_v12 = vrot.slane (!%p5892_p2), %v774_v6, 4 }
 0x13c   : > { %v784_v13 = vsel %vm8219_vm2, %v769_v9, %v783_v7 }
 0x13d   : > { %v778_v14 = vsel %vm8232_vm3, %v770_v10, %v777_v11  ;;  %v788_v15 = vsel %vm8136_vm8, %v779_v12, %v787_v8  ;;  %785 = vst [vmem:[#allocation2] sm:$0xff] %v784_v13 }
 0x13e   : > { %786 = vst [vmem:[#allocation2 + $0x8] sm:$0xff] %v778_v14  ;;  %789 = vst [vmem:[#allocation2 + $0x10] sm:$0x11] %v788_v15 }
 0x13f PF: > { %s9545_s6 = sld [smem:[#allocation24_spill]] }
 0x145   : > { %p5893_p11 = scmp.ne.s32.totalorder %s9545_s6, 0 }
 0x146   : > { %v794_v16 = vld [vmem:[#allocation2] sm:$0xff] (!%p5893_p11)  ;;  %v798_v17 = vld [vmem:[#allocation2 + $0x10] sm:$0x11] (!%p5893_p11)  ;;  %v7654_v19 = vmov (!%p5893_p11), 0  }
 0x147   : > { %793 = sbr.rel (%p5893_p11) target bundleno = 334 (0x14e), region = 68  ;;  %v795_v18 = vsel (!%p5893_p11), %vm8219_vm2, 0, %v794_v16  ;;  %797 = vst [vmem:[#allocation2 + $0x8] sm:$0xff] (!%p5893_p11), %v7654_v19  ;;  %v799_v20 = vsel (!%p5893_p11), %vm8136_vm8, 0, %v798_v17 }
 0x148   : > { %796 = vst [vmem:[#allocation2] sm:$0xff] (!%p5893_p11), %v795_v18  ;;  %800 = vst [vmem:[#allocation2 + $0x10] sm:$0x11] (!%p5893_p11), %v799_v20 }
 0x14e PF: > { %s9546_s15 = sld [smem:[#allocation24_spill]] }
 0x154   : > { %p5894_p10 = scmp.ge.s32.totalorder %s9546_s15, 1 }
 0x155   : > { %v805_v21 = vld [vmem:[%s383_s19] sm:$0xff] (!%p5894_p10)  ;;  %v806_v22 = vld [vmem:[%s383_s19 + $0x8] sm:$0xff] (!%p5894_p10) }
 0x156   : > { %804 = sbr.rel (%p5894_p10) target bundleno = 351 (0x15f), region = 72  ;;  %v808_v23 = vshrl.u32 (!%p5894_p10), %v805_v21, 16  ;;  %v811_v24 = vshll.u32 (!%p5894_p10), %v805_v21, 16  ;;  %v816_v25 = vshrl.u32 (!%p5894_p10), %v806_v22, 16  ;;  %v819_v26 = vshll.u32 (!%p5894_p10), %v806_v22, 16  ;;  %v828_v29 = vld [vmem:[#allocation2 + $0xd8] sm:$0xff] (!%p5894_p10) }
 0x157   : > { %v832_v30 = vld [vmem:[#allocation2 + $0xe8] sm:$0x11] (!%p5894_p10) }
 0x158   : > { %v810_v27 = vrot.slane (!%p5894_p10), %v808_v23, 7  ;;  %v818_v28 = vrot.slane (!%p5894_p10), %v816_v25, 7 }
 0x15a   : > { %v813_v31 = vor.u32 (!%p5894_p10), %v811_v24, %v810_v27  ;;  %v814_v32 = vrot.slane (!%p5894_p10), %v810_v27, 4  ;;  %v821_v33 = vor.u32 (!%p5894_p10), %v819_v26, %v818_v28  ;;  %v823_v34 = vrot.slane (!%p5894_p10), %v818_v28, 4 }
 0x15c   : > { %v829_v35 = vsel (!%p5894_p10), %vm8219_vm2, %v813_v31, %v828_v29  ;;  %v822_v36 = vsel (!%p5894_p10), %vm8232_vm3, %v814_v32, %v821_v33  ;;  %v833_v37 = vsel (!%p5894_p10), %vm8136_vm8, %v823_v34, %v832_v30 }
 0x15d   : > { %830 = vst [vmem:[#allocation2 + $0xd8] sm:$0xff] %v829_v35  ;;  %831 = vst [vmem:[#allocation2 + $0xe0] sm:$0xff] %v822_v36 }
 0x15e   : > { %834 = vst [vmem:[#allocation2 + $0xe8] sm:$0x11] %v833_v37 }
 0x15f PF: > { %s9547_s27 = sld [smem:[#allocation24_spill]] }
 0x165   : > { %p5895_p4 = scmp.ne.s32.totalorder %s9547_s27, 1 }
 0x166   : > { %v840_v38 = vld [vmem:[#allocation2 + $0xd8] sm:$0xff] (!%p5895_p4)  ;;  %v844_v39 = vld [vmem:[#allocation2 + $0xe8] sm:$0x11] (!%p5895_p4)  ;;  %v7655_v41 = vmov (!%p5895_p4), 0  }
 0x167   : > { %838 = sbr.rel (%p5895_p4) target bundleno = 366 (0x16e), region = 76  ;;  %v841_v40 = vsel (!%p5895_p4), %vm8219_vm2, 0, %v840_v38  ;;  %843 = vst [vmem:[#allocation2 + $0xe0] sm:$0xff] (!%p5895_p4), %v7655_v41  ;;  %v845_v5 = vsel (!%p5895_p4), %vm8136_vm8, 0, %v844_v39 }
 0x168   : > { %842 = vst [vmem:[#allocation2 + $0xd8] sm:$0xff] (!%p5895_p4), %v841_v40  ;;  %846 = vst [vmem:[#allocation2 + $0xe8] sm:$0x11] (!%p5895_p4), %v845_v5 }
 0x16e PF: > { %v6843_v42 = vld [vmem:[#allocation9 + $0x104] ss:$8 sps:$4 sm:$0xff]   ;;  %v6847_v44 = vld [vmem:[#allocation9 + $0x100] ss:$8 sps:$4 sm:$0xff]   ;;  %v6849_v46 = vld [vmem:[#allocation9 + $0x114] ss:$8 sps:$4 sm:$0xff]  }
 0x16f   : > { %v6845_v43 = vld [vmem:[#allocation9 + $0x404] ss:$8 sps:$4 sm:$0xff]   ;;  %1355 = vmatprep.subr.bf16.mxu1 %v6843_v42  ;;  %v6848_v45 = vld [vmem:[#allocation9 + $0x400] ss:$8 sps:$4 sm:$0xff]   ;;  %v6851_v47 = vld [vmem:[#allocation9 + $0x414] ss:$8 sps:$4 sm:$0xff]  }
 0x170   : > { %3213 = vmatprep.subr.bf16.mxu0 %v6845_v43  ;;  %1356 = vmatpush1.bf16.msra.mxu1 %v6847_v44  ;;  %v6853_v50 = vld [vmem:[#allocation9 + $0x110] ss:$8 sps:$4 sm:$0xff]   ;;  %v6855_v49 = vld [vmem:[#allocation9 + $0x124] ss:$8 sps:$4 sm:$0xff]   ;;  %v6859_v51 = vld [vmem:[#allocation9 + $0x120] ss:$8 sps:$4 sm:$0xff]  }
 0x171   : > { %3214 = vmatpush1.bf16.msra.mxu0 %v6848_v45  ;;  %1357 = vmatprep.subr.bf16.mxu1 %v6849_v46  ;;  %v6854_v48 = vld [vmem:[#allocation9 + $0x410] ss:$8 sps:$4 sm:$0xff]   ;;  %v6857_v0 = vld [vmem:[#allocation9 + $0x424] ss:$8 sps:$4 sm:$0xff]   ;;  %v6860_v52 = vld [vmem:[#allocation9 + $0x420] ss:$8 sps:$4 sm:$0xff]  }
 0x172   : > { %3215 = vmatprep.subr.bf16.mxu0 %v6851_v47  ;;  %v6861_v53 = vld [vmem:[#allocation9 + $0x134] ss:$8 sps:$4 sm:$0xff]   ;;  %v6865_v55 = vld [vmem:[#allocation9 + $0x130] ss:$8 sps:$4 sm:$0xff]   ;;  %v6867_v57 = vld [vmem:[#allocation9 + $0x144] ss:$8 sps:$4 sm:$0xff]  }
 0x173   : > { %v6863_v54 = vld [vmem:[#allocation9 + $0x434] ss:$8 sps:$4 sm:$0xff]   ;;  %v6866_v56 = vld [vmem:[#allocation9 + $0x430] ss:$8 sps:$4 sm:$0xff]   ;;  %v6869_v58 = vld [vmem:[#allocation9 + $0x444] ss:$8 sps:$4 sm:$0xff]  }
 0x174   : > { %1358 = vmatpush1.bf16.msra.mxu1 %v6853_v50  ;;  %v6871_v59 = vld [vmem:[#allocation9 + $0x140] ss:$8 sps:$4 sm:$0xff]   ;;  %v6873_v61 = vld [vmem:[#allocation9 + $0x154] ss:$8 sps:$4 sm:$0xff]   ;;  %v6877_v63 = vld [vmem:[#allocation9 + $0x150] ss:$8 sps:$4 sm:$0xff]  }
 0x175   : > { %3216 = vmatpush1.bf16.msra.mxu0 %v6854_v48  ;;  %1359 = vmatprep.subr.bf16.mxu1 %v6855_v49  ;;  %v6872_v60 = vld [vmem:[#allocation9 + $0x440] ss:$8 sps:$4 sm:$0xff]   ;;  %v6875_v62 = vld [vmem:[#allocation9 + $0x454] ss:$8 sps:$4 sm:$0xff]   ;;  %v6878_v1 = vld [vmem:[#allocation9 + $0x450] ss:$8 sps:$4 sm:$0xff]  }
 0x176   : > { %3217 = vmatprep.subr.bf16.mxu0 %v6857_v0  ;;  %v6879_v2 = vld [vmem:[#allocation9 + $0x164] ss:$8 sps:$4 sm:$0xff]   ;;  %v6883_v4 = vld [vmem:[#allocation9 + $0x160] ss:$8 sps:$4 sm:$0xff]   ;;  %v6885_v7 = vld [vmem:[#allocation9 + $0x174] ss:$8 sps:$4 sm:$0xff]  }
 0x177   : > { %v6881_v3 = vld [vmem:[#allocation9 + $0x464] ss:$8 sps:$4 sm:$0xff]   ;;  %v6884_v6 = vld [vmem:[#allocation9 + $0x460] ss:$8 sps:$4 sm:$0xff]   ;;  %v6887_v8 = vld [vmem:[#allocation9 + $0x474] ss:$8 sps:$4 sm:$0xff]  }
 0x178   : > { %1360 = vmatpush1.bf16.msra.mxu1 %v6859_v51  ;;  %v6889_v9 = vld [vmem:[#allocation9 + $0x170] ss:$8 sps:$4 sm:$0xff]   ;;  %v6891_v11 = vld [vmem:[#allocation9 + $0x184] ss:$8 sps:$4 sm:$0xff]   ;;  %v6895_v13 = vld [vmem:[#allocation9 + $0x180] ss:$8 sps:$4 sm:$0xff]  }
 0x179   : > { %3218 = vmatpush1.bf16.msra.mxu0 %v6860_v52  ;;  %1361 = vmatprep.subr.bf16.mxu1 %v6861_v53  ;;  %v6890_v10 = vld [vmem:[#allocation9 + $0x470] ss:$8 sps:$4 sm:$0xff]   ;;  %v6893_v12 = vld [vmem:[#allocation9 + $0x484] ss:$8 sps:$4 sm:$0xff]   ;;  %v6896_v14 = vld [vmem:[#allocation9 + $0x480] ss:$8 sps:$4 sm:$0xff]  }
 0x17a   : > { %3219 = vmatprep.subr.bf16.mxu0 %v6863_v54  ;;  %v6897_v15 = vld [vmem:[#allocation9 + $0x194] ss:$8 sps:$4 sm:$0xff]   ;;  %v6901_v17 = vld [vmem:[#allocation9 + $0x190] ss:$8 sps:$4 sm:$0xff]   ;;  %v6903_v19 = vld [vmem:[#allocation9 + $0x1a4] ss:$8 sps:$4 sm:$0xff]  }
 0x17b   : > { %v6899_v16 = vld [vmem:[#allocation9 + $0x494] ss:$8 sps:$4 sm:$0xff]   ;;  %v6902_v18 = vld [vmem:[#allocation9 + $0x490] ss:$8 sps:$4 sm:$0xff]   ;;  %v6905_v20 = vld [vmem:[#allocation9 + $0x4a4] ss:$8 sps:$4 sm:$0xff]  }
 0x17c   : > { %1362 = vmatpush1.bf16.msra.mxu1 %v6865_v55  ;;  %v6907_v21 = vld [vmem:[#allocation9 + $0x1a0] ss:$8 sps:$4 sm:$0xff]   ;;  %v6909_v23 = vld [vmem:[#allocation9 + $0x1b4] ss:$8 sps:$4 sm:$0xff]   ;;  %vm903_vm1 = vsmask.f32 3328 }
 0x17d   : > { %3220 = vmatpush1.bf16.msra.mxu0 %v6866_v56  ;;  %1363 = vmatprep.subr.bf16.mxu1 %v6867_v57  ;;  %v6908_v22 = vld [vmem:[#allocation9 + $0x4a0] ss:$8 sps:$4 sm:$0xff]   ;;  %v6911_v24 = vld [vmem:[#allocation9 + $0x4b4] ss:$8 sps:$4 sm:$0xff]   ;;  %vm904_vm4 = vsmask.f32 7440 }
 0x17e   : > { %3221 = vmatprep.subr.bf16.mxu0 %v6869_v58  ;;  %v6913_v25 = vld [vmem:[#allocation9 + $0x1b0] ss:$8 sps:$4 sm:$0xff]   ;;  %v6915_v28 = vld [vmem:[#allocation9 + $0x1c4] ss:$8 sps:$4 sm:$0xff]   ;;  %v6919_v46 = vld [vmem:[#allocation9 + $0x1c0] ss:$8 sps:$4 sm:$0xff]  }
 0x17f   : > { %v6914_v26 = vld [vmem:[#allocation9 + $0x4b0] ss:$8 sps:$4 sm:$0xff]   ;;  %v6917_v29 = vld [vmem:[#allocation9 + $0x4c4] ss:$8 sps:$4 sm:$0xff]   ;;  %v6920_v0 = vld [vmem:[#allocation9 + $0x4c0] ss:$8 sps:$4 sm:$0xff]  }
 0x180   : > { %1364 = vmatpush1.bf16.msra.mxu1 %v6871_v59  ;;  %v847_v27 = vld [vmem:[#allocation2] sm:$0xff]  ;;  %v848_v30 = vld [vmem:[#allocation2 + $0x8] sm:$0xff]  ;;  %v895_v31 = vld [vmem:[#allocation2 + $0x10] sm:$0x11]  ;;  %vm1845_vm6 = vcmask 1042432   ;;  %vm1846_vm7 = vcmask 1046532  }
 0x181   : > { %3222 = vmatpush1.bf16.msra.mxu0 %v6872_v60  ;;  %1365 = vmatprep.subr.bf16.mxu1 %v6873_v61  ;;  %v907_v32 = vshrl.u32 %v847_v27, 16  ;;  %v910_v33 = vshll.u32 %v847_v27, 16  ;;  %v916_v34 = vshll.u32 %v848_v30, 16  ;;  %v920_v35 = vshrl.u32 %v848_v30, 16  ;;  %v8327_v37 = vld [vmem:[#allocation2 + $0x18] sm:$0xff]  ;;  %v8329_v38 = vld [vmem:[#allocation2 + $0x20] sm:$0xff]  ;;  %vm8339_vm5 = vmor %vm903_vm1, %vm904_vm4 }
 0x182   : > { %3223 = vmatprep.subr.bf16.mxu0 %v6875_v62  ;;  %v926_v36 = vshll.u32 %v895_v31, 16  ;;  %v8331_v41 = vld [vmem:[#allocation2 + $0x28] sm:$0x11]  ;;  %v2765_v5 = vshrl.u32 %v8327_v37, 16  ;;  %v2768_v42 = vshll.u32 %v8327_v37, 16  ;;  %v2774_v45 = vshll.u32 %v8329_v38, 16  ;;  %vm8660_vm8 = vmor %vm1845_vm6, %vm1846_vm7 }
 0x183   : > { %v909_v39 = vrot.slane %v907_v32, 4  ;;  %v912_v40 = vrot.slane %v910_v33, 5  ;;  %v918_v43 = vrot.slane %v916_v34, 5  ;;  %v922_v44 = vrot.slane %v920_v35, 4  ;;  %v6921_v56 = vld [vmem:[#allocation9 + $0x1d4] ss:$8 sps:$4 sm:$0xff]  }
 0x184   : > { %1366 = vmatpush1.bf16.msra.mxu1 %v6877_v63  ;;  %v2767_v50 = vrot.slane %v2765_v5, 4  ;;  %v2770_v48 = vrot.slane %v2768_v42, 5  ;;  %v2778_v49 = vshrl.u32 %v8329_v38, 16  ;;  %v928_v53 = vrot.slane %v926_v36, 5  ;;  %v6923_v57 = vld [vmem:[#allocation9 + $0x4d4] ss:$8 sps:$4 sm:$0xff]  }
 0x185   : > { %3224 = vmatpush1.bf16.msra.mxu0 %v6878_v1  ;;  %1367 = vmatprep.subr.bf16.mxu1 %v6879_v2  ;;  %v913_v47 = vor.u32 %v912_v40, %v909_v39  ;;  %v923_v52 = vor.u32 %v922_v44, %v918_v43  ;;  %v2776_v54 = vrot.slane %v2774_v45, 5  ;;  %v2784_v55 = vshll.u32 %v8331_v41, 16  ;;  %v6925_v61 = vld [vmem:[#allocation9 + $0x1d0] ss:$8 sps:$4 sm:$0xff]   ;;  %v6935_v31 = vld [vmem:[#allocation9 + $0x4f4] ss:$8 sps:$4 sm:$0xff]  }
 0x186   : > { %3225 = vmatprep.subr.bf16.mxu0 %v6881_v3  ;;  %v2771_v59 = vor.u32 %v2770_v48, %v2767_v50  ;;  %v2780_v60 = vrot.slane %v2778_v49, 4  ;;  %v5947_v63 = vcombine.high %v8327_v37, %v8329_v38  ;;  %v6926_v1 = vld [vmem:[#allocation9 + $0x4d0] ss:$8 sps:$4 sm:$0xff]   ;;  %v6941_v45 = vld [vmem:[#allocation9 + $0x4] ss:$8 sps:$4 sm:$0xff]   ;;  %s9567_s16 = sld [smem:[#allocation25_spill]] }
 0x187   : > { %v914_v58 = vrot.slane %v913_v47, 4  ;;  %v924_v62 = vrot.slane %v923_v52, 4  ;;  %v6937_v36 = vld [vmem:[#allocation9 + $0x1f0] ss:$8 sps:$4 sm:$0xff]   ;;  %v7016_v27 = vld [vmem:[#allocation9 + $0x5c4] ss:$8 sps:$4 sm:$0xff]  }
 0x188   : > { %1368 = vmatpush1.bf16.msra.mxu1 %v6883_v4  ;;  %v2772_v3 = vrot.slane %v2771_v59, 4  ;;  %v2781_v4 = vor.u32 %v2780_v60, %v2776_v54  ;;  %v6938_v40 = vld [vmem:[#allocation9 + $0x4f0] ss:$8 sps:$4 sm:$0xff]   ;;  %s9568_s1 = sld [smem:[#allocation24_spill]]  ;;  %s5687_s24 = sshll.u32 %s8293_s17, 4  ;;  %s9309_s24 = int_to_ptr.vmem [resolvable:$true] %s5687_s24 }
 0x189   : > { %3226 = vmatpush1.bf16.msra.mxu0 %v6884_v6  ;;  %1369 = vmatprep.subr.bf16.mxu1 %v6885_v7  ;;  %v8348_v2 = vsel %vm8339_vm5, %v914_v58, %v918_v43  ;;  %v2786_v6 = vrot.slane %v2784_v55, 5  ;;  %v6927_v7 = vld [vmem:[#allocation9 + $0x1e4] ss:$8 sps:$4 sm:$0xff]   ;;  %v8388_v47 = vld [vmem:[#allocation2 + $0x40] sm:$0x11]  ;;  %v8395_v52 = vld [vmem:[#allocation2 + $0x48] sm:$0xff] }
 0x18a   : > { %3227 = vmatprep.subr.bf16.mxu0 %v6887_v8  ;;  %v6929_v8 = vld [vmem:[#allocation9 + $0x4e4] ss:$8 sps:$4 sm:$0xff]   ;;  %v8587_v39 = vld [vmem:[#allocation2 + $0xc8] sm:$0xff]  ;;  %s9570_s23 = sld [smem:[#allocation28_spill]]  ;;  %s9571_s3 = sld [smem:[#allocation44_spill]] }
 0x18b   : > { %v8399_v55 = vld [vmem:[#allocation2 + $0x58] sm:$0x11]  ;;  %s9319_s18 = scalar_lea.sflag [#allocation5], %s425_s2  ;;  %s7463_s19 = scalar_lea.vmem %s9309_s24, 4096 }
 0x18c   : > { %1370 = vmatpush1.bf16.msra.mxu1 %v6889_v9  ;;  %v8352_v9 = vsel %vm8339_vm5, %v924_v62, %v928_v53  ;;  %v8397_v53 = vld [vmem:[#allocation2 + $0x50] sm:$0xff]  ;;  %s6353_s13 = sshll.u32 %s9567_s16, 1  ;;  %p7464_p13 = scmp.ne.s32.totalorder %s9309_s24, %s7463_s19 }
 0x18d   : > { %3228 = vmatpush1.bf16.msra.mxu0 %v6890_v10  ;;  %1371 = vmatprep.subr.bf16.mxu1 %v6891_v11  ;;  %v8354_v10 = vld [vmem:[#allocation2 + $0x28] sm:$0x11]  ;;  %v5896_v44 = vcombine.low %v8348_v2, %v8352_v9  ;;  %v2822_v58 = vshll.u32 %v8397_v53, 16  ;;  %v2826_v59 = vshrl.u32 %v8397_v53, 16  ;;  %s7656_s12 = smov [#allocation12]  }
 0x18e   : > { %3229 = vmatprep.subr.bf16.mxu0 %v6893_v12  ;;  %v5897_v12 = vcombine.high %v8348_v2, %v8352_v9  ;;  %v2832_v2 = vshll.u32 %v8399_v55, 16  ;;  %s9282_s8 = sadd.s32 %s9568_s1, %s6353_s13  ;;  %s7467_s4 = sshll.u32 %s7656_s12, 4  ;;  %s7468_s4 = int_to_ptr.vmem [resolvable:$false] %s7467_s4 }
 0x18f   : > { %v2824_v9 = vrot.slane %v2822_v58, 5  ;;  %v6962_v58 = vld [vmem:[#allocation9 + $0x534] ss:$8 sps:$4 sm:$0xff]   ;;  %s6367_s14 = sshll.u32 %s9282_s8, 12  ;;  %s7469_s25 = scalar_lea.vmem %s7468_s4, 8192 }
 0x190   : > { %1372 = vmatpush1.bf16.msra.mxu1 %v6895_v13  ;;  %v8362_v13 = vsel %vm8339_vm5, %v2772_v3, %v2776_v54  ;;  %1387 = vmatprep.mubr.bf16.mxu1 %v5897_v12  ;;  %v6939_v54 = vld [vmem:[#allocation9] ss:$8 sps:$4 sm:$0xff]   ;;  %v6947_v3 = vld [vmem:[#allocation9 + $0x14] ss:$8 sps:$4 sm:$0xff]   ;;  %v2828_v12 = vrot.slane %v2826_v59, 4  ;;  %s9307_s10 = scalar_lea.hbm %s9571_s3, %s6367_s14  ;;  %p9572_p7 = scmp.ne.s32.totalorder %s9570_s23, 0 }
 0x191   : > { %3230 = vmatpush1.bf16.msra.mxu0 %v6896_v14  ;;  %1373 = vmatprep.subr.bf16.mxu1 %v6897_v15  ;;  %v2782_v14 = vrot.slane %v2781_v4, 4  ;;  %v8364_v15 = vld [vmem:[#allocation2 + $0x30] sm:$0xff]  ;;  %p7470_p6 = scmp.lt.s32.totalorder %s9309_s24, %s7468_s4  ;;  %p7471_p1 = scmp.lt.s32.totalorder %s7469_s25, %s7463_s19 }
 0x192   : > { %3231 = vmatprep.subr.bf16.mxu0 %v6899_v16  ;;  %v8366_v16 = vld [vmem:[#allocation2 + $0x38] sm:$0xff]  ;;  %p7465_p8 = pnand %p7464_p13, %p9572_p7 }
 0x193   : > { %p7472_p3 = por %p7471_p1, %p7470_p6 }
 0x194   : > { %1374 = vmatpush1.bf16.msra.mxu1 %v6901_v17  ;;  %v8368_v17 = vld [vmem:[#allocation2 + $0x40] sm:$0x11]  ;;  %p7466_p9 = pneg %p7465_p8 }
 0x195   : > { %3232 = vmatpush1.bf16.msra.mxu0 %v6902_v18  ;;  %1375 = vmatprep.subr.bf16.mxu1 %v6903_v19  ;;  %v950_v18 = vshll.u32 %v8354_v10, 16  ;;  %v2789_v19 = vshrl.u32 %v8364_v15, 16 }
 0x196   : > { %3233 = vmatprep.subr.bf16.mxu0 %v6905_v20  ;;  %v2792_v20 = vshll.u32 %v8364_v15, 16  ;;  %p7473_p12 = pnand %p7472_p3, %p7466_p9 }
 0x197   : > { %v2791_v30 = vrot.slane %v2789_v19, 4  ;;  %v952_v32 = vrot.slane %v950_v18, 5  ;;  %v6948_v18 = vld [vmem:[#allocation9 + $0x510] ss:$8 sps:$4 sm:$0xff]  }
 0x198   : > { %1376 = vmatpush1.bf16.msra.mxu1 %v6907_v21  ;;  %v2798_v21 = vshll.u32 %v8366_v16, 16  ;;  %v2794_v33 = vrot.slane %v2792_v20, 5 }
 0x199   : > { %3234 = vmatpush1.bf16.msra.mxu0 %v6908_v22  ;;  %1377 = vmatprep.subr.bf16.mxu1 %v6909_v23  ;;  %v6931_v22 = vld [vmem:[#allocation9 + $0x1e0] ss:$8 sps:$4 sm:$0xff]   ;;  %v8392_v50 = vsel %vm8339_vm5, %v2782_v14, %v952_v32  ;;  %v8428_v32 = vld [vmem:[#allocation2 + $0x60] sm:$0xff] }
 0x19a   : > { %3235 = vmatprep.subr.bf16.mxu0 %v6911_v24  ;;  %v6932_v23 = vld [vmem:[#allocation9 + $0x4e0] ss:$8 sps:$4 sm:$0xff]   ;;  %v8376_v24 = vsel %vm8339_vm5, %v2782_v14, %v2786_v6  ;;  %v2800_v34 = vrot.slane %v2798_v21, 5  ;;  %v2795_v5 = vor.u32 %v2794_v33, %v2791_v30  ;;  %v6945_v14 = vld [vmem:[#allocation9 + $0x10] ss:$8 sps:$4 sm:$0xff]  }
 0x19b   : > { %v6096_v60 = vcombine.low %v8362_v13, %v8376_v24 }
 0x19c   : > { %1378 = vmatpush1.bf16.msra.mxu1 %v6913_v25  ;;  %v2802_v25 = vshrl.u32 %v8366_v16, 16  ;;  %v2796_v48 = vrot.slane %v2795_v5, 4 }
 0x19d   : > { %3236 = vmatpush1.bf16.msra.mxu0 %v6914_v26  ;;  %1379 = vmatprep.subr.bf16.mxu1 %v6915_v28  ;;  %v2808_v26 = vshll.u32 %v8368_v17, 16  ;;  %v6933_v28 = vld [vmem:[#allocation9 + $0x1f4] ss:$8 sps:$4 sm:$0xff]  }
 0x19e   : > { %3237 = vmatprep.subr.bf16.mxu0 %v6917_v29  ;;  %v6097_v29 = vcombine.high %v8362_v13, %v8376_v24  ;;  %v2804_v35 = vrot.slane %v2802_v25, 4  ;;  %v8409_v62 = vsel %vm8339_vm5, %v2796_v48, %v2800_v34  ;;  %v2829_v24 = vor.u32 %v2828_v12, %v2824_v9 }
 0x19f   : > { %v2810_v43 = vrot.slane %v2808_v26, 5  ;;  %v2834_v25 = vrot.slane %v2832_v2, 5  ;;  %v6960_v2 = vld [vmem:[#allocation9 + $0x530] ss:$8 sps:$4 sm:$0xff]   ;;  %v8585_v26 = vld [vmem:[#allocation2 + $0xb8] sm:$0x11] }
 0x1a0   : > { %1380 = vmatpush1.bf16.msra.mxu1 %v6919_v46  ;;  %3245 = vmatprep.mubr.bf16.mxu0 %v6097_v29  ;;  %v2805_v42 = vor.u32 %v2804_v35, %v2800_v34  ;;  %v6944_v46 = vld [vmem:[#allocation9 + $0x504] ss:$8 sps:$4 sm:$0xff]   ;;  %v2830_v34 = vrot.slane %v2829_v24, 4  ;;  %v8470_v24 = vld [vmem:[#allocation2 + $0x80] sm:$0xff] }
 0x1a1   : > { %3238 = vmatpush1.bf16.msra.mxu0 %v6920_v0  ;;  %1381 = vmatprep.subr.bf16.mxu1 %v6921_v56  ;;  %v974_v0 = vshll.u32 %v8388_v47, 16  ;;  %v2813_v56 = vshrl.u32 %v8395_v52, 16  ;;  %v6956_v29 = vld [vmem:[#allocation9 + $0x524] ss:$8 sps:$4 sm:$0xff]  }
 0x1a2   : > { %3239 = vmatprep.subr.bf16.mxu0 %v6923_v57  ;;  %v2806_v49 = vrot.slane %v2805_v42, 4  ;;  %v2816_v57 = vshll.u32 %v8395_v52, 16  ;;  %v2840_v42 = vshll.u32 %v8428_v32, 16 }
 0x1a3   : > { %v2815_v4 = vrot.slane %v2813_v56, 4  ;;  %v976_v20 = vrot.slane %v974_v0, 5 }
 0x1a4   : > { %1382 = vmatpush1.bf16.msra.mxu1 %v6925_v61  ;;  %v6942_v61 = vld [vmem:[#allocation9 + $0x500] ss:$8 sps:$4 sm:$0xff]   ;;  %v2818_v6 = vrot.slane %v2816_v57, 5  ;;  %v2842_v56 = vrot.slane %v2840_v42, 5 }
 0x1a5   : > { %3240 = vmatpush1.bf16.msra.mxu0 %v6926_v1  ;;  %1383 = vmatprep.subr.bf16.mxu1 %v6927_v7  ;;  %v8413_v1 = vsel %vm8339_vm5, %v2806_v49, %v2810_v43  ;;  %v6950_v7 = vld [vmem:[#allocation9 + $0x514] ss:$8 sps:$4 sm:$0xff]   ;;  %v8440_v5 = vsel %vm8339_vm5, %v2806_v49, %v976_v20  ;;  %v6954_v49 = vld [vmem:[#allocation9 + $0x520] ss:$8 sps:$4 sm:$0xff]  }
 0x1a6   : > { %3241 = vmatprep.subr.bf16.mxu0 %v6929_v8  ;;  %v5899_v8 = vcombine.high %v8362_v13, %v8392_v50  ;;  %v6099_v19 = vcombine.high %v8409_v62, %v8413_v1  ;;  %v2819_v21 = vor.u32 %v2818_v6, %v2815_v4  ;;  %v6098_v33 = vcombine.low %v8409_v62, %v8413_v1  ;;  %v6957_v1 = vld [vmem:[#allocation9 + $0x30] ss:$8 sps:$4 sm:$0xff]  }
 0x1a8   : > { %1384 = vmatpush1.bf16.msra.mxu1 %v6931_v22  ;;  %v2820_v30 = vrot.slane %v2819_v21, 4  ;;  %v8466_v21 = vld [vmem:[#allocation2 + $0x70] sm:$0x11]  ;;  %v2761_v22 = vld [vmem:[#allocation2 + $0xc0] sm:$0xff] }
 0x1a9   : > { %3242 = vmatpush1.bf16.msra.mxu0 %v6932_v23  ;;  %1385 = vmatprep.subr.bf16.mxu1 %v6933_v28  ;;  %v6953_v23 = vld [vmem:[#allocation9 + $0x24] ss:$8 sps:$4 sm:$0xff]   ;;  %v5898_v28 = vcombine.low %v8362_v13, %v8392_v50  ;;  %v2837_v13 = vshrl.u32 %v8428_v32, 16  ;;  %v8451_v50 = vsel %vm8339_vm5, %v2830_v34, %v2834_v25 }
 0x1aa   : > { %3243 = vmatprep.subr.bf16.mxu0 %v6935_v31  ;;  %v8426_v31 = vld [vmem:[#allocation2 + $0x58] sm:$0x11] }
 0x1ab   : > { %v998_v35 = vshll.u32 %v8426_v31, 16  ;;  %v2839_v48 = vrot.slane %v2837_v13, 4  ;;  %v2870_v13 = vshll.u32 %v8470_v24, 16 }
 0x1ac   : > { %1386 = vmatpush1.bf16.msra.mxu1 %v6937_v36  ;;  %v8433_v36 = vld [vmem:[#allocation2 + $0x68] sm:$0xff] }
 0x1ad   : > { %3244 = vmatpush1.bf16.msra.mxu0 %v6938_v40  ;;  %1708 = vmatprep.subr.bf16.mxu1 %v6941_v45  ;;  %v8435_v40 = vld [vmem:[#allocation2 + $0x70] sm:$0x11]  ;;  %v2846_v43 = vshll.u32 %v8433_v36, 16  ;;  %v1000_v59 = vrot.slane %v998_v35, 5  ;;  %v2843_v6 = vor.u32 %v2842_v56, %v2839_v48  ;;  %v1022_v35 = vshll.u32 %v8466_v21, 16 }
 0x1ae   : > { %3703 = vmatprep.subr.bf16.mxu0 %v6944_v46  ;;  %v6951_v45 = vld [vmem:[#allocation9 + $0x20] ss:$8 sps:$4 sm:$0xff]   ;;  %v8447_v46 = vsel %vm8339_vm5, %v2820_v30, %v2824_v9  ;;  %v2856_v0 = vshll.u32 %v8435_v40, 16  ;;  %v6971_v48 = vld [vmem:[#allocation9 + $0x54] ss:$8 sps:$4 sm:$0xff]  }
 0x1af   : > { %1388 = vmatmul.mubr.bf16.vlgmr.msra.gmra.mrb[0].mxu1 %v5896_v44  ;;  %v2850_v44 = vshrl.u32 %v8433_v36, 16  ;;  %v2848_v57 = vrot.slane %v2846_v43, 5  ;;  %v6101_v4 = vcombine.high %v8447_v46, %v8451_v50  ;;  %v2844_v20 = vrot.slane %v2843_v6, 4 }
 0x1b0   : > { %3246 = vmatmul.mubr.bf16.vlgmr.msra.gmra.mrb[0].mxu0 %v6096_v60  ;;  %1709 = vmatpush1.bf16.msra.mxu1 %v6939_v54  ;;  %v6959_v54 = vld [vmem:[#allocation9 + $0x34] ss:$8 sps:$4 sm:$0xff]   ;;  %v2858_v12 = vrot.slane %v2856_v0, 5  ;;  %v8474_v25 = vsel %vm8339_vm5, %v2830_v34, %v1000_v59  ;;  %v2874_v34 = vshrl.u32 %v8470_v24, 16  ;;  %v2872_v0 = vrot.slane %v2870_v13, 5 }
 0x1b1   : > { %3704 = vmatpush1.bf16.msra.mxu0 %v6942_v61  ;;  %1710 = vmatprep.subr.bf16.mxu1 %v6947_v3  ;;  %v2852_v60 = vrot.slane %v2850_v44, 4  ;;  %v5901_v3 = vcombine.high %v8409_v62, %v8440_v5  ;;  %v5903_v59 = vcombine.high %v8447_v46, %v8474_v25 }
 0x1b2   : > { %3705 = vmatprep.subr.bf16.mxu0 %v6950_v7  ;;  %1397 = vmatprep.mubr.bf16.mxu1 %v5899_v8  ;;  %v6965_v7 = vld [vmem:[#allocation9 + $0x44] ss:$8 sps:$4 sm:$0xff]  }
 0x1b3   : > { %3255 = vmatprep.mubr.bf16.mxu0 %v6099_v19  ;;  %v6968_v8 = vld [vmem:[#allocation9 + $0x544] ss:$8 sps:$4 sm:$0xff]   ;;  %v2853_v9 = vor.u32 %v2852_v60, %v2848_v57  ;;  %v6100_v19 = vcombine.low %v8447_v46, %v8451_v50  ;;  %v6966_v50 = vld [vmem:[#allocation9 + $0x540] ss:$8 sps:$4 sm:$0xff]  }
 0x1b4   : > { %1711 = vmatpush1.bf16.msra.mxu1 %v6945_v14  ;;  %v6996_v14 = vld [vmem:[#allocation9 + $0x590] ss:$8 sps:$4 sm:$0xff]  }
 0x1b5   : > { %3706 = vmatpush1.bf16.msra.mxu0 %v6948_v18  ;;  %1712 = vmatprep.subr.bf16.mxu1 %v6953_v23  ;;  %v5900_v18 = vcombine.low %v8409_v62, %v8440_v5  ;;  %v8468_v23 = vld [vmem:[#allocation2 + $0x78] sm:$0xff] }
 0x1b6   : > { %3707 = vmatprep.subr.bf16.mxu0 %v6956_v29  ;;  %v8476_v29 = vld [vmem:[#allocation2 + $0x88] sm:$0x11]  ;;  %v2861_v62 = vshrl.u32 %v8468_v23, 16  ;;  %v2864_v30 = vshll.u32 %v8468_v23, 16  ;;  %v6963_v5 = vld [vmem:[#allocation9 + $0x40] ss:$8 sps:$4 sm:$0xff]  }
 0x1b7   : > { %1398 = vmatmul.mubr.bf16.gmra.mrb[4].mxu1 %v5898_v28  ;;  %v2854_v28 = vrot.slane %v2853_v9, 4 }
 0x1b8   : > { %3256 = vmatmul.mubr.bf16.gmra.mrb[4].mxu0 %v6098_v33  ;;  %1713 = vmatpush1.bf16.msra.mxu1 %v6951_v45  ;;  %v8482_v33 = vsel %vm8339_vm5, %v2844_v20, %v2848_v57  ;;  %v2863_v43 = vrot.slane %v2861_v62, 4  ;;  %v2866_v44 = vrot.slane %v2864_v30, 5  ;;  %v2880_v45 = vshll.u32 %v8476_v29, 16  ;;  %v6969_v57 = vld [vmem:[#allocation9 + $0x50] ss:$8 sps:$4 sm:$0xff]   ;;  %v8504_v62 = vld [vmem:[#allocation2 + $0x90] sm:$0xff] }
 0x1b9   : > { %3708 = vmatpush1.bf16.msra.mxu0 %v6954_v49  ;;  %1714 = vmatprep.subr.bf16.mxu1 %v6959_v54  ;;  %v8489_v42 = vsel %vm8339_vm5, %v2854_v28, %v2858_v12  ;;  %v2876_v49 = vrot.slane %v2874_v34, 4  ;;  %v6974_v54 = vld [vmem:[#allocation9 + $0x554] ss:$8 sps:$4 sm:$0xff]   ;;  %v2885_v13 = vshrl.u32 %v8504_v62, 16  ;;  %v2888_v34 = vshll.u32 %v8504_v62, 16 }
 0x1ba   : > { %3709 = vmatprep.subr.bf16.mxu0 %v6962_v58  ;;  %1407 = vmatprep.mubr.bf16.mxu1 %v5901_v3  ;;  %v2867_v56 = vor.u32 %v2866_v44, %v2863_v43  ;;  %v6972_v58 = vld [vmem:[#allocation9 + $0x550] ss:$8 sps:$4 sm:$0xff]   ;;  %v6103_v60 = vcombine.high %v8482_v33, %v8489_v42  ;;  %v1024_v3 = vrot.slane %v1022_v35, 5  ;;  %v2882_v9 = vrot.slane %v2880_v45, 5 }
 0x1bb   : > { %3265 = vmatprep.mubr.bf16.mxu0 %v6101_v4  ;;  %v2877_v4 = vor.u32 %v2876_v49, %v2872_v0  ;;  %v8502_v20 = vld [vmem:[#allocation2 + $0x88] sm:$0x11]  ;;  %v6102_v30 = vcombine.low %v8482_v33, %v8489_v42  ;;  %v8512_v35 = vld [vmem:[#allocation2 + $0xa0] sm:$0x11]  ;;  %v6978_v42 = vld [vmem:[#allocation9 + $0x560] ss:$8 sps:$4 sm:$0xff]  }
 0x1bc   : > { %1715 = vmatpush1.bf16.msra.mxu1 %v6957_v1  ;;  %v6977_v1 = vld [vmem:[#allocation9 + $0x64] ss:$8 sps:$4 sm:$0xff]   ;;  %v2868_v6 = vrot.slane %v2867_v56, 4  ;;  %v8518_v43 = vsel %vm8339_vm5, %v2854_v28, %v1024_v3  ;;  %v1046_v44 = vshll.u32 %v8502_v20, 16  ;;  %v2904_v28 = vshll.u32 %v8512_v35, 16 }
 0x1bd   : > { %3710 = vmatpush1.bf16.msra.mxu0 %v6960_v2  ;;  %1716 = vmatprep.subr.bf16.mxu1 %v6965_v7  ;;  %v6980_v2 = vld [vmem:[#allocation9 + $0x564] ss:$8 sps:$4 sm:$0xff]   ;;  %v8500_v12 = vrot.slane %v2877_v4, 4  ;;  %v6983_v49 = vld [vmem:[#allocation9 + $0x74] ss:$8 sps:$4 sm:$0xff]  }
 0x1be   : > { %3711 = vmatprep.subr.bf16.mxu0 %v6968_v8  ;;  %v8525_v45 = vsel %vm8339_vm5, %v2868_v6, %v2872_v0  ;;  %v5905_v0 = vcombine.high %v8482_v33, %v8518_v43  ;;  %v6981_v4 = vld [vmem:[#allocation9 + $0x70] ss:$8 sps:$4 sm:$0xff]  }
 0x1bf   : > { %1408 = vmatmul.mubr.bf16.gmra.mrb[8].mxu1 %v5900_v18  ;;  %v8506_v18 = vld [vmem:[#allocation2 + $0x98] sm:$0xff]  ;;  %v6984_v6 = vld [vmem:[#allocation9 + $0x570] ss:$8 sps:$4 sm:$0xff]  }
 0x1c0   : > { %3266 = vmatmul.mubr.bf16.gmra.mrb[8].mxu0 %v6100_v19  ;;  %1717 = vmatpush1.bf16.msra.mxu1 %v6963_v5  ;;  %v5902_v19 = vcombine.low %v8447_v46, %v8474_v25  ;;  %v6975_v5 = vld [vmem:[#allocation9 + $0x60] ss:$8 sps:$4 sm:$0xff]   ;;  %v2894_v46 = vshll.u32 %v8506_v18, 16  ;;  %v2898_v25 = vshrl.u32 %v8506_v18, 16  ;;  %v8543_v8 = vld [vmem:[#allocation2 + $0xa0] sm:$0x11] }
 0x1c1   : > { %3712 = vmatpush1.bf16.msra.mxu0 %v6966_v50  ;;  %1718 = vmatprep.subr.bf16.mxu1 %v6971_v48  ;;  %v8530_v50 = vsel %vm8339_vm5, %v8500_v12, %v2882_v9  ;;  %v2887_v48 = vrot.slane %v2885_v13, 4  ;;  %v8545_v7 = vld [vmem:[#allocation2 + $0xa8] sm:$0xff] }
 0x1c2   : > { %3713 = vmatprep.subr.bf16.mxu0 %v6974_v54  ;;  %1417 = vmatprep.mubr.bf16.mxu1 %v5903_v59  ;;  %v2890_v54 = vrot.slane %v2888_v34, 5  ;;  %v2896_v56 = vrot.slane %v2894_v46, 5  ;;  %v2900_v59 = vrot.slane %v2898_v25, 4  ;;  %v6105_v9 = vcombine.high %v8525_v45, %v8530_v50  ;;  %v6989_v34 = vld [vmem:[#allocation9 + $0x84] ss:$8 sps:$4 sm:$0xff]  }
 0x1c3   : > { %3275 = vmatprep.mubr.bf16.mxu0 %v6103_v60  ;;  %v6986_v60 = vld [vmem:[#allocation9 + $0x574] ss:$8 sps:$4 sm:$0xff]  }
 0x1c4   : > { %1719 = vmatpush1.bf16.msra.mxu1 %v6969_v57  ;;  %v1048_v57 = vrot.slane %v1046_v44, 5  ;;  %v2901_v13 = vor.u32 %v2900_v59, %v2896_v56  ;;  %v8547_v44 = vld [vmem:[#allocation2 + $0xb0] sm:$0xff]  ;;  %v6998_v46 = vld [vmem:[#allocation9 + $0x594] ss:$8 sps:$4 sm:$0xff]  }
 0x1c5   : > { %3714 = vmatpush1.bf16.msra.mxu0 %v6972_v58  ;;  %1720 = vmatprep.subr.bf16.mxu1 %v6977_v1  ;;  %v2891_v58 = vor.u32 %v2890_v54, %v2887_v48  ;;  %v6992_v1 = vld [vmem:[#allocation9 + $0x584] ss:$8 sps:$4 sm:$0xff]   ;;  %v2909_v48 = vshrl.u32 %v8545_v7, 16  ;;  %v6104_v54 = vcombine.low %v8525_v45, %v8530_v50  ;;  %v6990_v59 = vld [vmem:[#allocation9 + $0x580] ss:$8 sps:$4 sm:$0xff]  }
 0x1c6   : > { %3715 = vmatprep.subr.bf16.mxu0 %v6980_v2  ;;  %v2906_v2 = vrot.slane %v2904_v28, 5  ;;  %v8541_v3 = vrot.slane %v2901_v13, 4  ;;  %v6987_v28 = vld [vmem:[#allocation9 + $0x80] ss:$8 sps:$4 sm:$0xff]  }
 0x1c7   : > { %1418 = vmatmul.mubr.bf16.gmra.mrb[12].mxu1 %v5902_v19  ;;  %v2892_v25 = vrot.slane %v2891_v58, 4  ;;  %v5904_v19 = vcombine.low %v8482_v33, %v8518_v43  ;;  %v1070_v33 = vshll.u32 %v8543_v8, 16  ;;  %v2922_v43 = vshrl.u32 %v8547_v44, 16 }
 0x1c8   : > { %3276 = vmatmul.mubr.bf16.gmra.mrb[12].mxu0 %v6102_v30  ;;  %1721 = vmatpush1.bf16.msra.mxu1 %v6975_v5  ;;  %v8551_v30 = vld [vmem:[#allocation2 + $0xb8] sm:$0x11]  ;;  %v2912_v5 = vshll.u32 %v8545_v7, 16  ;;  %v2911_v50 = vrot.slane %v2909_v48, 4 }
 0x1c9   : > { %3716 = vmatpush1.bf16.msra.mxu0 %v6978_v42  ;;  %1722 = vmatprep.subr.bf16.mxu1 %v6983_v49  ;;  %v2918_v42 = vshll.u32 %v8547_v44, 16  ;;  %v8561_v49 = vsel %vm8339_vm5, %v8500_v12, %v1048_v57  ;;  %v6995_v12 = vld [vmem:[#allocation9 + $0x94] ss:$8 sps:$4 sm:$0xff]   ;;  %v2924_v13 = vrot.slane %v2922_v43, 4 }
 0x1ca   : > { %3717 = vmatprep.subr.bf16.mxu0 %v6986_v60  ;;  %1427 = vmatprep.mubr.bf16.mxu1 %v5905_v0  ;;  %v8567_v60 = vsel %vm8339_vm5, %v2892_v25, %v2896_v56  ;;  %v8572_v0 = vsel %vm8339_vm5, %v8541_v3, %v2906_v2  ;;  %v2914_v57 = vrot.slane %v2912_v5, 5  ;;  %v5907_v56 = vcombine.high %v8525_v45, %v8561_v49  ;;  %v6993_v2 = vld [vmem:[#allocation9 + $0x90] ss:$8 sps:$4 sm:$0xff]   ;;  %v7001_v5 = vld [vmem:[#allocation9 + $0xa4] ss:$8 sps:$4 sm:$0xff]  }
 0x1cb   : > { %3285 = vmatprep.mubr.bf16.mxu0 %v6105_v9  ;;  %v2928_v9 = vshll.u32 %v8551_v30, 16  ;;  %v2920_v58 = vrot.slane %v2918_v42, 5  ;;  %v6107_v48 = vcombine.high %v8567_v60, %v8572_v0  ;;  %v7013_v42 = vld [vmem:[#allocation9 + $0xc4] ss:$8 sps:$4 sm:$0xff]  }
 0x1cc   : > { %1723 = vmatpush1.bf16.msra.mxu1 %v6981_v4  ;;  %v1072_v4 = vrot.slane %v1070_v33, 5  ;;  %v2933_v33 = vshrl.u32 %v2761_v22, 16 }
 0x1cd   : > { %3718 = vmatpush1.bf16.msra.mxu0 %v6984_v6  ;;  %1724 = vmatprep.subr.bf16.mxu1 %v6989_v34  ;;  %v2915_v6 = vor.u32 %v2914_v57, %v2911_v50  ;;  %v2925_v61 = vor.u32 %v2924_v13, %v2920_v58  ;;  %v7004_v34 = vld [vmem:[#allocation9 + $0x5a4] ss:$8 sps:$4 sm:$0xff]   ;;  %v2936_v50 = vshll.u32 %v2761_v22, 16 }
 0x1ce   : > { %3719 = vmatprep.subr.bf16.mxu0 %v6992_v1  ;;  %v2930_v1 = vrot.slane %v2928_v9, 5  ;;  %v8599_v9 = vsel %vm8339_vm5, %v8541_v3, %v1072_v4  ;;  %v7007_v3 = vld [vmem:[#allocation9 + $0xb4] ss:$8 sps:$4 sm:$0xff]   ;;  %v3395_v4 = vrot.slane %v8331_v41, 5 }
 0x1cf   : > { %1428 = vmatmul.mubr.bf16.gmra.mrb[16].mxu1 %v5904_v19  ;;  %v2916_v43 = vrot.slane %v2915_v6, 4  ;;  %v8583_v25 = vrot.slane %v2925_v61, 4  ;;  %v5906_v19 = vcombine.low %v8525_v45, %v8561_v49  ;;  %v6999_v61 = vld [vmem:[#allocation9 + $0xa0] ss:$8 sps:$4 sm:$0xff]   ;;  %v2946_v45 = vshrl.u32 %v8587_v39, 16 }
 0x1d0   : > { %3286 = vmatmul.mubr.bf16.gmra.mrb[16].mxu0 %v6104_v54  ;;  %1725 = vmatpush1.bf16.msra.mxu1 %v6987_v28  ;;  %v8591_v54 = vld [vmem:[#allocation2 + $0xd0] sm:$0x11]  ;;  %v2942_v28 = vshll.u32 %v8587_v39, 16  ;;  %v2938_v13 = vrot.slane %v2936_v50, 5  ;;  %v5909_v6 = vcombine.high %v8567_v60, %v8599_v9 }
 0x1d1   : > { %3720 = vmatpush1.bf16.msra.mxu0 %v6990_v59  ;;  %1726 = vmatprep.subr.bf16.mxu1 %v6995_v12  ;;  %v6106_v59 = vcombine.low %v8567_v60, %v8572_v0  ;;  %v7002_v49 = vld [vmem:[#allocation9 + $0x5a0] ss:$8 sps:$4 sm:$0xff]   ;;  %v8605_v22 = vsel %vm8339_vm5, %v2916_v43, %v2920_v58  ;;  %v8610_v12 = vsel %vm8339_vm5, %v8583_v25, %v2930_v1  ;;  %v2935_v0 = vrot.slane %v2933_v33, 4  ;;  %v7010_v58 = vld [vmem:[#allocation9 + $0x5b4] ss:$8 sps:$4 sm:$0xff]  }
 0x1d2   : > { %3721 = vmatprep.subr.bf16.mxu0 %v6998_v46  ;;  %1437 = vmatprep.mubr.bf16.mxu1 %v5907_v56  ;;  %v1094_v46 = vshll.u32 %v8585_v26, 16  ;;  %v2952_v57 = vshll.u32 %v8591_v54, 16  ;;  %v2944_v56 = vrot.slane %v2942_v28, 5  ;;  %v6109_v1 = vcombine.high %v8605_v22, %v8610_v12 }
 0x1d3   : > { %3295 = vmatprep.mubr.bf16.mxu0 %v6107_v48  ;;  %v2948_v48 = vrot.slane %v2946_v45, 4  ;;  %v2939_v43 = vor.u32 %v2938_v13, %v2935_v0  ;;  %v8619_v28 = vrot.slane %v8329_v38, 5  ;;  %v8622_v0 = vrot.slane %v8366_v16, 5 }
 0x1d4   : > { %1727 = vmatpush1.bf16.msra.mxu1 %v6993_v2  ;;  %v1096_v33 = vrot.slane %v1094_v46, 5  ;;  %v2954_v50 = vrot.slane %v2952_v57, 5  ;;  %v8629_v46 = vrot.slane %v8397_v53, 5  ;;  %v7014_v57 = vld [vmem:[#allocation9 + $0x5c0] ss:$8 sps:$4 sm:$0xff]  }
 0x1d5   : > { %3722 = vmatpush1.bf16.msra.mxu0 %v6996_v14  ;;  %1728 = vmatprep.subr.bf16.mxu1 %v7001_v5  ;;  %v2949_v2 = vor.u32 %v2948_v48, %v2944_v56  ;;  %v7005_v14 = vld [vmem:[#allocation9 + $0xb0] ss:$8 sps:$4 sm:$0xff]   ;;  %v3394_v48 = vrot.slane %v8619_v28, 4 }
 0x1d6   : > { %3723 = vmatprep.subr.bf16.mxu0 %v7004_v34  ;;  %v7008_v5 = vld [vmem:[#allocation9 + $0x5b0] ss:$8 sps:$4 sm:$0xff]   ;;  %v2940_v34 = vrot.slane %v2939_v43, 4 }
 0x1d7   : > { %1438 = vmatmul.mubr.bf16.gmra.mrb[20].mxu1 %v5906_v19  ;;  %v2950_v45 = vrot.slane %v2949_v2, 4  ;;  %v5908_v19 = vcombine.low %v8567_v60, %v8599_v9  ;;  %v9449_v9 = vrot.slane %v8587_v39, 5 }
 0x1d8   : > { %3296 = vmatmul.mubr.bf16.gmra.mrb[20].mxu0 %v6106_v59  ;;  %1729 = vmatpush1.bf16.msra.mxu1 %v6999_v61  ;;  %v7011_v59 = vld [vmem:[#allocation9 + $0xc0] ss:$8 sps:$4 sm:$0xff]   ;;  %v6108_v61 = vcombine.low %v8605_v22, %v8610_v12  ;;  %v8641_v13 = vsel %vm8339_vm5, %v2940_v34, %v2944_v56  ;;  %v3401_v56 = vrot.slane %v8622_v0, 4  ;;  %v7017_v34 = vld [vmem:[#allocation9 + $0xd0] ss:$8 sps:$4 sm:$0xff]  }
 0x1d9   : > { %3724 = vmatpush1.bf16.msra.mxu0 %v7002_v49  ;;  %1730 = vmatprep.subr.bf16.mxu1 %v7007_v3  ;;  %v8632_v49 = vrot.slane %v8433_v36, 5  ;;  %v8637_v3 = vsel %vm8339_vm5, %v8583_v25, %v1096_v33  ;;  %v8645_v60 = vsel %vm8339_vm5, %v2950_v45, %v2954_v50  ;;  %v3358_v12 = vld [vmem:[#allocation2 + $0x18] sm:$0xee]  ;;  %v7019_v25 = vld [vmem:[#allocation9 + $0xd4] ss:$8 sps:$4 sm:$0xff]   ;;  %v8669_v50 = vrot.slane %v8506_v18, 5 }
 0x1da   : > { %3725 = vmatprep.subr.bf16.mxu0 %v7010_v58  ;;  %1447 = vmatprep.mubr.bf16.mxu1 %v5909_v6  ;;  %v3444_v58 = vrot.slane %v8591_v54, 5  ;;  %v7022_v6 = vld [vmem:[#allocation9 + $0x5d4] ss:$8 sps:$4 sm:$0xff]   ;;  %v5911_v43 = vcombine.high %v8605_v22, %v8637_v3  ;;  %v6111_v2 = vcombine.high %v8641_v13, %v8645_v60  ;;  %v6144_v54 = vrot.slane %v3358_v12, 9  ;;  %v7020_v45 = vld [vmem:[#allocation9 + $0x5d0] ss:$8 sps:$4 sm:$0xff]  }
 0x1db   : > { %3305 = vmatprep.mubr.bf16.mxu0 %v6109_v1  ;;  %v8652_v1 = vrot.slane %v8470_v24, 5  ;;  %v3415_v33 = vrot.slane %v8632_v49, 4  ;;  %v8681_v12 = vsel %vm8660_vm8, %v3394_v48, %v3395_v4  ;;  %v1874_v4 = vrot.slane %v8426_v31, 5  ;;  %v3359_v31 = vld [vmem:[#allocation2 + $0x30] sm:$0xee] }
 0x1dc   : > { %1731 = vmatpush1.bf16.msra.mxu1 %v7005_v14 }
 0x1dd   : > { %3726 = vmatpush1.bf16.msra.mxu0 %v7008_v5  ;;  %1732 = vmatprep.subr.bf16.mxu1 %v7013_v42  ;;  %v3443_v42 = vrot.slane %v9449_v9, 4  ;;  %v1860_v5 = vrot.slane %v8354_v10, 5  ;;  %v1867_v9 = vrot.slane %v8388_v47, 5  ;;  %v3422_v10 = vrot.slane %v8652_v1, 4 }
 0x1de   : > { %3727 = vmatprep.subr.bf16.mxu0 %v7016_v27  ;;  %v3408_v27 = vrot.slane %v8629_v46, 4  ;;  %v8689_v47 = vrot.slane %v8547_v44, 5 }
 0x1df   : > { %1448 = vmatmul.mubr.bf16.gmra.mrb[24].mxu1 %v5908_v19  ;;  %v8674_v11 = vsel %vm8660_vm8, %v3443_v42, %v3444_v58  ;;  %v7025_v19 = vld [vmem:[#allocation9 + $0xe4] ss:$8 sps:$4 sm:$0xff]   ;;  %v8695_v41 = vsel %vm8660_vm8, %v3401_v56, %v1867_v9  ;;  %v5910_v58 = vcombine.low %v8605_v22, %v8637_v3  ;;  %v7031_v9 = vld [vmem:[#allocation9 + $0xf4] ss:$8 sps:$4 sm:$0xff]   ;;  %v1902_v42 = vrot.slane %v8585_v26, 5 }
 0x1e0   : > { %3306 = vmatmul.mubr.bf16.gmra.mrb[24].mxu0 %v6108_v61  ;;  %1733 = vmatpush1.bf16.msra.mxu1 %v7011_v59  ;;  %v7028_v61 = vld [vmem:[#allocation9 + $0x5e4] ss:$8 sps:$4 sm:$0xff]   ;;  %v8686_v59 = vsel %vm8660_vm8, %v3394_v48, %v1860_v5  ;;  %v7023_v48 = vld [vmem:[#allocation9 + $0xe0] ss:$8 sps:$4 sm:$0xff]   ;;  %v8712_v22 = vsel %vm8660_vm8, %v3408_v27, %v1874_v4  ;;  %v8728_v5 = vld [vmem:[#allocation2 + $0x8] sm:$0xff]  ;;  %v6145_v4 = vrot.slane %v3359_v31, 9 }
 0x1e1   : > { %3728 = vmatpush1.bf16.msra.mxu0 %v7014_v57  ;;  %1734 = vmatprep.subr.bf16.mxu1 %v7019_v25  ;;  %v1881_v57 = vrot.slane %v8466_v21, 5  ;;  %v6110_v25 = vcombine.low %v8641_v13, %v8645_v60  ;;  %v9450_v21 = vrot.slane %v8669_v50, 4  ;;  %v1895_v60 = vrot.slane %v8543_v8, 5  ;;  %v7032_v8 = vld [vmem:[#allocation9 + $0x5f0] ss:$8 sps:$4 sm:$0xff]  }
 0x1e2   : > { %3729 = vmatprep.subr.bf16.mxu0 %v7022_v6  ;;  %1457 = vmatprep.mubr.bf16.mxu1 %v5911_v43  ;;  %v7026_v6 = vld [vmem:[#allocation9 + $0x5e0] ss:$8 sps:$4 sm:$0xff]   ;;  %v3393_v43 = vsel %vm8660_vm8, %v6144_v54, %v8619_v28  ;;  %v7310_v54 = vld [vmem:[#allocation2] sm:$0xff] }
 0x1e3   : > { %3315 = vmatprep.mubr.bf16.mxu0 %v6111_v2  ;;  %v1888_v2 = vrot.slane %v8502_v20, 5  ;;  %v8718_v3 = vsel %vm8660_vm8, %v3415_v33, %v1881_v57  ;;  %v7034_v20 = vld [vmem:[#allocation9 + $0x5f4] ss:$8 sps:$4 sm:$0xff]   ;;  %v3402_v57 = vrot.slane %v8368_v17, 5  ;;  %v8738_v26 = vsel %vm8660_vm8, %v9450_v21, %v1895_v60  ;;  %v7037_v17 = vld [vmem:[#allocation9 + $0x200] ss:$8 sps:$4 sm:$0xff]  }
 0x1e4   : > { %1735 = vmatpush1.bf16.msra.mxu1 %v7017_v34  ;;  %v5945_v34 = vcombine.high %v7310_v54, %v8728_v5  ;;  %v6152_v31 = vcombine.low %v3393_v43, %v8681_v12  ;;  %v5944_v60 = vcombine.low %v7310_v54, %v8728_v5  ;;  %v3400_v21 = vsel %vm8660_vm8, %v6145_v4, %v8622_v0  ;;  %v7053_v4 = vld [vmem:[#allocation9 + $0x224] ss:$8 sps:$4 sm:$0xff]  }
 0x1e5   : > { %3730 = vmatpush1.bf16.msra.mxu0 %v7020_v45  ;;  %1736 = vmatprep.subr.bf16.mxu1 %v7025_v19  ;;  %v8724_v13 = vsel %vm8660_vm8, %v3422_v10, %v1888_v2  ;;  %v6153_v45 = vcombine.high %v3393_v43, %v8681_v12  ;;  %v3436_v19 = vrot.slane %v8689_v47, 4  ;;  %v7039_v2 = vld [vmem:[#allocation9 + $0x204] ss:$8 sps:$4 sm:$0xff]   ;;  %v7043_v43 = vld [vmem:[#allocation9 + $0x210] ss:$8 sps:$4 sm:$0xff]  }
 0x1e6   : > { %3731 = vmatprep.subr.bf16.mxu0 %v7028_v61  ;;  %v7029_v61 = vld [vmem:[#allocation9 + $0xf0] ss:$8 sps:$4 sm:$0xff]  }
 0x1e7   : > { %1458 = vmatmul.mubr.bf16.gmra.mrb[28].mxu1 %v5910_v58  ;;  %v8744_v58 = vsel %vm8660_vm8, %v3436_v19, %v1902_v42  ;;  %v7048_v42 = vld [vmem:[#allocation9 + $0x614] ss:$8 sps:$4 sm:$0xff]  }
 0x1e8   : > { %3316 = vmatmul.mubr.bf16.gmra.mrb[28].mxu0 %v6110_v25  ;;  %1737 = vmatpush1.bf16.msra.mxu1 %v7023_v48  ;;  %v7042_v25 = vld [vmem:[#allocation9 + $0x604] ss:$8 sps:$4 sm:$0xff]   ;;  %v7040_v48 = vld [vmem:[#allocation9 + $0x600] ss:$8 sps:$4 sm:$0xff]  }
 0x1e9   : > { %3732 = vmatpush1.bf16.msra.mxu0 %v7026_v6  ;;  %1738 = vmatprep.subr.bf16.mxu1 %v7031_v9  ;;  %v7045_v6 = vld [vmem:[#allocation9 + $0x214] ss:$8 sps:$4 sm:$0xff]   ;;  %v3403_v9 = vsel %vm8660_vm8, %v3401_v56, %v3402_v57  ;;  %v7056_v56 = vld [vmem:[#allocation9 + $0x624] ss:$8 sps:$4 sm:$0xff]  }
 0x1ea   : > { %3733 = vmatprep.subr.bf16.mxu0 %v7034_v20  ;;  %1740 = vmatprep.mubr.bf16.mxu1 %v5945_v34  ;;  %v3360_v20 = vld [vmem:[#allocation2 + $0x48] sm:$0xee]  ;;  %v6155_v12 = vcombine.high %v3400_v21, %v3403_v9  ;;  %v3409_v34 = vrot.slane %v8399_v55, 5  ;;  %v6154_v57 = vcombine.low %v3400_v21, %v3403_v9  ;;  %v9552_v21 = vcombine.low %v8327_v37, %v8329_v38  ;;  %v7067_v9 = vld [vmem:[#allocation9 + $0x244] ss:$8 sps:$4 sm:$0xff]  }
 0x1eb   : > { %3735 = vmatprep.mubr.bf16.mxu0 %v6153_v45  ;;  %v6146_v54 = vrot.slane %v3360_v20, 9  ;;  %v7046_v45 = vld [vmem:[#allocation9 + $0x610] ss:$8 sps:$4 sm:$0xff]   ;;  %v7070_v20 = vld [vmem:[#allocation9 + $0x644] ss:$8 sps:$4 sm:$0xff]  }
 0x1ec   : > { %1739 = vmatpush1.bf16.msra.mxu1 %v7029_v61  ;;  %v7051_v61 = vld [vmem:[#allocation9 + $0x220] ss:$8 sps:$4 sm:$0xff]   ;;  %v3410_v55 = vsel %vm8660_vm8, %v3408_v27, %v3409_v34  ;;  %v7057_v27 = vld [vmem:[#allocation9 + $0x230] ss:$8 sps:$4 sm:$0xff]  }
 0x1ed   : > { %3734 = vmatpush1.bf16.msra.mxu0 %v7032_v8  ;;  %2161 = vmatprep.subr.bf16.mxu1 %v7039_v2  ;;  %v3407_v8 = vsel %vm8660_vm8, %v6146_v54, %v8629_v46  ;;  %v7054_v2 = vld [vmem:[#allocation9 + $0x620] ss:$8 sps:$4 sm:$0xff]   ;;  %v7073_v54 = vld [vmem:[#allocation9 + $0x254] ss:$8 sps:$4 sm:$0xff]  }
 0x1ee   : > { %4138 = vmatprep.subr.bf16.mxu0 %v7042_v25  ;;  %v3361_v25 = vld [vmem:[#allocation2 + $0x60] sm:$0xee]  ;;  %v6156_v37 = vcombine.low %v3407_v8, %v3410_v55  ;;  %v7068_v38 = vld [vmem:[#allocation9 + $0x640] ss:$8 sps:$4 sm:$0xff]  }
 0x1ef   : > { %1741 = vmatmul.mubr.bf16.vlgmr.msra.gmra.mrb[0].mxu1 %v5944_v60  ;;  %v6147_v60 = vrot.slane %v3361_v25, 9  ;;  %v3362_v34 = vld [vmem:[#allocation2 + $0x78] sm:$0xee] }
 0x1f0   : > { %3736 = vmatmul.mubr.bf16.vlgmr.msra.gmra.mrb[0].mxu0 %v6152_v31  ;;  %2162 = vmatpush1.bf16.msra.mxu1 %v7037_v17  ;;  %v7059_v17 = vld [vmem:[#allocation9 + $0x234] ss:$8 sps:$4 sm:$0xff]   ;;  %v6157_v31 = vcombine.high %v3407_v8, %v3410_v55  ;;  %v7074_v8 = vld [vmem:[#allocation9 + $0x650] ss:$8 sps:$4 sm:$0xff]   ;;  %v6148_v55 = vrot.slane %v3362_v34, 9  ;;  %v9558_v34 = vcombine.high %v8428_v32, %v8433_v36 }
 0x1f1   : > { %4139 = vmatpush1.bf16.msra.mxu0 %v7040_v48  ;;  %2163 = vmatprep.subr.bf16.mxu1 %v7045_v6  ;;  %v3416_v48 = vrot.slane %v8435_v40, 5  ;;  %v7060_v6 = vld [vmem:[#allocation9 + $0x630] ss:$8 sps:$4 sm:$0xff]   ;;  %v3414_v40 = vsel %vm8660_vm8, %v6147_v60, %v8632_v49  ;;  %v7082_v60 = vld [vmem:[#allocation9 + $0x660] ss:$8 sps:$4 sm:$0xff]  }
 0x1f2   : > { %4140 = vmatprep.subr.bf16.mxu0 %v7048_v42  ;;  %1750 = vmatprep.mubr.bf16.mxu1 %v5947_v63  ;;  %v7062_v63 = vld [vmem:[#allocation9 + $0x634] ss:$8 sps:$4 sm:$0xff]   ;;  %v9553_v42 = vcombine.high %v8364_v15, %v8366_v16 }
 0x1f3   : > { %3745 = vmatprep.mubr.bf16.mxu0 %v6155_v12  ;;  %v7065_v12 = vld [vmem:[#allocation9 + $0x240] ss:$8 sps:$4 sm:$0xff]  }
 0x1f4   : > { %2164 = vmatpush1.bf16.msra.mxu1 %v7043_v43  ;;  %v3417_v43 = vsel %vm8660_vm8, %v3415_v33, %v3416_v48  ;;  %v7081_v33 = vld [vmem:[#allocation9 + $0x264] ss:$8 sps:$4 sm:$0xff]   ;;  %v3421_v48 = vsel %vm8660_vm8, %v6148_v55, %v8652_v1 }
 0x1f5   : > { %4141 = vmatpush1.bf16.msra.mxu0 %v7046_v45  ;;  %2165 = vmatprep.subr.bf16.mxu1 %v7053_v4  ;;  %v7076_v45 = vld [vmem:[#allocation9 + $0x654] ss:$8 sps:$4 sm:$0xff]   ;;  %v7071_v4 = vld [vmem:[#allocation9 + $0x250] ss:$8 sps:$4 sm:$0xff]  }
 0x1f6   : > { %4142 = vmatprep.subr.bf16.mxu0 %v7056_v56  ;;  %v6159_v56 = vcombine.high %v3414_v40, %v3417_v43 }
 0x1f7   : > { %1751 = vmatmul.mubr.bf16.gmra.mrb[4].mxu1 %v9552_v21  ;;  %v6158_v21 = vcombine.low %v3414_v40, %v3417_v43  ;;  %v7088_v40 = vld [vmem:[#allocation9 + $0x670] ss:$8 sps:$4 sm:$0xff]   ;;  %v7095_v43 = vld [vmem:[#allocation9 + $0x284] ss:$8 sps:$4 sm:$0xff]  }
 0x1f8   : > { %3746 = vmatmul.mubr.bf16.gmra.mrb[4].mxu0 %v6154_v57  ;;  %2166 = vmatpush1.bf16.msra.mxu1 %v7051_v61  ;;  %v3423_v61 = vrot.slane %v8476_v29, 5  ;;  %v9554_v57 = vcombine.low %v8364_v15, %v8366_v16  ;;  %v9556_v16 = vrot.slane %v8587_v39, 5  ;;  %v3363_v39 = vld [vmem:[#allocation2 + $0x90] sm:$0xee] }
 0x1f9   : > { %4143 = vmatpush1.bf16.msra.mxu0 %v7054_v2  ;;  %2167 = vmatprep.subr.bf16.mxu1 %v7059_v17  ;;  %v3365_v2 = vld [vmem:[#allocation2 + $0xc0] sm:$0xee]  ;;  %v7084_v17 = vld [vmem:[#allocation9 + $0x664] ss:$8 sps:$4 sm:$0xff]  }
 0x1fa   : > { %4144 = vmatprep.subr.bf16.mxu0 %v7062_v63  ;;  %1760 = vmatprep.mubr.bf16.mxu1 %v9553_v42  ;;  %v6151_v25 = vrot.slane %v3365_v2, 9  ;;  %v9555_v63 = vcombine.high %v8395_v52, %v8397_v53  ;;  %v3424_v15 = vsel %vm8660_vm8, %v3422_v10, %v3423_v61  ;;  %v7087_v10 = vld [vmem:[#allocation9 + $0x274] ss:$8 sps:$4 sm:$0xff]   ;;  %v9557_v42 = vcombine.low %v8395_v52, %v8397_v53 }
 0x1fb   : > { %3755 = vmatprep.mubr.bf16.mxu0 %v6157_v31  ;;  %v7079_v31 = vld [vmem:[#allocation9 + $0x260] ss:$8 sps:$4 sm:$0xff]   ;;  %v6160_v52 = vcombine.low %v3421_v48, %v3424_v15  ;;  %v3364_v61 = vld [vmem:[#allocation2 + $0xa8] sm:$0xee]  ;;  %v9560_v2 = vcombine.low %v8428_v32, %v8433_v36 }
 0x1fc   : > { %2168 = vmatpush1.bf16.msra.mxu1 %v7057_v27  ;;  %v8795_v29 = vsel %vm8660_vm8, %v6151_v25, %v9556_v16  ;;  %v3437_v25 = vrot.slane %v8551_v30, 5  ;;  %v7112_v16 = vld [vmem:[#allocation9 + $0x6a4] ss:$8 sps:$4 sm:$0xff]  }
 0x1fd   : > { %4145 = vmatpush1.bf16.msra.mxu0 %v7060_v6  ;;  %2169 = vmatprep.subr.bf16.mxu1 %v7067_v9  ;;  %v6167_v27 = vcombine.high %v8795_v29, %v8674_v11  ;;  %v6166_v6 = vcombine.low %v8795_v29, %v8674_v11  ;;  %v7090_v9 = vld [vmem:[#allocation9 + $0x674] ss:$8 sps:$4 sm:$0xff]   ;;  %v7152_v11 = vld [vmem:[#allocation9 + $0x700] ss:$8 sps:$4 sm:$0xff]  }
 0x1fe   : > { %4146 = vmatprep.subr.bf16.mxu0 %v7070_v20  ;;  %v6161_v20 = vcombine.high %v3421_v48, %v3424_v15  ;;  %v7109_v15 = vld [vmem:[#allocation9 + $0x2a4] ss:$8 sps:$4 sm:$0xff]   ;;  %v3438_v30 = vsel %vm8660_vm8, %v3436_v19, %v3437_v25  ;;  %v7115_v48 = vld [vmem:[#allocation9 + $0x2b4] ss:$8 sps:$4 sm:$0xff]   ;;  %v7138_v25 = vld [vmem:[#allocation9 + $0x6e0] ss:$8 sps:$4 sm:$0xff]  }
 0x1ff   : > { %1761 = vmatmul.mubr.bf16.gmra.mrb[8].mxu1 %v9554_v57  ;;  %v7101_v57 = vld [vmem:[#allocation9 + $0x294] ss:$8 sps:$4 sm:$0xff]   ;;  %v7126_v19 = vld [vmem:[#allocation9 + $0x6c4] ss:$8 sps:$4 sm:$0xff]  }
 0x200   : > { %3756 = vmatmul.mubr.bf16.gmra.mrb[8].mxu0 %v6156_v37  ;;  %2170 = vmatpush1.bf16.msra.mxu1 %v7065_v12  ;;  %v7085_v12 = vld [vmem:[#allocation9 + $0x270] ss:$8 sps:$4 sm:$0xff]   ;;  %v6149_v37 = vrot.slane %v3363_v39, 9  ;;  %v7118_v39 = vld [vmem:[#allocation9 + $0x6b4] ss:$8 sps:$4 sm:$0xff]  }
 0x201   : > { %4147 = vmatpush1.bf16.msra.mxu0 %v7068_v38  ;;  %2171 = vmatprep.subr.bf16.mxu1 %v7073_v54  ;;  %v3430_v38 = vrot.slane %v8512_v35, 5  ;;  %v7098_v54 = vld [vmem:[#allocation9 + $0x684] ss:$8 sps:$4 sm:$0xff]   ;;  %v9559_v35 = vrot.slane %v8669_v50, 4  ;;  %v8874_v29 = vld [vmem:[#allocation2 + $0x48] sm:$0xff] }
 0x202   : > { %4148 = vmatprep.subr.bf16.mxu0 %v7076_v45  ;;  %1770 = vmatprep.mubr.bf16.mxu1 %v9555_v63  ;;  %v7093_v45 = vld [vmem:[#allocation9 + $0x280] ss:$8 sps:$4 sm:$0xff]   ;;  %v3428_v53 = vsel %vm8660_vm8, %v6149_v37, %v8669_v50  ;;  %v7102_v63 = vld [vmem:[#allocation9 + $0x690] ss:$8 sps:$4 sm:$0xff]   ;;  %v9563_v37 = vcombine.high %v8504_v62, %v8506_v18 }
 0x203   : > { %3765 = vmatprep.mubr.bf16.mxu0 %v6159_v56  ;;  %v7096_v56 = vld [vmem:[#allocation9 + $0x680] ss:$8 sps:$4 sm:$0xff]  }
 0x204   : > { %2172 = vmatpush1.bf16.msra.mxu1 %v7071_v4  ;;  %v3431_v4 = vsel %vm8660_vm8, %v9559_v35, %v3430_v38  ;;  %v7121_v38 = vld [vmem:[#allocation9 + $0x2c0] ss:$8 sps:$4 sm:$0xff]   ;;  %v7127_v35 = vld [vmem:[#allocation9 + $0x2d0] ss:$8 sps:$4 sm:$0xff]  }
 0x205   : > { %4149 = vmatpush1.bf16.msra.mxu0 %v7074_v8  ;;  %2173 = vmatprep.subr.bf16.mxu1 %v7081_v33  ;;  %v7104_v8 = vld [vmem:[#allocation9 + $0x694] ss:$8 sps:$4 sm:$0xff]   ;;  %v6163_v55 = vcombine.high %v3428_v53, %v3431_v4  ;;  %v6150_v33 = vrot.slane %v3364_v61, 9  ;;  %v6162_v32 = vcombine.low %v3428_v53, %v3431_v4  ;;  %v9564_v53 = vcombine.low %v8504_v62, %v8506_v18  ;;  %v7130_v61 = vld [vmem:[#allocation9 + $0x6d0] ss:$8 sps:$4 sm:$0xff]  }
 0x206   : > { %4150 = vmatprep.subr.bf16.mxu0 %v7084_v17  ;;  %v7099_v17 = vld [vmem:[#allocation9 + $0x290] ss:$8 sps:$4 sm:$0xff]   ;;  %v7135_v62 = vld [vmem:[#allocation9 + $0x2e0] ss:$8 sps:$4 sm:$0xff]  }
 0x207   : > { %1771 = vmatmul.mubr.bf16.gmra.mrb[12].mxu1 %v9557_v42  ;;  %v3435_v36 = vsel %vm8660_vm8, %v6150_v33, %v8689_v47  ;;  %v7116_v42 = vld [vmem:[#allocation9 + $0x6b0] ss:$8 sps:$4 sm:$0xff]   ;;  %v8854_v33 = vld [vmem:[#allocation2 + $0x38] sm:$0xff] }
 0x208   : > { %3766 = vmatmul.mubr.bf16.gmra.mrb[12].mxu0 %v6158_v21  ;;  %2174 = vmatpush1.bf16.msra.mxu1 %v7079_v31  ;;  %v9561_v31 = vcombine.high %v8468_v23, %v8470_v24  ;;  %v7107_v21 = vld [vmem:[#allocation9 + $0x2a0] ss:$8 sps:$4 sm:$0xff]  }
 0x209   : > { %4151 = vmatpush1.bf16.msra.mxu0 %v7082_v60  ;;  %2175 = vmatprep.subr.bf16.mxu1 %v7087_v10  ;;  %v7110_v60 = vld [vmem:[#allocation9 + $0x6a0] ss:$8 sps:$4 sm:$0xff]   ;;  %v6165_v10 = vcombine.high %v3435_v36, %v3438_v30 }
 0x20a   : > { %4152 = vmatprep.subr.bf16.mxu0 %v7090_v9  ;;  %1780 = vmatprep.mubr.bf16.mxu1 %v9558_v34  ;;  %v9562_v9 = vcombine.low %v8468_v23, %v8470_v24  ;;  %v1850_v23 = vrot.slane %v8728_v5, 5  ;;  %v1821_v24 = vld [vmem:[#allocation2] sm:$0xee]  ;;  %v7137_v5 = vld [vmem:[#allocation9 + $0x2e4] ss:$8 sps:$4 sm:$0xff]  }
 0x20b   : > { %3775 = vmatprep.mubr.bf16.mxu0 %v6161_v20  ;;  %v7113_v20 = vld [vmem:[#allocation9 + $0x2b0] ss:$8 sps:$4 sm:$0xff]   ;;  %v7132_v34 = vld [vmem:[#allocation9 + $0x6d4] ss:$8 sps:$4 sm:$0xff]   ;;  %v5992_v4 = vrot.slane %v1821_v24, 9 }
 0x20c   : > { %2176 = vmatpush1.bf16.msra.mxu1 %v7085_v12  ;;  %v7123_v12 = vld [vmem:[#allocation9 + $0x2c4] ss:$8 sps:$4 sm:$0xff]  }
 0x20d   : > { %4153 = vmatpush1.bf16.msra.mxu0 %v7088_v40  ;;  %2177 = vmatprep.subr.bf16.mxu1 %v7095_v43  ;;  %v6164_v40 = vcombine.low %v3435_v36, %v3438_v30  ;;  %v7124_v43 = vld [vmem:[#allocation9 + $0x6c0] ss:$8 sps:$4 sm:$0xff]   ;;  %v1851_v18 = vsel %vm8660_vm8, %v5992_v4, %v1850_v23  ;;  %v7144_v36 = vld [vmem:[#allocation9 + $0x6f0] ss:$8 sps:$4 sm:$0xff]   ;;  %v7151_v30 = vld [vmem:[#allocation9 + $0x304] ss:$8 sps:$4 sm:$0xff]  }
 0x20e   : > { %4154 = vmatprep.subr.bf16.mxu0 %v7098_v54  ;;  %v7129_v54 = vld [vmem:[#allocation9 + $0x2d4] ss:$8 sps:$4 sm:$0xff]  }
 0x20f   : > { %1781 = vmatmul.mubr.bf16.gmra.mrb[16].mxu1 %v9560_v2  ;;  %v8852_v2 = vld [vmem:[#allocation2 + $0x30] sm:$0xff]  ;;  %v7174_v4 = vld [vmem:[#allocation9 + $0x734] ss:$8 sps:$4 sm:$0xff]  }
 0x210   : > { %3776 = vmatmul.mubr.bf16.gmra.mrb[16].mxu0 %v6160_v52  ;;  %2178 = vmatpush1.bf16.msra.mxu1 %v7093_v45  ;;  %v7312_v45 = vld [vmem:[#allocation2 + $0x10] sm:$0x11] }
 0x211   : > { %4155 = vmatpush1.bf16.msra.mxu0 %v7096_v56  ;;  %2179 = vmatprep.subr.bf16.mxu1 %v7101_v57  ;;  %v1853_v52 = vrot.slane %v7312_v45, 5  ;;  %v1852_v56 = vrot.slane %v1850_v23, 4  ;;  %v7140_v57 = vld [vmem:[#allocation9 + $0x6e4] ss:$8 sps:$4 sm:$0xff]  }
 0x212   : > { %4156 = vmatprep.subr.bf16.mxu0 %v7104_v8  ;;  %1790 = vmatprep.mubr.bf16.mxu1 %v9561_v31  ;;  %v9565_v8 = vcombine.high %v8545_v7, %v8547_v44  ;;  %v9566_v31 = vcombine.low %v8545_v7, %v8547_v44  ;;  %v8869_v7 = vcombine.low %v8852_v2, %v8854_v33 }
 0x213   : > { %3785 = vmatprep.mubr.bf16.mxu0 %v6163_v55  ;;  %v1854_v55 = vsel %vm8660_vm8, %v1852_v56, %v1853_v52  ;;  %v8893_v52 = vld [vmem:[#allocation2 + $0x60] sm:$0xff] }
 0x214   : > { %2180 = vmatpush1.bf16.msra.mxu1 %v7099_v17  ;;  %v1822_v17 = vld [vmem:[#allocation2 + $0x18] sm:$0xee] }
 0x215   : > { %4157 = vmatpush1.bf16.msra.mxu0 %v7102_v63  ;;  %2181 = vmatprep.subr.bf16.mxu1 %v7109_v15  ;;  %v7143_v63 = vld [vmem:[#allocation9 + $0x2f4] ss:$8 sps:$4 sm:$0xff]  }
 0x216   : > { %4158 = vmatprep.subr.bf16.mxu0 %v7112_v16  ;;  %v7146_v15 = vld [vmem:[#allocation9 + $0x6f4] ss:$8 sps:$4 sm:$0xff]   ;;  %v8858_v16 = vcombine.high %v8852_v2, %v8854_v33 }
 0x217   : > { %1791 = vmatmul.mubr.bf16.gmra.mrb[20].mxu1 %v9562_v9  ;;  %v7157_v9 = vld [vmem:[#allocation9 + $0x314] ss:$8 sps:$4 sm:$0xff]  }
 0x218   : > { %3786 = vmatmul.mubr.bf16.gmra.mrb[20].mxu0 %v6162_v32  ;;  %2182 = vmatpush1.bf16.msra.mxu1 %v7107_v21  ;;  %v5993_v21 = vrot.slane %v1822_v17, 9  ;;  %v7141_v32 = vld [vmem:[#allocation9 + $0x2f0] ss:$8 sps:$4 sm:$0xff]  }
 0x219   : > { %4159 = vmatpush1.bf16.msra.mxu0 %v7110_v60  ;;  %2183 = vmatprep.subr.bf16.mxu1 %v7115_v48  ;;  %v7154_v60 = vld [vmem:[#allocation9 + $0x704] ss:$8 sps:$4 sm:$0xff]   ;;  %v7149_v48 = vld [vmem:[#allocation9 + $0x300] ss:$8 sps:$4 sm:$0xff]  }
 0x21a   : > { %4160 = vmatprep.subr.bf16.mxu0 %v7118_v39  ;;  %1800 = vmatprep.mubr.bf16.mxu1 %v9563_v37  ;;  %v6000_v39 = vcombine.low %v1851_v18, %v1854_v55  ;;  %v1858_v44 = vsel %vm8660_vm8, %v5993_v21, %v8619_v28  ;;  %v7155_v28 = vld [vmem:[#allocation9 + $0x310] ss:$8 sps:$4 sm:$0xff]   ;;  %v7188_v21 = vld [vmem:[#allocation9 + $0x754] ss:$8 sps:$4 sm:$0xff]  }
 0x21b   : > { %3795 = vmatprep.mubr.bf16.mxu0 %v6165_v10  ;;  %v1823_v10 = vld [vmem:[#allocation2 + $0x30] sm:$0xee]  ;;  %v7158_v37 = vld [vmem:[#allocation9 + $0x710] ss:$8 sps:$4 sm:$0xff]   ;;  %v6002_v23 = vcombine.low %v1858_v44, %v8686_v59 }
 0x21c   : > { %2184 = vmatpush1.bf16.msra.mxu1 %v7113_v20  ;;  %v7160_v20 = vld [vmem:[#allocation9 + $0x714] ss:$8 sps:$4 sm:$0xff]  }
 0x21d   : > { %4161 = vmatpush1.bf16.msra.mxu0 %v7116_v42  ;;  %2185 = vmatprep.subr.bf16.mxu1 %v7123_v12  ;;  %v6003_v42 = vcombine.high %v1858_v44, %v8686_v59 }
 0x21e   : > { %4162 = vmatprep.subr.bf16.mxu0 %v7126_v19  ;;  %v5994_v19 = vrot.slane %v1823_v10, 9 }
 0x21f   : > { %1801 = vmatmul.mubr.bf16.gmra.mrb[24].mxu1 %v9564_v53  ;;  %v8895_v53 = vld [vmem:[#allocation2 + $0x68] sm:$0xff] }
 0x220   : > { %3796 = vmatmul.mubr.bf16.gmra.mrb[24].mxu0 %v6164_v40  ;;  %2186 = vmatpush1.bf16.msra.mxu1 %v7121_v38  ;;  %v7164_v38 = vld [vmem:[#allocation9 + $0x324] ss:$8 sps:$4 sm:$0xff]   ;;  %v1865_v45 = vsel %vm8660_vm8, %v5994_v19, %v8622_v0  ;;  %v8900_v56 = vcombine.high %v8893_v52, %v8895_v53  ;;  %v7169_v0 = vld [vmem:[#allocation9 + $0x330] ss:$8 sps:$4 sm:$0xff]   ;;  %v7199_v19 = vld [vmem:[#allocation9 + $0x374] ss:$8 sps:$4 sm:$0xff]  }
 0x221   : > { %4163 = vmatpush1.bf16.msra.mxu0 %v7124_v43  ;;  %2187 = vmatprep.subr.bf16.mxu1 %v7129_v54  ;;  %v7168_v40 = vld [vmem:[#allocation9 + $0x724] ss:$8 sps:$4 sm:$0xff]   ;;  %v7162_v43 = vld [vmem:[#allocation9 + $0x320] ss:$8 sps:$4 sm:$0xff]   ;;  %v6005_v59 = vcombine.high %v1865_v45, %v8695_v41 }
 0x222   : > { %4164 = vmatprep.subr.bf16.mxu0 %v7132_v34  ;;  %1810 = vmatprep.mubr.bf16.mxu1 %v9565_v8  ;;  %v7166_v54 = vld [vmem:[#allocation9 + $0x720] ss:$8 sps:$4 sm:$0xff]   ;;  %v7171_v34 = vld [vmem:[#allocation9 + $0x334] ss:$8 sps:$4 sm:$0xff]   ;;  %v7182_v8 = vld [vmem:[#allocation9 + $0x744] ss:$8 sps:$4 sm:$0xff]  }
 0x223   : > { %3805 = vmatprep.mubr.bf16.mxu0 %v6167_v27  ;;  %v6001_v27 = vcombine.high %v1851_v18, %v1854_v55  ;;  %v8904_v18 = vld [vmem:[#allocation2 + $0x78] sm:$0xff]  ;;  %v6004_v55 = vcombine.low %v1865_v45, %v8695_v41 }
 0x224   : > { %2188 = vmatpush1.bf16.msra.mxu1 %v7127_v35  ;;  %v1824_v35 = vld [vmem:[#allocation2 + $0x48] sm:$0xee]  ;;  %v7208_v45 = vld [vmem:[#allocation9 + $0x780] ss:$8 sps:$4 sm:$0xff]  }
 0x225   : > { %4165 = vmatpush1.bf16.msra.mxu0 %v7130_v61  ;;  %2189 = vmatprep.subr.bf16.mxu1 %v7137_v5  ;;  %v5995_v61 = vrot.slane %v1824_v35, 9  ;;  %v7172_v5 = vld [vmem:[#allocation9 + $0x730] ss:$8 sps:$4 sm:$0xff]  }
 0x226   : > { %4166 = vmatprep.subr.bf16.mxu0 %v7140_v57  ;;  %v7178_v57 = vld [vmem:[#allocation9 + $0x344] ss:$8 sps:$4 sm:$0xff]  }
 0x227   : > { %1811 = vmatmul.mubr.bf16.gmra.mrb[28].mxu1 %v9566_v31  ;;  %v1872_v17 = vsel %vm8660_vm8, %v5995_v61, %v8629_v46  ;;  %v7185_v31 = vld [vmem:[#allocation9 + $0x354] ss:$8 sps:$4 sm:$0xff]   ;;  %v7183_v46 = vld [vmem:[#allocation9 + $0x350] ss:$8 sps:$4 sm:$0xff]   ;;  %v8952_v61 = vld [vmem:[#allocation2 + $0xb0] sm:$0xff] }
 0x228   : > { %3806 = vmatmul.mubr.bf16.gmra.mrb[28].mxu0 %v6166_v6  ;;  %2190 = vmatpush1.bf16.msra.mxu1 %v7135_v62  ;;  %v8876_v6 = vld [vmem:[#allocation2 + $0x50] sm:$0xff]  ;;  %v6007_v41 = vcombine.high %v1872_v17, %v8712_v22  ;;  %v6006_v44 = vcombine.low %v1872_v17, %v8712_v22 }
 0x229   : > { %4167 = vmatpush1.bf16.msra.mxu0 %v7138_v25  ;;  %2191 = vmatprep.subr.bf16.mxu1 %v7143_v63  ;;  %v8881_v12 = vcombine.high %v8874_v29, %v8876_v6  ;;  %v8888_v24 = vcombine.low %v8874_v29, %v8876_v6  ;;  %v7176_v62 = vld [vmem:[#allocation9 + $0x340] ss:$8 sps:$4 sm:$0xff]   ;;  %v8909_v25 = vcombine.low %v8893_v52, %v8895_v53  ;;  %v8914_v63 = vld [vmem:[#allocation2 + $0x80] sm:$0xff] }
 0x22a   : > { %4168 = vmatprep.subr.bf16.mxu0 %v7146_v15  ;;  %2193 = vmatprep.mubr.bf16.mxu1 %v6001_v27  ;;  %v7180_v15 = vld [vmem:[#allocation9 + $0x740] ss:$8 sps:$4 sm:$0xff]   ;;  %v1825_v27 = vld [vmem:[#allocation2 + $0x60] sm:$0xee]  ;;  %v8926_v10 = vcombine.low %v8904_v18, %v8914_v63 }
 0x22b   : > { %4170 = vmatprep.mubr.bf16.mxu0 %v8858_v16 }
 0x22c   : > { %2192 = vmatpush1.bf16.msra.mxu1 %v7141_v32  ;;  %v8919_v32 = vcombine.high %v8904_v18, %v8914_v63 }
 0x22d   : > { %4169 = vmatpush1.bf16.msra.mxu0 %v7144_v36  ;;  %2595 = vmatprep.subr.bf16.mxu1 %v7151_v30  ;;  %v5996_v36 = vrot.slane %v1825_v27, 9  ;;  %v7186_v30 = vld [vmem:[#allocation9 + $0x750] ss:$8 sps:$4 sm:$0xff]  }
 0x22e   : > { %4756 = vmatprep.subr.bf16.mxu0 %v7154_v60  ;;  %v7192_v60 = vld [vmem:[#allocation9 + $0x364] ss:$8 sps:$4 sm:$0xff]   ;;  %v7214_v27 = vld [vmem:[#allocation9 + $0x790] ss:$8 sps:$4 sm:$0xff]  }
 0x22f   : > { %2194 = vmatmul.mubr.bf16.vlgmr.msra.gmra.mrb[0].mxu1 %v6000_v39  ;;  %v7190_v39 = vld [vmem:[#allocation9 + $0x360] ss:$8 sps:$4 sm:$0xff]  }
 0x230   : > { %4171 = vmatmul.mubr.bf16.vlgmr.msra.gmra.mrb[0].mxu0 %v8869_v7  ;;  %2596 = vmatpush1.bf16.msra.mxu1 %v7149_v48  ;;  %v7196_v48 = vld [vmem:[#allocation9 + $0x764] ss:$8 sps:$4 sm:$0xff]  }
 0x231   : > { %4757 = vmatpush1.bf16.msra.mxu0 %v7152_v11  ;;  %2597 = vmatprep.subr.bf16.mxu1 %v7157_v9  ;;  %v7194_v11 = vld [vmem:[#allocation9 + $0x760] ss:$8 sps:$4 sm:$0xff]   ;;  %v1879_v9 = vsel %vm8660_vm8, %v5996_v36, %v8632_v49  ;;  %v4321_v36 = vshrl.u32 %v8854_v33, 16 }
 0x232   : > { %4758 = vmatprep.subr.bf16.mxu0 %v7160_v20  ;;  %2203 = vmatprep.mubr.bf16.mxu1 %v6003_v42  ;;  %v8931_v20 = vld [vmem:[#allocation2 + $0x90] sm:$0xff]  ;;  %v8933_v42 = vld [vmem:[#allocation2 + $0x98] sm:$0xff]  ;;  %v6009_v22 = vcombine.high %v1879_v9, %v8718_v3  ;;  %v6008_v35 = vcombine.low %v1879_v9, %v8718_v3 }
 0x233   : > { %4180 = vmatprep.mubr.bf16.mxu0 %v8881_v12  ;;  %v7222_v9 = vld [vmem:[#allocation9 + $0x7a0] ss:$8 sps:$4 sm:$0xff]  }
 0x234   : > { %2598 = vmatpush1.bf16.msra.mxu1 %v7155_v28  ;;  %v1826_v28 = vld [vmem:[#allocation2 + $0x78] sm:$0xee] }
 0x235   : > { %4759 = vmatpush1.bf16.msra.mxu0 %v7158_v37  ;;  %2599 = vmatprep.subr.bf16.mxu1 %v7164_v38  ;;  %v7202_v37 = vld [vmem:[#allocation9 + $0x774] ss:$8 sps:$4 sm:$0xff]   ;;  %v8938_v38 = vcombine.high %v8931_v20, %v8933_v42  ;;  %v5997_v49 = vrot.slane %v1826_v28, 9 }
 0x236   : > { %4760 = vmatprep.subr.bf16.mxu0 %v7168_v40  ;;  %v7197_v40 = vld [vmem:[#allocation9 + $0x370] ss:$8 sps:$4 sm:$0xff]   ;;  %v7230_v28 = vld [vmem:[#allocation9 + $0x7b4] ss:$8 sps:$4 sm:$0xff]  }
 0x237   : > { %2204 = vmatmul.mubr.bf16.gmra.mrb[4].mxu1 %v6002_v23  ;;  %v7210_v23 = vld [vmem:[#allocation9 + $0x784] ss:$8 sps:$4 sm:$0xff]  }
 0x238   : > { %4181 = vmatmul.mubr.bf16.gmra.mrb[4].mxu0 %v8888_v24  ;;  %2600 = vmatpush1.bf16.msra.mxu1 %v7162_v43  ;;  %v7200_v43 = vld [vmem:[#allocation9 + $0x770] ss:$8 sps:$4 sm:$0xff]  }
 0x239   : > { %4761 = vmatpush1.bf16.msra.mxu0 %v7166_v54  ;;  %2601 = vmatprep.subr.bf16.mxu1 %v7171_v34  ;;  %v7206_v54 = vld [vmem:[#allocation9 + $0x384] ss:$8 sps:$4 sm:$0xff]   ;;  %v7204_v34 = vld [vmem:[#allocation9 + $0x380] ss:$8 sps:$4 sm:$0xff]  }
 0x23a   : > { %4762 = vmatprep.subr.bf16.mxu0 %v7174_v4  ;;  %2213 = vmatprep.mubr.bf16.mxu1 %v6005_v59  ;;  %v8945_v4 = vcombine.low %v8931_v20, %v8933_v42  ;;  %v1886_v59 = vsel %vm8660_vm8, %v5997_v49, %v8652_v1  ;;  %v7211_v1 = vld [vmem:[#allocation9 + $0x390] ss:$8 sps:$4 sm:$0xff]  }
 0x23b   : > { %4190 = vmatprep.mubr.bf16.mxu0 %v8900_v56  ;;  %v6011_v3 = vcombine.high %v1886_v59, %v8724_v13 }
 0x23c   : > { %2602 = vmatpush1.bf16.msra.mxu1 %v7169_v0  ;;  %v8950_v0 = vld [vmem:[#allocation2 + $0xa8] sm:$0xff] }
 0x23d   : > { %4763 = vmatpush1.bf16.msra.mxu0 %v7172_v5  ;;  %2603 = vmatprep.subr.bf16.mxu1 %v7178_v57  ;;  %v7213_v5 = vld [vmem:[#allocation9 + $0x394] ss:$8 sps:$4 sm:$0xff]   ;;  %v1827_v57 = vld [vmem:[#allocation2 + $0x90] sm:$0xee] }
 0x23e   : > { %4764 = vmatprep.subr.bf16.mxu0 %v7182_v8  ;;  %v7216_v8 = vld [vmem:[#allocation9 + $0x794] ss:$8 sps:$4 sm:$0xff]   ;;  %v5998_v17 = vrot.slane %v1827_v57, 9  ;;  %v4341_v57 = vshll.u32 %v8876_v6, 16 }
 0x23f   : > { %2214 = vmatmul.mubr.bf16.gmra.mrb[8].mxu1 %v6004_v55  ;;  %v4308_v55 = vshrl.u32 %v8852_v2, 16 }
 0x240   : > { %4191 = vmatmul.mubr.bf16.gmra.mrb[8].mxu0 %v8909_v25  ;;  %2604 = vmatpush1.bf16.msra.mxu1 %v7176_v62  ;;  %v8957_v62 = vcombine.high %v8950_v0, %v8952_v61 }
 0x241   : > { %4765 = vmatpush1.bf16.msra.mxu0 %v7180_v15  ;;  %2605 = vmatprep.subr.bf16.mxu1 %v7185_v31  ;;  %v4311_v15 = vshll.u32 %v8852_v2, 16  ;;  %v7220_v31 = vld [vmem:[#allocation9 + $0x3a4] ss:$8 sps:$4 sm:$0xff]   ;;  %v8968_v2 = vcombine.low %v8950_v0, %v8952_v61 }
 0x242   : > { %4766 = vmatprep.subr.bf16.mxu0 %v7188_v21  ;;  %2223 = vmatprep.mubr.bf16.mxu1 %v6007_v41  ;;  %v7224_v21 = vld [vmem:[#allocation9 + $0x7a4] ss:$8 sps:$4 sm:$0xff]   ;;  %v4310_v41 = vrot.slane %v4308_v55, 4 }
 0x243   : > { %4200 = vmatprep.mubr.bf16.mxu0 %v8919_v32 }
 0x244   : > { %2606 = vmatpush1.bf16.msra.mxu1 %v7183_v46  ;;  %v4317_v46 = vshll.u32 %v8854_v33, 16  ;;  %v1828_v33 = vld [vmem:[#allocation2 + $0xa8] sm:$0xee] }
 0x245   : > { %4767 = vmatpush1.bf16.msra.mxu0 %v7186_v30  ;;  %2607 = vmatprep.subr.bf16.mxu1 %v7192_v60  ;;  %v6010_v30 = vcombine.low %v1886_v59, %v8724_v13  ;;  %v1893_v60 = vsel %vm8660_vm8, %v5998_v17, %v8669_v50  ;;  %v7227_v13 = vld [vmem:[#allocation9 + $0x3b4] ss:$8 sps:$4 sm:$0xff]   ;;  %v5999_v49 = vrot.slane %v1828_v33, 9  ;;  %v4335_v59 = vshll.u32 %v8874_v29, 16  ;;  %v8998_v17 = vld [vmem:[#allocation2 + $0xd8] sm:$0xff] }
 0x246   : > { %4768 = vmatprep.subr.bf16.mxu0 %v7196_v48  ;;  %v8973_v48 = vld [vmem:[#allocation2 + $0xc0] sm:$0xff]  ;;  %v4319_v50 = vrot.slane %v4317_v46, 5 }
 0x247   : > { %2224 = vmatmul.mubr.bf16.gmra.mrb[12].mxu1 %v6006_v44  ;;  %v7218_v44 = vld [vmem:[#allocation9 + $0x3a0] ss:$8 sps:$4 sm:$0xff]   ;;  %v4337_v46 = vrot.slane %v4335_v59, 5  ;;  %v7242_v33 = vld [vmem:[#allocation9 + $0x7d0] ss:$8 sps:$4 sm:$0xff]  }
 0x248   : > { %4201 = vmatmul.mubr.bf16.gmra.mrb[12].mxu0 %v8926_v10  ;;  %2608 = vmatpush1.bf16.msra.mxu1 %v7190_v39  ;;  %v8975_v39 = vld [vmem:[#allocation2 + $0xc8] sm:$0xff] }
 0x249   : > { %4769 = vmatpush1.bf16.msra.mxu0 %v7194_v11  ;;  %2609 = vmatprep.subr.bf16.mxu1 %v7199_v19  ;;  %v4313_v11 = vrot.slane %v4311_v15, 5  ;;  %v6013_v19 = vcombine.high %v1893_v60, %v8738_v26  ;;  %v8993_v55 = vcombine.low %v8973_v48, %v8975_v39 }
 0x24a   : > { %4770 = vmatprep.subr.bf16.mxu0 %v7202_v37  ;;  %2233 = vmatprep.mubr.bf16.mxu1 %v6009_v22  ;;  %v8980_v37 = vcombine.high %v8973_v48, %v8975_v39  ;;  %v4323_v22 = vrot.slane %v4321_v36, 4 }
 0x24b   : > { %4210 = vmatprep.mubr.bf16.mxu0 %v8938_v38 }
 0x24c   : > { %2610 = vmatpush1.bf16.msra.mxu1 %v7197_v40  ;;  %v7225_v40 = vld [vmem:[#allocation9 + $0x3b0] ss:$8 sps:$4 sm:$0xff]  }
 0x24d   : > { %4771 = vmatpush1.bf16.msra.mxu0 %v7200_v43  ;;  %2611 = vmatprep.subr.bf16.mxu1 %v7206_v54  ;;  %v7228_v43 = vld [vmem:[#allocation9 + $0x7b0] ss:$8 sps:$4 sm:$0xff]  }
 0x24e   : > { %4772 = vmatprep.subr.bf16.mxu0 %v7210_v23  ;;  %v8983_v54 = vld [vmem:[#allocation2 + $0x40] sm:$0x11]  ;;  %v4314_v23 = vor.u32 %v4313_v11, %v4310_v41 }
 0x24f   : > { %2234 = vmatmul.mubr.bf16.gmra.mrb[16].mxu1 %v6008_v35  ;;  %v4332_v35 = vshrl.u32 %v8874_v29, 16  ;;  %v9000_v29 = vld [vmem:[#allocation2 + $0xe0] sm:$0xff]  ;;  %v4327_v15 = vshll.u32 %v8983_v54, 16 }
 0x250   : > { %4211 = vmatmul.mubr.bf16.gmra.mrb[16].mxu0 %v8945_v4  ;;  %2612 = vmatpush1.bf16.msra.mxu1 %v7204_v34  ;;  %v7234_v34 = vld [vmem:[#allocation9 + $0x3c4] ss:$8 sps:$4 sm:$0xff]   ;;  %v6214_v59 = vcombine.low %v8998_v17, %v9000_v29 }
 0x251   : > { %4773 = vmatpush1.bf16.msra.mxu0 %v7208_v45  ;;  %2613 = vmatprep.subr.bf16.mxu1 %v7213_v5  ;;  %v7238_v45 = vld [vmem:[#allocation9 + $0x7c4] ss:$8 sps:$4 sm:$0xff]   ;;  %v4324_v5 = vor.u32 %v4323_v22, %v4319_v50  ;;  %v4334_v41 = vrot.slane %v4332_v35, 4 }
 0x252   : > { %4774 = vmatprep.subr.bf16.mxu0 %v7216_v8  ;;  %2243 = vmatprep.mubr.bf16.mxu1 %v6011_v3  ;;  %v4345_v8 = vshrl.u32 %v8876_v6, 16  ;;  %v6012_v3 = vcombine.low %v1893_v60, %v8738_v26  ;;  %v7236_v6 = vld [vmem:[#allocation9 + $0x7c0] ss:$8 sps:$4 sm:$0xff]   ;;  %v7241_v26 = vld [vmem:[#allocation9 + $0x3d4] ss:$8 sps:$4 sm:$0xff]  }
 0x253   : > { %4220 = vmatprep.mubr.bf16.mxu0 %v8957_v62  ;;  %v4325_v11 = vrot.slane %v4324_v5, 4 }
 0x254   : > { %2614 = vmatpush1.bf16.msra.mxu1 %v7211_v1  ;;  %v1900_v1 = vsel %vm8660_vm8, %v5999_v49, %v8689_v47  ;;  %v6215_v47 = vcombine.high %v8998_v17, %v9000_v29  ;;  %v4347_v60 = vrot.slane %v4345_v8, 4  ;;  %v4338_v49 = vor.u32 %v4337_v46, %v4334_v41  ;;  %v7250_v8 = vld [vmem:[#allocation9 + $0x7e0] ss:$8 sps:$4 sm:$0xff]   ;;  %v7253_v41 = vld [vmem:[#allocation9 + $0x3f0] ss:$8 sps:$4 sm:$0xff]  }
 0x255   : > { %4775 = vmatpush1.bf16.msra.mxu0 %v7214_v27  ;;  %2615 = vmatprep.subr.bf16.mxu1 %v7220_v31  ;;  %v7232_v27 = vld [vmem:[#allocation9 + $0x3c0] ss:$8 sps:$4 sm:$0xff]   ;;  %v4315_v31 = vrot.slane %v4314_v23, 4  ;;  %v6015_v36 = vcombine.high %v1900_v1, %v8744_v58  ;;  %v4359_v23 = vshll.u32 %v8893_v52, 16  ;;  %v6014_v35 = vcombine.low %v1900_v1, %v8744_v58  ;;  %v7256_v46 = vld [vmem:[#allocation9 + $0x7f0] ss:$8 sps:$4 sm:$0xff]  }
 0x256   : > { %4776 = vmatprep.subr.bf16.mxu0 %v7224_v21  ;;  %v7244_v21 = vld [vmem:[#allocation9 + $0x7d4] ss:$8 sps:$4 sm:$0xff]  }
 0x257   : > { %2244 = vmatmul.mubr.bf16.gmra.mrb[20].mxu1 %v6010_v30  ;;  %v4343_v30 = vrot.slane %v4341_v57, 5  ;;  %v9011_v22 = vsel %vm8339_vm5, %v4315_v31, %v4319_v50  ;;  %v7246_v57 = vld [vmem:[#allocation9 + $0x3e0] ss:$8 sps:$4 sm:$0xff]   ;;  %v4361_v1 = vrot.slane %v4359_v23, 5  ;;  %v4393_v23 = vshrl.u32 %v8914_v63, 16 }
 0x258   : > { %4221 = vmatmul.mubr.bf16.gmra.mrb[20].mxu0 %v8968_v2  ;;  %2616 = vmatpush1.bf16.msra.mxu1 %v7218_v44  ;;  %v4329_v44 = vrot.slane %v4327_v15, 5  ;;  %v4339_v15 = vrot.slane %v4338_v49, 4 }
 0x259   : > { %4777 = vmatpush1.bf16.msra.mxu0 %v7222_v9  ;;  %2617 = vmatprep.subr.bf16.mxu1 %v7227_v13  ;;  %v7239_v9 = vld [vmem:[#allocation9 + $0x3d0] ss:$8 sps:$4 sm:$0xff]   ;;  %v9007_v13 = vld [vmem:[#allocation2 + $0x58] sm:$0x11] }
 0x25a   : > { %4778 = vmatprep.subr.bf16.mxu0 %v7230_v28  ;;  %2253 = vmatprep.mubr.bf16.mxu1 %v6013_v19  ;;  %v7248_v28 = vld [vmem:[#allocation9 + $0x3e4] ss:$8 sps:$4 sm:$0xff]   ;;  %v4330_v50 = vsel %vm8339_vm5, %v4325_v11, %v4329_v44  ;;  %v4351_v5 = vshll.u32 %v9007_v13, 16  ;;  %v4383_v11 = vshll.u32 %v8904_v18, 16  ;;  %v4344_v44 = vsel %vm8339_vm5, %v4339_v15, %v4343_v30 }
 0x25b   : > { %4230 = vmatprep.mubr.bf16.mxu0 %v8980_v37  ;;  %v7252_v19 = vld [vmem:[#allocation9 + $0x7e4] ss:$8 sps:$4 sm:$0xff]   ;;  %v6249_v58 = vcombine.high %v9011_v22, %v4330_v50  ;;  %v6248_v49 = vcombine.low %v9011_v22, %v4330_v50  ;;  %v4404_v15 = vshrl.u32 %v8931_v20, 16 }
 0x25c   : > { %2618 = vmatpush1.bf16.msra.mxu1 %v7225_v40  ;;  %v4356_v40 = vshrl.u32 %v8893_v52, 16  ;;  %v7255_v52 = vld [vmem:[#allocation9 + $0x3f4] ss:$8 sps:$4 sm:$0xff]  }
 0x25d   : > { %4779 = vmatpush1.bf16.msra.mxu0 %v7228_v43  ;;  %2619 = vmatprep.subr.bf16.mxu1 %v7234_v34  ;;  %v4348_v43 = vor.u32 %v4347_v60, %v4343_v30  ;;  %v4365_v34 = vshll.u32 %v8895_v53, 16  ;;  %v4380_v60 = vshrl.u32 %v8904_v18, 16  ;;  %v7262_v18 = vld [vmem:[#allocation9 + $0x800] ss:$8 sps:$4 sm:$0xff]   ;;  %v7267_v30 = vld [vmem:[#allocation9 + $0x814] ss:$8 sps:$4 sm:$0xff]  }
 0x25e   : > { %4780 = vmatprep.subr.bf16.mxu0 %v7238_v45  ;;  %v4369_v45 = vshrl.u32 %v8895_v53, 16  ;;  %v4358_v53 = vrot.slane %v4356_v40, 4 }
 0x25f   : > { %2254 = vmatmul.mubr.bf16.gmra.mrb[24].mxu1 %v6012_v3  ;;  %v7258_v3 = vld [vmem:[#allocation9 + $0x7f4] ss:$8 sps:$4 sm:$0xff]  }
 0x260   : > { %4231 = vmatmul.mubr.bf16.gmra.mrb[24].mxu0 %v8993_v55  ;;  %2620 = vmatpush1.bf16.msra.mxu1 %v7232_v27  ;;  %v7261_v27 = vld [vmem:[#allocation2 + $0x1c] ss:$8 sps:$4 sm:$0xff]   ;;  %v4371_v31 = vrot.slane %v4369_v45, 4  ;;  %v4385_v45 = vrot.slane %v4383_v11, 5 }
 0x261   : > { %4781 = vmatpush1.bf16.msra.mxu0 %v7236_v6  ;;  %2621 = vmatprep.subr.bf16.mxu1 %v7241_v26  ;;  %v4367_v6 = vrot.slane %v4365_v34, 5  ;;  %v4349_v26 = vrot.slane %v4348_v43, 4  ;;  %v4382_v34 = vrot.slane %v4380_v60, 4 }
 0x262   : > { %4782 = vmatprep.subr.bf16.mxu0 %v7244_v21  ;;  %2263 = vmatprep.mubr.bf16.mxu1 %v6015_v36  ;;  %v4353_v21 = vrot.slane %v4351_v5, 5  ;;  %v9024_v36 = vld [vmem:[#allocation2 + $0x70] sm:$0x11] }
 0x263   : > { %4240 = vmatprep.mubr.bf16.mxu0 %v6215_v47  ;;  %v7264_v47 = vld [vmem:[#allocation9 + $0x804] ss:$8 sps:$4 sm:$0xff]   ;;  %v4375_v43 = vshll.u32 %v9024_v36, 16 }
 0x264   : > { %2622 = vmatpush1.bf16.msra.mxu1 %v7239_v9  ;;  %v4362_v9 = vor.u32 %v4361_v1, %v4358_v53  ;;  %v4354_v40 = vsel %vm8339_vm5, %v4349_v26, %v4353_v21  ;;  %v4417_v1 = vshrl.u32 %v8933_v42, 16 }
 0x265   : > { %4783 = vmatpush1.bf16.msra.mxu0 %v7242_v33  ;;  %2623 = vmatprep.subr.bf16.mxu1 %v7248_v28  ;;  %v4372_v33 = vor.u32 %v4371_v31, %v4367_v6  ;;  %v4389_v28 = vshll.u32 %v8914_v63, 16  ;;  %v4377_v50 = vrot.slane %v4375_v43, 5  ;;  %v9036_v63 = vld [vmem:[#allocation2 + $0x88] sm:$0x11]  ;;  %v6250_v31 = vcombine.low %v4344_v44, %v4354_v40 }
 0x266   : > { %4784 = vmatprep.subr.bf16.mxu0 %v7252_v19  ;;  %v7259_v19 = vld [vmem:[#allocation2 + $0x18] ss:$8 sps:$4 sm:$0xff]   ;;  %v4431_v43 = vshll.u32 %v8950_v0, 16 }
 0x267   : > { %2264 = vmatmul.mubr.bf16.gmra.mrb[28].mxu1 %v6014_v35  ;;  %v6251_v35 = vcombine.high %v4344_v44, %v4354_v40  ;;  %v4373_v22 = vrot.slane %v4372_v33, 4  ;;  %v4391_v5 = vrot.slane %v4389_v28, 5  ;;  %v7271_v28 = vld [vmem:[#allocation9 + $0x830] ss:$8 sps:$4 sm:$0xff]   ;;  %v4428_v40 = vshrl.u32 %v8950_v0, 16 }
 0x268   : > { %4241 = vmatmul.mubr.bf16.gmra.mrb[28].mxu0 %v6214_v59  ;;  %2624 = vmatpush1.bf16.msra.mxu1 %v7246_v57  ;;  %v4363_v59 = vrot.slane %v4362_v9, 4  ;;  %v4395_v57 = vrot.slane %v4393_v23, 4  ;;  %v4419_v9 = vrot.slane %v4417_v1, 4  ;;  %v7274_v0 = vld [vmem:[#allocation9 + $0x840] ss:$8 sps:$4 sm:$0xff]  }
 0x269   : > { %4785 = vmatpush1.bf16.msra.mxu0 %v7250_v8  ;;  %2625 = vmatprep.subr.bf16.mxu1 %v7255_v52  ;;  %v7265_v8 = vld [vmem:[#allocation9 + $0x810] ss:$8 sps:$4 sm:$0xff]   ;;  %v7270_v52 = vld [vmem:[#allocation9 + $0x824] ss:$8 sps:$4 sm:$0xff]   ;;  %v4378_v26 = vsel %vm8339_vm5, %v4373_v22, %v4377_v50  ;;  %v4430_v22 = vrot.slane %v4428_v40, 4  ;;  %v4433_v50 = vrot.slane %v4431_v43, 5 }
 0x26a   : > { %4786 = vmatprep.subr.bf16.mxu0 %v7258_v3  ;;  %2627 = vmatprep.mubr.bf16.mxu1 %v7261_v27  ;;  %v4386_v3 = vor.u32 %v4385_v45, %v4382_v34  ;;  %v4368_v53 = vsel %vm8339_vm5, %v4363_v59, %v4367_v6  ;;  %v4407_v27 = vshll.u32 %v8931_v20, 16  ;;  %v4396_v21 = vor.u32 %v4395_v57, %v4391_v5  ;;  %v7283_v40 = vld [vmem:[#allocation9 + $0x870] ss:$8 sps:$4 sm:$0xff]   ;;  %v9075_v43 = vld [vmem:[#allocation2 + $0xd0] sm:$0x11] }
 0x26b   : > { %4788 = vmatprep.mubr.bf16.mxu0 %v6249_v58  ;;  %v4413_v58 = vshll.u32 %v8933_v42, 16  ;;  %v6253_v20 = vcombine.high %v4368_v53, %v4378_v26  ;;  %v6252_v34 = vcombine.low %v4368_v53, %v4378_v26  ;;  %v4441_v59 = vshrl.u32 %v8952_v61, 16  ;;  %v7277_v53 = vld [vmem:[#allocation9 + $0x850] ss:$8 sps:$4 sm:$0xff]  }
 0x26c   : > { %2626 = vmatpush1.bf16.msra.mxu1 %v7253_v41  ;;  %v4399_v41 = vshll.u32 %v9036_v63, 16  ;;  %v4387_v6 = vrot.slane %v4386_v3, 4  ;;  %v4409_v60 = vrot.slane %v4407_v27, 5  ;;  %v4397_v44 = vrot.slane %v4396_v21, 4  ;;  %v9062_v27 = vld [vmem:[#allocation2 + $0xb8] sm:$0x11] }
 0x26d   : > { %4787 = vmatpush1.bf16.msra.mxu0 %v7256_v46  ;;  %6368 = vmatprep.subr.bf16.mxu1 %v7264_v47  ;;  %v7273_v46 = vld [vmem:[#allocation9 + $0x834] ss:$8 sps:$4 sm:$0xff]   ;;  %v4415_v11 = vrot.slane %v4413_v58, 5  ;;  %v7282_v58 = vld [vmem:[#allocation9 + $0x864] ss:$8 sps:$4 sm:$0xff]   ;;  %v4434_v1 = vor.u32 %v4433_v50, %v4430_v22  ;;  %v4455_v26 = vshll.u32 %v8973_v48, 16 }
 0x26e   : > { %5246 = vmatprep.subr.bf16.mxu0 %v7264_v47  ;;  %v4406_v47 = vrot.slane %v4404_v15, 4  ;;  %v4401_v33 = vrot.slane %v4399_v41, 5  ;;  %v4443_v15 = vrot.slane %v4441_v59, 4  ;;  %v4461_v21 = vshll.u32 %v8975_v39, 16  ;;  %v7286_v22 = vld [vmem:[#allocation9 + $0x880] ss:$8 sps:$4 sm:$0xff]  }
 0x26f   : > { %2628 = vmatmul.mubr.bf16.vlgmr.msra.gmra.mrb[0].mxu1 %v7259_v19  ;;  %v9049_v19 = vld [vmem:[#allocation2 + $0xa0] sm:$0x11]  ;;  %v4465_v41 = vshrl.u32 %v8975_v39, 16 }
 0x270   : > { %4789 = vmatmul.mubr.bf16.vlgmr.msra.gmra.mrb[0].mxu0 %v6248_v49  ;;  %6384 = vmatpush1.bf16.msra.mxu1 %v7262_v18  ;;  %v7276_v49 = vld [vmem:[#allocation9 + $0x844] ss:$8 sps:$4 sm:$0xff]   ;;  %v4410_v23 = vor.u32 %v4409_v60, %v4406_v47  ;;  %v4402_v45 = vsel %vm8339_vm5, %v4397_v44, %v4401_v33  ;;  %v4447_v47 = vshll.u32 %v9062_v27, 16  ;;  %v4463_v44 = vrot.slane %v4461_v21, 5 }
 0x271   : > { %5247 = vmatpush1.bf16.msra.mxu0 %v7262_v18  ;;  %6369 = vmatprep.subr.bf16.mxu1 %v7267_v30  ;;  %v4420_v18 = vor.u32 %v4419_v9, %v4415_v11  ;;  %v4467_v33 = vrot.slane %v4465_v41, 4 }
 0x272   : > { %5248 = vmatprep.subr.bf16.mxu0 %v7267_v30  ;;  %2637 = vmatprep.mubr.bf16.mxu1 %v8858_v16  ;;  %v7268_v16 = vld [vmem:[#allocation9 + $0x820] ss:$8 sps:$4 sm:$0xff]   ;;  %v4437_v30 = vshll.u32 %v8952_v61, 16  ;;  %v4411_v57 = vrot.slane %v4410_v23, 4 }
 0x273   : > { %4798 = vmatprep.mubr.bf16.mxu0 %v6251_v35  ;;  %v4423_v35 = vshll.u32 %v9049_v19, 16 }
 0x274   : > { %6385 = vmatpush1.bf16.msra.mxu1 %v7265_v8  ;;  %v4439_v3 = vrot.slane %v4437_v30, 5  ;;  %v4468_v30 = vor.u32 %v4467_v33, %v4463_v44  ;;  %v4963_v33 = vrot.slane %v8933_v42, 5  ;;  %v4966_v42 = vrot.slane %v9049_v19, 5 }
 0x275   : > { %5249 = vmatpush1.bf16.msra.mxu0 %v7265_v8  ;;  %6370 = vmatprep.subr.bf16.mxu1 %v7270_v52  ;;  %v4421_v8 = vrot.slane %v4420_v18, 4 }
 0x276   : > { %5250 = vmatprep.subr.bf16.mxu0 %v7270_v52  ;;  %v4425_v52 = vrot.slane %v4423_v35, 5 }
 0x277   : > { %2638 = vmatmul.mubr.bf16.gmra.mrb[4].mxu1 %v8869_v7  ;;  %v4392_v7 = vsel %vm8339_vm5, %v4387_v6, %v4391_v5  ;;  %v4444_v6 = vor.u32 %v4443_v15, %v4439_v3 }
 0x278   : > { %4799 = vmatmul.mubr.bf16.gmra.mrb[4].mxu0 %v6250_v31  ;;  %6386 = vmatpush1.bf16.msra.mxu1 %v7268_v16  ;;  %v6255_v5 = vcombine.high %v4392_v7, %v4402_v45  ;;  %v4452_v31 = vshrl.u32 %v8973_v48, 16  ;;  %v7280_v48 = vld [vmem:[#allocation9 + $0x860] ss:$8 sps:$4 sm:$0xff]  }
 0x279   : > { %5251 = vmatpush1.bf16.msra.mxu0 %v7268_v16  ;;  %6371 = vmatprep.subr.bf16.mxu1 %v7273_v46  ;;  %v6254_v16 = vcombine.low %v4392_v7, %v4402_v45  ;;  %v7288_v7 = vld [vmem:[#allocation9 + $0x884] ss:$8 sps:$4 sm:$0xff]   ;;  %v4485_v45 = vshll.u32 %v9000_v29, 16 }
 0x27a   : > { %5252 = vmatprep.subr.bf16.mxu0 %v7273_v46  ;;  %2647 = vmatprep.mubr.bf16.mxu1 %v8881_v12  ;;  %v7279_v12 = vld [vmem:[#allocation9 + $0x854] ss:$8 sps:$4 sm:$0xff]   ;;  %v4426_v46 = vsel %vm8339_vm5, %v4421_v8, %v4425_v52  ;;  %v4454_v60 = vrot.slane %v4452_v31, 4  ;;  %v4469_v8 = vrot.slane %v4468_v30, 4 }
 0x27b   : > { %4808 = vmatprep.mubr.bf16.mxu0 %v6253_v20  ;;  %v4435_v20 = vrot.slane %v4434_v1, 4  ;;  %v7294_v1 = vld [vmem:[#allocation9 + $0x8a4] ss:$8 sps:$4 sm:$0xff]  }
 0x27c   : > { %6387 = vmatpush1.bf16.msra.mxu1 %v7271_v28 }
 0x27d   : > { %5253 = vmatpush1.bf16.msra.mxu0 %v7271_v28  ;;  %6372 = vmatprep.subr.bf16.mxu1 %v7276_v49  ;;  %v4445_v28 = vrot.slane %v4444_v6, 4  ;;  %v4440_v23 = vsel %vm8339_vm5, %v4435_v20, %v4439_v3  ;;  %v4487_v3 = vrot.slane %v4485_v45, 5  ;;  %v7300_v20 = vld [vmem:[#allocation9 + $0x8c4] ss:$8 sps:$4 sm:$0xff]  }
 0x27e   : > { %5254 = vmatprep.subr.bf16.mxu0 %v7276_v49  ;;  %v4449_v49 = vrot.slane %v4447_v47, 5  ;;  %v7314_v45 = vld [vmem:[#allocation2 + $0x50] sm:$0xff] }
 0x27f   : > { %2648 = vmatmul.mubr.bf16.gmra.mrb[8].mxu1 %v8888_v24  ;;  %v4416_v24 = vsel %vm8339_vm5, %v4411_v57, %v4415_v11  ;;  %v4457_v11 = vrot.slane %v4455_v26, 5 }
 0x280   : > { %4809 = vmatmul.mubr.bf16.gmra.mrb[8].mxu0 %v6252_v34  ;;  %6388 = vmatpush1.bf16.msra.mxu1 %v7274_v0  ;;  %v6257_v9 = vcombine.high %v4416_v24, %v4426_v46  ;;  %v4479_v34 = vshll.u32 %v8998_v17, 16  ;;  %v6256_v35 = vcombine.low %v4416_v24, %v4426_v46  ;;  %v4450_v59 = vsel %vm8339_vm5, %v4445_v28, %v4449_v49  ;;  %v7297_v46 = vld [vmem:[#allocation9 + $0x8b4] ss:$8 sps:$4 sm:$0xff]   ;;  %v7298_v28 = vld [vmem:[#allocation9 + $0x8c0] ss:$8 sps:$4 sm:$0xff]  }
 0x281   : > { %5255 = vmatpush1.bf16.msra.mxu0 %v7274_v0  ;;  %6373 = vmatprep.subr.bf16.mxu1 %v7279_v12  ;;  %v4458_v18 = vor.u32 %v4457_v11, %v4454_v60  ;;  %v4471_v0 = vshll.u32 %v9075_v43, 16  ;;  %v6259_v50 = vcombine.high %v4440_v23, %v4450_v59  ;;  %v6258_v26 = vcombine.low %v4440_v23, %v4450_v59  ;;  %v7313_v60 = vld [vmem:[#allocation2 + $0x38] sm:$0xff]  ;;  %v4901_v49 = vld [vmem:[#allocation2 + $0x30] sm:$0xee] }
 0x282   : > { %5256 = vmatprep.subr.bf16.mxu0 %v7279_v12  ;;  %2657 = vmatprep.mubr.bf16.mxu1 %v8900_v56  ;;  %v7285_v56 = vld [vmem:[#allocation9 + $0x874] ss:$8 sps:$4 sm:$0xff]   ;;  %v4489_v12 = vshrl.u32 %v9000_v29, 16  ;;  %v4935_v11 = vrot.slane %v7313_v60, 5  ;;  %v6296_v30 = vrot.slane %v4901_v49, 9 }
 0x283   : > { %4818 = vmatprep.mubr.bf16.mxu0 %v6255_v5  ;;  %v4459_v5 = vrot.slane %v4458_v18, 4  ;;  %v4473_v52 = vrot.slane %v4471_v0, 5  ;;  %v4938_v18 = vrot.slane %v8983_v54, 5  ;;  %v7306_v59 = vld [vmem:[#allocation9 + $0x8e4] ss:$8 sps:$4 sm:$0xff]  }
 0x284   : > { %6389 = vmatpush1.bf16.msra.mxu1 %v7277_v53  ;;  %v4491_v15 = vrot.slane %v4489_v12, 4  ;;  %v4937_v23 = vrot.slane %v4935_v11, 4  ;;  %v4902_v0 = vld [vmem:[#allocation2 + $0x48] sm:$0xee]  ;;  %v4970_v12 = vrot.slane %v8952_v61, 5  ;;  %v4936_v19 = vsel %vm8660_vm8, %v6296_v30, %v4935_v11 }
 0x285   : > { %5257 = vmatpush1.bf16.msra.mxu0 %v7277_v53  ;;  %6374 = vmatprep.subr.bf16.mxu1 %v7282_v58  ;;  %v7289_v53 = vld [vmem:[#allocation9 + $0x890] ss:$8 sps:$4 sm:$0xff]   ;;  %v4464_v31 = vsel %vm8339_vm5, %v4459_v5, %v4463_v44  ;;  %v4474_v24 = vsel %vm8339_vm5, %v4469_v8, %v4473_v52  ;;  %v7304_v61 = vld [vmem:[#allocation9 + $0x8e0] ss:$8 sps:$4 sm:$0xff]   ;;  %v6297_v5 = vrot.slane %v4902_v0, 9  ;;  %v4980_v11 = vrot.slane %v9075_v43, 5 }
 0x286   : > { %5258 = vmatprep.subr.bf16.mxu0 %v7282_v58  ;;  %v9088_v58 = vld [vmem:[#allocation2 + $0xe8] sm:$0x11]  ;;  %v4492_v21 = vor.u32 %v4491_v15, %v4487_v3  ;;  %v6261_v6 = vcombine.high %v4464_v31, %v4474_v24  ;;  %v4906_v54 = vld [vmem:[#allocation2 + $0xa8] sm:$0xee]  ;;  %v4972_v52 = vrot.slane %v4970_v12, 4  ;;  %v4984_v43 = vrot.slane %v9000_v29, 5 }
 0x287   : > { %2658 = vmatmul.mubr.bf16.gmra.mrb[12].mxu1 %v8909_v25  ;;  %v4476_v25 = vshrl.u32 %v8998_v17, 16  ;;  %v4481_v17 = vrot.slane %v4479_v34, 5  ;;  %v4495_v41 = vshll.u32 %v9088_v58, 16  ;;  %v7301_v34 = vld [vmem:[#allocation9 + $0x8d0] ss:$8 sps:$4 sm:$0xff]   ;;  %v6301_v8 = vrot.slane %v4906_v54, 9 }
 0x288   : > { %4819 = vmatmul.mubr.bf16.gmra.mrb[12].mxu0 %v6254_v16  ;;  %6390 = vmatpush1.bf16.msra.mxu1 %v7280_v48  ;;  %v7292_v16 = vld [vmem:[#allocation9 + $0x8a0] ss:$8 sps:$4 sm:$0xff]   ;;  %v4493_v47 = vrot.slane %v4492_v21, 4  ;;  %v4977_v21 = vrot.slane %v8975_v39, 5  ;;  %v4959_v30 = vrot.slane %v9036_v63, 5 }
 0x289   : > { %5259 = vmatpush1.bf16.msra.mxu0 %v7280_v48  ;;  %6375 = vmatprep.subr.bf16.mxu1 %v7285_v56  ;;  %v4478_v57 = vrot.slane %v4476_v25, 4  ;;  %v4497_v48 = vrot.slane %v4495_v41, 5  ;;  %v4965_v25 = vrot.slane %v4963_v33, 4  ;;  %v4907_v41 = vld [vmem:[#allocation2 + $0xc0] sm:$0xee] }
 0x28a   : > { %5260 = vmatprep.subr.bf16.mxu0 %v7285_v56  ;;  %2667 = vmatprep.mubr.bf16.mxu1 %v8919_v32  ;;  %v7291_v32 = vld [vmem:[#allocation9 + $0x894] ss:$8 sps:$4 sm:$0xff]   ;;  %v7295_v56 = vld [vmem:[#allocation9 + $0x8b0] ss:$8 sps:$4 sm:$0xff]   ;;  %v4979_v60 = vrot.slane %v4977_v21, 4 }
 0x28b   : > { %4828 = vmatprep.mubr.bf16.mxu0 %v6257_v9  ;;  %v6260_v9 = vcombine.low %v4464_v31, %v4474_v24  ;;  %v4908_v49 = vld [vmem:[#allocation2 + $0xd8] sm:$0xee] }
 0x28c   : > { %6391 = vmatpush1.bf16.msra.mxu1 %v7283_v40 }
 0x28d   : > { %5261 = vmatpush1.bf16.msra.mxu0 %v7283_v40  ;;  %6376 = vmatprep.subr.bf16.mxu1 %v7288_v7  ;;  %v4905_v40 = vld [vmem:[#allocation2 + $0x90] sm:$0xee] }
 0x28e   : > { %5262 = vmatprep.subr.bf16.mxu0 %v7288_v7  ;;  %v6300_v51 = vrot.slane %v4905_v40, 9 }
 0x28f   : > { %2668 = vmatmul.mubr.bf16.gmra.mrb[16].mxu1 %v8926_v10  ;;  %v4482_v10 = vor.u32 %v4481_v17, %v4478_v57  ;;  %v4945_v57 = vrot.slane %v9007_v13, 5  ;;  %v7309_v17 = vld [vmem:[#allocation9 + $0x8f4] ss:$8 sps:$4 sm:$0xff]  }
 0x290   : > { %4829 = vmatmul.mubr.bf16.gmra.mrb[16].mxu0 %v6256_v35  ;;  %6392 = vmatpush1.bf16.msra.mxu1 %v7286_v22  ;;  %v4942_v35 = vrot.slane %v7314_v45, 5 }
 0x291   : > { %5263 = vmatpush1.bf16.msra.mxu0 %v7286_v22  ;;  %6377 = vmatprep.subr.bf16.mxu1 %v7291_v32 }
 0x292   : > { %5264 = vmatprep.subr.bf16.mxu0 %v7291_v32  ;;  %2677 = vmatprep.mubr.bf16.mxu1 %v8938_v38  ;;  %v4483_v38 = vrot.slane %v4482_v10, 4  ;;  %v4964_v32 = vsel %vm8660_vm8, %v6300_v51, %v4963_v33  ;;  %v4943_v31 = vsel %vm8660_vm8, %v6297_v5, %v4942_v35  ;;  %v4971_v10 = vsel %vm8660_vm8, %v6301_v8, %v4970_v12 }
 0x293   : > { %4838 = vmatprep.mubr.bf16.mxu0 %v6259_v50  ;;  %v4967_v50 = vsel %vm8660_vm8, %v4965_v25, %v4966_v42  ;;  %v4981_v33 = vsel %vm8660_vm8, %v4979_v60, %v4980_v11  ;;  %v6303_v25 = vrot.slane %v4908_v49, 9  ;;  %v4986_v42 = vrot.slane %v4984_v43, 4 }
 0x294   : > { %6393 = vmatpush1.bf16.msra.mxu1 %v7289_v53  ;;  %v4488_v44 = vsel %vm8339_vm5, %v4483_v38, %v4487_v3  ;;  %v4973_v3 = vrot.slane %v9062_v27, 5 }
 0x295   : > { %5265 = vmatpush1.bf16.msra.mxu0 %v7289_v53  ;;  %6378 = vmatprep.subr.bf16.mxu1 %v7294_v1  ;;  %v6313_v53 = vcombine.high %v4964_v32, %v4967_v50 }
 0x296   : > { %5266 = vmatprep.subr.bf16.mxu0 %v7294_v1  ;;  %v7307_v1 = vld [vmem:[#allocation9 + $0x8f0] ss:$8 sps:$4 sm:$0xff]   ;;  %v4974_v27 = vsel %vm8660_vm8, %v4972_v52, %v4973_v3 }
 0x297   : > { %2678 = vmatmul.mubr.bf16.gmra.mrb[20].mxu1 %v8945_v4  ;;  %v4498_v4 = vsel %vm8339_vm5, %v4493_v47, %v4497_v48  ;;  %v6315_v38 = vcombine.high %v4971_v10, %v4974_v27  ;;  %v4952_v48 = vrot.slane %v9024_v36, 5 }
 0x298   : > { %4839 = vmatmul.mubr.bf16.gmra.mrb[20].mxu0 %v6258_v26  ;;  %6394 = vmatpush1.bf16.msra.mxu1 %v7292_v16  ;;  %v6263_v7 = vcombine.high %v4488_v44, %v4498_v4  ;;  %v6262_v22 = vcombine.low %v4488_v44, %v4498_v4  ;;  %v4903_v26 = vld [vmem:[#allocation2 + $0x60] sm:$0xee] }
 0x299   : > { %5267 = vmatpush1.bf16.msra.mxu0 %v7292_v16  ;;  %6379 = vmatprep.subr.bf16.mxu1 %v7297_v46  ;;  %v6298_v47 = vrot.slane %v4903_v26, 9 }
 0x29a   : > { %5268 = vmatprep.subr.bf16.mxu0 %v7297_v46  ;;  %2687 = vmatprep.mubr.bf16.mxu1 %v8957_v62  ;;  %v7303_v62 = vld [vmem:[#allocation9 + $0x8d4] ss:$8 sps:$4 sm:$0xff]   ;;  %v6312_v46 = vcombine.low %v4964_v32, %v4967_v50 }
 0x29b   : > { %4848 = vmatprep.mubr.bf16.mxu0 %v6261_v6 }
 0x29c   : > { %6395 = vmatpush1.bf16.msra.mxu1 %v7295_v56 }
 0x29d   : > { %5269 = vmatpush1.bf16.msra.mxu0 %v7295_v56  ;;  %6380 = vmatprep.subr.bf16.mxu1 %v7300_v20 }
 0x29e   : > { %5270 = vmatprep.subr.bf16.mxu0 %v7300_v20  ;;  %v6302_v20 = vrot.slane %v4907_v41, 9 }
 0x29f   : > { %2688 = vmatmul.mubr.bf16.gmra.mrb[24].mxu1 %v8968_v2  ;;  %v4939_v2 = vsel %vm8660_vm8, %v4937_v23, %v4938_v18 }
 0x2a0   : > { %4849 = vmatmul.mubr.bf16.gmra.mrb[24].mxu0 %v6260_v9  ;;  %6396 = vmatpush1.bf16.msra.mxu1 %v7298_v28  ;;  %v6305_v15 = vcombine.high %v4936_v19, %v4939_v2  ;;  %v6304_v16 = vcombine.low %v4936_v19, %v4939_v2  ;;  %v7316_v9 = vld [vmem:[#allocation2 + $0x80] sm:$0xff]  ;;  %v4978_v36 = vsel %vm8660_vm8, %v6302_v20, %v4977_v21 }
 0x2a1   : > { %5271 = vmatpush1.bf16.msra.mxu0 %v7298_v28  ;;  %6381 = vmatprep.subr.bf16.mxu1 %v7303_v62  ;;  %v4956_v44 = vrot.slane %v7316_v9, 5  ;;  %v4904_v28 = vld [vmem:[#allocation2 + $0x78] sm:$0xee]  ;;  %v6317_v23 = vcombine.high %v4978_v36, %v4981_v33  ;;  %v6316_v0 = vcombine.low %v4978_v36, %v4981_v33 }
 0x2a2   : > { %5272 = vmatprep.subr.bf16.mxu0 %v7303_v62  ;;  %2697 = vmatprep.mubr.bf16.mxu1 %v8980_v37  ;;  %v4944_v37 = vrot.slane %v4942_v35, 4  ;;  %v6314_v62 = vcombine.low %v4971_v10, %v4974_v27  ;;  %v6299_v18 = vrot.slane %v4904_v28, 9  ;;  %v4985_v35 = vsel %vm8660_vm8, %v6303_v25, %v4984_v43 }
 0x2a3   : > { %4858 = vmatprep.mubr.bf16.mxu0 %v6263_v7  ;;  %v4958_v51 = vrot.slane %v4956_v44, 4  ;;  %v5564_v25 = vlaneseq }
 0x2a4   : > { %6397 = vmatpush1.bf16.msra.mxu1 %v7301_v34  ;;  %v4946_v13 = vsel %vm8660_vm8, %v4944_v37, %v4945_v57  ;;  %v4957_v29 = vsel %vm8660_vm8, %v6299_v18, %v4956_v44 }
 0x2a5   : > { %5273 = vmatpush1.bf16.msra.mxu0 %v7301_v34  ;;  %6382 = vmatprep.subr.bf16.mxu1 %v7306_v59  ;;  %v6307_v6 = vcombine.high %v4943_v31, %v4946_v13  ;;  %v6306_v40 = vcombine.low %v4943_v31, %v4946_v13  ;;  %v4987_v34 = vrot.slane %v9088_v58, 5  ;;  %v4960_v45 = vsel %vm8660_vm8, %v4958_v51, %v4959_v30 }
 0x2a6   : > { %5274 = vmatprep.subr.bf16.mxu0 %v7306_v59  ;;  %v6311_v12 = vcombine.high %v4957_v29, %v4960_v45  ;;  %v6310_v2 = vcombine.low %v4957_v29, %v4960_v45 }
 0x2a7   : > { %2698 = vmatmul.mubr.bf16.gmra.mrb[28].mxu1 %v8993_v55  ;;  %v7315_v55 = vld [vmem:[#allocation2 + $0x68] sm:$0xff]  ;;  %v4988_v63 = vsel %vm8660_vm8, %v4986_v42, %v4987_v34  ;;  %v5565_v34 = vshrl.u32 %v5564_v25, 7 }
 0x2a8   : > { %4859 = vmatmul.mubr.bf16.gmra.mrb[28].mxu0 %v6262_v22  ;;  %6398 = vmatpush1.bf16.msra.mxu1 %v7304_v61  ;;  %v4949_v24 = vrot.slane %v7315_v55, 5  ;;  %v6319_v58 = vcombine.high %v4985_v35, %v4988_v63  ;;  %v6318_v54 = vcombine.low %v4985_v35, %v4988_v63 }
 0x2a9   : > { %5275 = vmatpush1.bf16.msra.mxu0 %v7304_v61  ;;  %6383 = vmatprep.subr.bf16.mxu1 %v7309_v17 }
 0x2aa   : > { %5276 = vmatprep.subr.bf16.mxu0 %v7309_v17  ;;  %5278 = vmatprep.mubr.bf16.mxu0 %v6305_v15  ;;  %v4951_v56 = vrot.slane %v4949_v24, 4  ;;  %v4950_v39 = vsel %vm8660_vm8, %v6298_v47, %v4949_v24 }
 0x2ab   : > { %5318 = vmatprep.mubr.bf16.mxu1 %v6313_v53 }
 0x2ac   : > { %6399 = vmatpush1.bf16.msra.mxu1 %v7307_v1  ;;  %v4953_v4 = vsel %vm8660_vm8, %v4951_v56, %v4952_v48 }
 0x2ad   : > { %5277 = vmatpush1.bf16.msra.mxu0 %v7307_v1  ;;  %v6309_v7 = vcombine.high %v4950_v39, %v4953_v4  ;;  %v6308_v59 = vcombine.low %v4950_v39, %v4953_v4 }
 0x2af   : > { %5319 = vmatmul.mubr.bf16.vlgmr.msra.gmra.mrb[32].mxu1 %v6312_v46 }
 0x2b0   : > { %5279 = vmatmul.mubr.bf16.vlgmr.msra.gmra.mrb[0].mxu0 %v6304_v16  ;;  %5328 = vmatprep.mubr.bf16.mxu1 %v6315_v38 }
 0x2b1   : > { %5288 = vmatprep.mubr.bf16.mxu0 %v6307_v6 }
 0x2b7   : > { %5329 = vmatmul.mubr.bf16.gmra.mrb[36].mxu1 %v6314_v62 }
 0x2b8   : > { %5289 = vmatmul.mubr.bf16.gmra.mrb[4].mxu0 %v6306_v40  ;;  %5338 = vmatprep.mubr.bf16.mxu1 %v6317_v23 }
 0x2b9   : > { %5298 = vmatprep.mubr.bf16.mxu0 %v6309_v7 }
 0x2bf   : > { %5339 = vmatmul.mubr.bf16.gmra.mrb[40].mxu1 %v6316_v0 }
 0x2c0   : > { %5299 = vmatmul.mubr.bf16.gmra.mrb[8].mxu0 %v6308_v59  ;;  %5348 = vmatprep.mubr.bf16.mxu1 %v6319_v58 }
 0x2c1   : > { %5308 = vmatprep.mubr.bf16.mxu0 %v6311_v12 }
 0x2c7   : > { %5349 = vmatmul.mubr.bf16.gmra.mrb[44].mxu1 %v6318_v54 }
 0x2c8   : > { %5309 = vmatmul.mubr.bf16.gmra.mrb[12].mxu0 %v6310_v2 }
 0x342   : > { %v9149_v22 = vpop.f32.mrb[0].mxu1 }
 0x343   : > { %v9151_v19 = vpop.f32.mrb[1].mxu1 }
 0x344   : > { %v9153_v32 = vpop.f32.mrb[2].mxu1 }
 0x345   : > { %v9155_v14 = vpop.f32.mrb[3].mxu1 }
 0x34a   : > { %v9157_v50 = vpop.f32.mrb[4].mxu1 }
 0x34b   : > { %v9159_v61 = vpop.f32.mrb[5].mxu1 }
 0x34c   : > { %v9161_v5 = vpop.f32.mrb[6].mxu1 }
 0x34d   : > { %v9163_v37 = vpop.f32.mrb[7].mxu1 }
 0x352   : > { %v9165_v57 = vpop.f32.mrb[8].mxu1 }
 0x353   : > { %v9167_v17 = vpop.f32.mrb[9].mxu1 }
 0x354   : > { %v9169_v8 = vpop.f32.mrb[10].mxu1 }
 0x355   : > { %v9171_v52 = vpop.f32.mrb[11].mxu1 }
 0x35a   : > { %v9173_v3 = vpop.f32.mrb[12].mxu1 }
 0x35b   : > { %v9175_v15 = vpop.f32.mrb[13].mxu1 }
 0x35c   : > { %v9177_v53 = vpop.f32.mrb[14].mxu1 }
 0x35d   : > { %v9179_v1 = vpop.f32.mrb[15].mxu1 }
 0x362   : > { %v2669_v31 = vpop.f32.mrb[16].mxu1 }
 0x363   : > { %v4830_v13 = vpop.f32.mrb[16].mxu0  ;;  %v2671_v27 = vpop.f32.mrb[17].mxu1 }
 0x364   : > { %v6416_v10 = vadd.f32 %v4830_v13, %v2669_v31  ;;  %v4832_v26 = vpop.f32.mrb[17].mxu0  ;;  %v2673_v24 = vpop.f32.mrb[18].mxu1  ;;  %v5566_v13 = vsub.s32 0, %v5565_v34 }
 0x365   : > { %v6418_v55 = vadd.f32 %v4832_v26, %v2671_v27  ;;  %v4834_v21 = vpop.f32.mrb[18].mxu0  ;;  %v2675_v16 = vpop.f32.mrb[19].mxu1  ;;  %v5562_v26 = vld [vmem:[#allocation11] sm:$0x3] }
 0x366   : > { %v6420_v41 = vadd.f32 %v4834_v21, %v2673_v24  ;;  %v4836_v46 = vpop.f32.mrb[19].mxu0  ;;  %v5570_v24 = vsub.s32 1, %v5565_v34  ;;  %v9207_v21 = vrot.slane %v5562_v26, %v5566_v13 }
 0x367   : > { %v9181_v6 = vadd.f32 %v4836_v46, %v2675_v16 }
 0x36a   : > { %v2679_v38 = vpop.f32.mrb[20].mxu1 }
 0x36b   : > { %v4840_v47 = vpop.f32.mrb[20].mxu0  ;;  %v2681_v56 = vpop.f32.mrb[21].mxu1 }
 0x36c   : > { %v9183_v48 = vadd.f32 %v4840_v47, %v2679_v38  ;;  %v4842_v20 = vpop.f32.mrb[21].mxu0  ;;  %v2683_v11 = vpop.f32.mrb[22].mxu1  ;;  %v9209_v38 = vrot.slane %v5562_v26, %v5570_v24 }
 0x36d   : > { %v9185_v60 = vadd.f32 %v4842_v20, %v2681_v56  ;;  %v4844_v39 = vpop.f32.mrb[22].mxu0  ;;  %v2685_v44 = vpop.f32.mrb[23].mxu1 }
 0x36e   : > { %v9187_v9 = vadd.f32 %v4844_v39, %v2683_v11  ;;  %v4846_v4 = vpop.f32.mrb[23].mxu0 }
 0x36f   : > { %v9189_v36 = vadd.f32 %v4846_v4, %v2685_v44 }
 0x372   : > { %v2689_v33 = vpop.f32.mrb[24].mxu1 }
 0x373   : > { %v4850_v28 = vpop.f32.mrb[24].mxu0  ;;  %v2691_v49 = vpop.f32.mrb[25].mxu1 }
 0x374   : > { %v9191_v43 = vadd.f32 %v4850_v28, %v2689_v33  ;;  %v4852_v40 = vpop.f32.mrb[25].mxu0  ;;  %v2693_v7 = vpop.f32.mrb[26].mxu1 }
 0x375   : > { %v9193_v62 = vadd.f32 %v4852_v40, %v2691_v49  ;;  %v4854_v23 = vpop.f32.mrb[26].mxu0  ;;  %v2695_v30 = vpop.f32.mrb[27].mxu1 }
 0x376   : > { %v9195_v18 = vadd.f32 %v4854_v23, %v2693_v7  ;;  %v4856_v51 = vpop.f32.mrb[27].mxu0 }
 0x377   : > { %v9197_v42 = vadd.f32 %v4856_v51, %v2695_v30 }
 0x37a   : > { %v2699_v29 = vpop.f32.mrb[28].mxu1 }
 0x37b   : > { %v4860_v45 = vpop.f32.mrb[28].mxu0  ;;  %v2701_v63 = vpop.f32.mrb[29].mxu1 }
 0x37c   : > { %v9199_v35 = vadd.f32 %v4860_v45, %v2699_v29  ;;  %v4862_v59 = vpop.f32.mrb[29].mxu0  ;;  %v2703_v12 = vpop.f32.mrb[30].mxu1 }
 0x37d   : > { %v9201_v0 = vadd.f32 %v4862_v59, %v2701_v63  ;;  %v4864_v58 = vpop.f32.mrb[30].mxu0  ;;  %v2705_v54 = vpop.f32.mrb[31].mxu1 }
 0x37e   : > { %v9203_v2 = vadd.f32 %v4864_v58, %v2703_v12  ;;  %v4866_v31 = vpop.f32.mrb[31].mxu0 }
 0x37f   : > { %v9205_v27 = vadd.f32 %v4866_v31, %v2705_v54 }
 0x382   : > { %v5320_v46 = vpop.f32.mrb[32].mxu1 }
 0x383   : > { %v5280_v16 = vpop.f32.mrb[0].mxu0  ;;  %v6417_v56 = vadd.f32 %v6416_v10, %v5320_v46  ;;  %v5322_v11 = vpop.f32.mrb[33].mxu1 }
 0x384   : > { %v6400_v47 = vadd.f32 %v5280_v16, %v9149_v22  ;;  %v5282_v20 = vpop.f32.mrb[1].mxu0  ;;  %v6419_v44 = vadd.f32 %v6418_v55, %v5322_v11  ;;  %v5324_v33 = vpop.f32.mrb[34].mxu1 }
 0x385   : > { %v6401_v39 = vadd.f32 %v5282_v20, %v9151_v19  ;;  %v5284_v4 = vpop.f32.mrb[2].mxu0  ;;  %v5590_v49 = vadd.f32 %v6417_v56, %v9207_v21  ;;  %v6421_v7 = vadd.f32 %v6420_v41, %v5324_v33  ;;  %v5326_v30 = vpop.f32.mrb[35].mxu1 }
 0x386   : > { %v5574_v28 = vadd.f32 %v6400_v47, %v9207_v21  ;;  %v6402_v40 = vadd.f32 %v5284_v4, %v9153_v32  ;;  %v5286_v23 = vpop.f32.mrb[3].mxu0  ;;  %v5591_v10 = vadd.f32 %v6419_v44, %v9209_v38  ;;  %v6423_v55 = vadd.f32 %v9181_v6, %v5326_v30 }
 0x387   : > { %v5575_v22 = vadd.f32 %v6401_v39, %v9209_v38  ;;  %v6403_v19 = vadd.f32 %v5286_v23, %v9155_v14  ;;  %v5622_v25 = vmax.f32 %v5590_v49, 0.0  ;;  %v5592_v32 = vadd.f32 %v6421_v7, %v9207_v21 }
 0x388   : > { %v5606_v51 = vmax.f32 %v5574_v28, 0.0  ;;  %v5576_v34 = vadd.f32 %v6402_v40, %v9207_v21  ;;  %v5623_v29 = vmax.f32 %v5591_v10, 0.0  ;;  %v5593_v63 = vadd.f32 %v6423_v55, %v9209_v38 }
 0x389   : > { %v5607_v41 = vmax.f32 %v5575_v22, 0.0  ;;  %v5577_v45 = vadd.f32 %v6403_v19, %v9209_v38  ;;  %5654 = vst [vmem:[%s8293_s17 + $0x80] sm:$0xff] %v5622_v25  ;;  %v5624_v6 = vmax.f32 %v5592_v32, 0.0 }
 0x38a   : > { %5638 = vst [vmem:[%s8293_s17] sm:$0xff] %v5606_v51  ;;  %v5608_v14 = vmax.f32 %v5576_v34, 0.0  ;;  %5655 = vst [vmem:[%s8293_s17 + $0x88] sm:$0xff] %v5623_v29  ;;  %v5625_v12 = vmax.f32 %v5593_v63, 0.0  ;;  %v5330_v54 = vpop.f32.mrb[36].mxu1 }
 0x38b   : > { %5639 = vst [vmem:[%s8293_s17 + $0x8] sm:$0xff] %v5607_v41  ;;  %v5609_v59 = vmax.f32 %v5577_v45, 0.0  ;;  %v5290_v58 = vpop.f32.mrb[4].mxu0  ;;  %5656 = vst [vmem:[%s8293_s17 + $0x90] sm:$0xff] %v5624_v6  ;;  %v6425_v13 = vadd.f32 %v9183_v48, %v5330_v54  ;;  %v5332_v24 = vpop.f32.mrb[37].mxu1 }
 0x38c   : > { %5640 = vst [vmem:[%s8293_s17 + $0x10] sm:$0xff] %v5608_v14  ;;  %v6404_v31 = vadd.f32 %v5290_v58, %v9157_v50  ;;  %v5292_v26 = vpop.f32.mrb[5].mxu0  ;;  %5657 = vst [vmem:[%s8293_s17 + $0x98] sm:$0xff] %v5625_v12  ;;  %v6427_v46 = vadd.f32 %v9185_v60, %v5332_v24  ;;  %v5334_v56 = vpop.f32.mrb[38].mxu1 }
 0x38d   : > { %5641 = vst [vmem:[%s8293_s17 + $0x18] sm:$0xff] %v5609_v59  ;;  %v6405_v16 = vadd.f32 %v5292_v26, %v9159_v61  ;;  %v5294_v47 = vpop.f32.mrb[6].mxu0  ;;  %v5594_v11 = vadd.f32 %v6425_v13, %v9207_v21  ;;  %v6429_v50 = vadd.f32 %v9187_v9, %v5334_v56  ;;  %v5336_v44 = vpop.f32.mrb[39].mxu1 }
 0x38e   : > { %v5578_v20 = vadd.f32 %v6404_v31, %v9207_v21  ;;  %v6406_v39 = vadd.f32 %v5294_v47, %v9161_v5  ;;  %v5296_v48 = vpop.f32.mrb[7].mxu0  ;;  %v5595_v61 = vadd.f32 %v6427_v46, %v9209_v38  ;;  %v6431_v33 = vadd.f32 %v9189_v36, %v5336_v44 }
 0x38f   : > { %v5579_v4 = vadd.f32 %v6405_v16, %v9209_v38  ;;  %v6407_v60 = vadd.f32 %v5296_v48, %v9163_v37  ;;  %v5626_v49 = vmax.f32 %v5594_v11, 0.0  ;;  %v5596_v9 = vadd.f32 %v6429_v50, %v9207_v21 }
 0x390   : > { %v5610_v28 = vmax.f32 %v5578_v20, 0.0  ;;  %v5580_v5 = vadd.f32 %v6406_v39, %v9207_v21  ;;  %v5627_v7 = vmax.f32 %v5595_v61, 0.0  ;;  %v5597_v30 = vadd.f32 %v6431_v33, %v9209_v38 }
 0x391   : > { %v5611_v40 = vmax.f32 %v5579_v4, 0.0  ;;  %v5581_v23 = vadd.f32 %v6407_v60, %v9209_v38  ;;  %5658 = vst [vmem:[%s8293_s17 + $0xa0] sm:$0xff] %v5626_v49  ;;  %v5628_v36 = vmax.f32 %v5596_v9, 0.0 }
 0x392   : > { %5642 = vst [vmem:[%s8293_s17 + $0x20] sm:$0xff] %v5610_v28  ;;  %v5612_v37 = vmax.f32 %v5580_v5, 0.0  ;;  %5659 = vst [vmem:[%s8293_s17 + $0xa8] sm:$0xff] %v5627_v7  ;;  %v5629_v10 = vmax.f32 %v5597_v30, 0.0  ;;  %v5340_v55 = vpop.f32.mrb[40].mxu1 }
 0x393   : > { %5643 = vst [vmem:[%s8293_s17 + $0x28] sm:$0xff] %v5611_v40  ;;  %v5613_v22 = vmax.f32 %v5581_v23, 0.0  ;;  %v5300_v19 = vpop.f32.mrb[8].mxu0  ;;  %5660 = vst [vmem:[%s8293_s17 + $0xb0] sm:$0xff] %v5628_v36  ;;  %v6433_v25 = vadd.f32 %v9191_v43, %v5340_v55  ;;  %v5342_v32 = vpop.f32.mrb[41].mxu1 }
 0x394   : > { %5644 = vst [vmem:[%s8293_s17 + $0x30] sm:$0xff] %v5612_v37  ;;  %v6408_v51 = vadd.f32 %v5300_v19, %v9165_v57  ;;  %v5302_v34 = vpop.f32.mrb[9].mxu0  ;;  %5661 = vst [vmem:[%s8293_s17 + $0xb8] sm:$0xff] %v5629_v10  ;;  %v6435_v29 = vadd.f32 %v9193_v62, %v5342_v32  ;;  %v5344_v63 = vpop.f32.mrb[42].mxu1 }
 0x395   : > { %5645 = vst [vmem:[%s8293_s17 + $0x38] sm:$0xff] %v5613_v22  ;;  %v6409_v41 = vadd.f32 %v5302_v34, %v9167_v17  ;;  %v5304_v45 = vpop.f32.mrb[10].mxu0  ;;  %v5598_v6 = vadd.f32 %v6433_v25, %v9207_v21  ;;  %v6437_v57 = vadd.f32 %v9195_v18, %v5344_v63  ;;  %v5346_v12 = vpop.f32.mrb[43].mxu1 }
 0x396   : > { %v5582_v14 = vadd.f32 %v6408_v51, %v9207_v21  ;;  %v6410_v59 = vadd.f32 %v5304_v45, %v9169_v8  ;;  %v5306_v43 = vpop.f32.mrb[11].mxu0  ;;  %v5599_v17 = vadd.f32 %v6435_v29, %v9209_v38  ;;  %v6439_v54 = vadd.f32 %v9197_v42, %v5346_v12 }
 0x397   : > { %v5583_v58 = vadd.f32 %v6409_v41, %v9209_v38  ;;  %v6411_v62 = vadd.f32 %v5306_v43, %v9171_v52  ;;  %v5630_v13 = vmax.f32 %v5598_v6, 0.0  ;;  %v5600_v18 = vadd.f32 %v6437_v57, %v9207_v21 }
 0x398   : > { %v5614_v31 = vmax.f32 %v5582_v14, 0.0  ;;  %v5584_v8 = vadd.f32 %v6410_v59, %v9207_v21  ;;  %v5631_v24 = vmax.f32 %v5599_v17, 0.0  ;;  %v5601_v46 = vadd.f32 %v6439_v54, %v9209_v38 }
 0x399   : > { %v5615_v26 = vmax.f32 %v5583_v58, 0.0  ;;  %v5585_v16 = vadd.f32 %v6411_v62, %v9209_v38  ;;  %5662 = vst [vmem:[%s8293_s17 + $0xc0] sm:$0xff] %v5630_v13  ;;  %v5632_v42 = vmax.f32 %v5600_v18, 0.0 }
 0x39a   : > { %5646 = vst [vmem:[%s8293_s17 + $0x40] sm:$0xff] %v5614_v31  ;;  %v5616_v52 = vmax.f32 %v5584_v8, 0.0  ;;  %5663 = vst [vmem:[%s8293_s17 + $0xc8] sm:$0xff] %v5631_v24  ;;  %v5633_v56 = vmax.f32 %v5601_v46, 0.0  ;;  %v5350_v11 = vpop.f32.mrb[44].mxu1 }
 0x39b   : > { %5647 = vst [vmem:[%s8293_s17 + $0x48] sm:$0xff] %v5615_v26  ;;  %v5617_v47 = vmax.f32 %v5585_v16, 0.0  ;;  %v5310_v20 = vpop.f32.mrb[12].mxu0  ;;  %5664 = vst [vmem:[%s8293_s17 + $0xd0] sm:$0xff] %v5632_v42  ;;  %v6441_v50 = vadd.f32 %v9199_v35, %v5350_v11  ;;  %v5352_v44 = vpop.f32.mrb[45].mxu1 }
 0x39c   : > { %5648 = vst [vmem:[%s8293_s17 + $0x50] sm:$0xff] %v5616_v52  ;;  %v6412_v39 = vadd.f32 %v5310_v20, %v9173_v3  ;;  %v5312_v48 = vpop.f32.mrb[13].mxu0  ;;  %5665 = vst [vmem:[%s8293_s17 + $0xd8] sm:$0xff] %v5633_v56  ;;  %v6443_v61 = vadd.f32 %v9201_v0, %v5352_v44  ;;  %v5354_v33 = vpop.f32.mrb[46].mxu1 }
 0x39d   : > { %5649 = vst [vmem:[%s8293_s17 + $0x58] sm:$0xff] %v5617_v47  ;;  %v6413_v4 = vadd.f32 %v5312_v48, %v9175_v15  ;;  %v5314_v60 = vpop.f32.mrb[14].mxu0  ;;  %v5602_v3 = vadd.f32 %v6441_v50, %v9207_v21  ;;  %v6445_v49 = vadd.f32 %v9203_v2, %v5354_v33  ;;  %v5356_v9 = vpop.f32.mrb[47].mxu1 }
 0x39e   : > { %v5586_v28 = vadd.f32 %v6412_v39, %v9207_v21  ;;  %v6414_v35 = vadd.f32 %v5314_v60, %v9177_v53  ;;  %v5316_v5 = vpop.f32.mrb[15].mxu0  ;;  %v5603_v15 = vadd.f32 %v6443_v61, %v9209_v38  ;;  %v6447_v7 = vadd.f32 %v9205_v27, %v5356_v9 }
 0x39f   : > { %v5587_v40 = vadd.f32 %v6413_v4, %v9209_v38  ;;  %v6415_v0 = vadd.f32 %v5316_v5, %v9179_v1  ;;  %v5634_v53 = vmax.f32 %v5602_v3, 0.0  ;;  %v5604_v30 = vadd.f32 %v6445_v49, %v9207_v21 }
 0x3a0   : > { %v5618_v23 = vmax.f32 %v5586_v28, 0.0  ;;  %v5588_v2 = vadd.f32 %v6414_v35, %v9207_v21  ;;  %v5635_v36 = vmax.f32 %v5603_v15, 0.0  ;;  %v5605_v27 = vadd.f32 %v6447_v7, %v9209_v38 }
 0x3a1   : > { %v5619_v37 = vmax.f32 %v5587_v40, 0.0  ;;  %v5589_v1 = vadd.f32 %v6415_v0, %v9209_v38  ;;  %5666 = vst [vmem:[%s8293_s17 + $0xe0] sm:$0xff] %v5634_v53  ;;  %v5636_v10 = vmax.f32 %v5604_v30, 0.0 }
 0x3a2   : > { %5650 = vst [vmem:[%s8293_s17 + $0x60] sm:$0xff] %v5618_v23  ;;  %v5620_v22 = vmax.f32 %v5588_v2, 0.0  ;;  %5667 = vst [vmem:[%s8293_s17 + $0xe8] sm:$0xff] %v5635_v36  ;;  %v5637_v19 = vmax.f32 %v5605_v27, 0.0 }
 0x3a3   : > { %5651 = vst [vmem:[%s8293_s17 + $0x68] sm:$0xff] %v5619_v37  ;;  %v5621_v21 = vmax.f32 %v5589_v1, 0.0  ;;  %5668 = vst [vmem:[%s8293_s17 + $0xf0] sm:$0xff] %v5636_v10 }
 0x3a4   : > { %5652 = vst [vmem:[%s8293_s17 + $0x70] sm:$0xff] %v5620_v22  ;;  %5669 = vst [vmem:[%s8293_s17 + $0xf8] sm:$0xff] %v5637_v19 }
 0x3a5   : > { %5653 = vst [vmem:[%s8293_s17 + $0x78] sm:$0xff] %v5621_v21 }
 0x3a6   : > { %7476 = shalt.err (!%p7473_p12)
}
 0x3a7   : > { %s7477_s2 = scalar_lea.hbm %s9307_s10, 4096  ;;  %s7481_s15 = scalar_lea.hbm %s9571_s3, 16384 }
 0x3a8   : > { %p7478_p5 = scmp.ne.s32.totalorder %s9307_s10, %s7477_s2  ;;  %p7482_p11 = scmp.lt.u32.totalorder %s9307_s10, %s9571_s3 }
 0x3a9   : > { %p7483_p10 = scmp.lt.u32.totalorder %s7481_s15, %s7477_s2  ;;  %p7485_p13 = scmp.lt.u32.totalorder %s7477_s2, %s9307_s10 }
 0x3aa   : > { %p7479_p0 = pnand %p7478_p5, %p9572_p7 }
 0x3ab   : > { %p7484_p4 = por %p7483_p10, %p7482_p11 }
 0x3ac   : > { %p7480_p2 = pneg %p7479_p0 }
 0x3ad   : > { %p7486_p8 = por %p7485_p13, %p7484_p4 }
 0x3af   : > { %p7487_p9 = pnand %p7486_p8, %p7480_p2 }
 0x3b1   : > { %7490 = shalt.err (!%p7487_p9)
}
 0x3b2   : > { %s7657_s13 = smov 256   ;;  %s7658_s1 = smov 16  }
 0x3b3   : > { %6670 = dma.vmem_to_hbm [thread:$0]  (%p9572_p7), %s9309_s24, 4096, %s9307_s10, %s9319_s18, %s7657_s13, %s7657_s13, %s7658_s1  }
 0x3b4 PF: > { %s9573_s8 = sld [smem:[#allocation18_spill]]  ;;  %s9574_s14 = sld [smem:[#allocation29_spill]] }
 0x3b5   : > { %p6698_p6 = scmp.ge.s32.totalorder %s7645_s9, 2 }
 0x3ba   : > { %s5702_s22 = sand.u32 1, %s9573_s8   ;;  %p9575_p1 = scmp.ne.s32.totalorder %s9574_s14, 0 }
 0x3bb   : > { %s5703_s30 = scalar_lea.sflag [#allocation5], %s5702_s22 }
 0x3bc   : > { %p6690_p3 = pnand %p6698_p6, %p9575_p1 }
 0x3be   : > { %7576 = dma.done.wait (!%p6690_p3), %s5703_s30, 4096  }
 0x3bf   : > { %7578 = vsyncadd (!%p6690_p3), %s5703_s30, 4294963200  ;;  %s25_s9 = sadd.s32 1, %s7645_s9   ;;  %s9577_s18 = sld [smem:[#allocation19_spill]] }
 0x3c0   : > { %p9348_p12 = scmp.ge.s32.totalorder %s25_s9, 6   ;;  %s9578_s24 = sld [smem:[#allocation21_spill]] }
 0x3c1   : > { %s9579_s22 = sld [smem:[#allocation22_spill]]  ;;  %s9580_s10 = sld [smem:[#allocation23_spill]] }
 0x3c2   : > { %s9581_s12 = sld [smem:[#allocation37_spill]]  ;;  %s9582_s4 = sld [smem:[#allocation38_spill]] }
 0x3c3   : > { %s9583_s6 = sld [smem:[#allocation26_spill]]  ;;  %s9584_s2 = sld [smem:[#allocation31_spill]] }
 0x3c4   : > { %s9585_s8 = sld [smem:[#allocation32_spill]]  ;;  %s9586_s19 = smov %s7589_s20 }
 0x3c5   : > { %s9588_s20 = smov %s7896_s0  ;;  %s9590_s23 = smov %s9614_s5 }
 0x3c6   : > { %s9589_s21 = smov %s9578_s24  ;;  %s9592_s25 = smov %s7613_s26 }
 0x3c7   : > { %s9591_s24 = smov %s9580_s10  ;;  %s9594_s27 = smov %s7621_s28 }
 0x3c8   : > { %s9593_s26 = smov %s9581_s12  ;;  %s9595_s28 = smov %s7625_s29 }
 0x3c9   : > { %s9596_s29 = smov %s9582_s4  ;;  %s9597_s30 = smov %s7637_s7 }
 0x3ca   : > { %s9598_s7 = smov %s9584_s2  ;;  %24 = sbr.rel (!%p9348_p12) target bundleno = 22 (0x16), region = 158 }
 0x3d1   :  { %5708 = vsyncpa [#allocation4], 1 }
 0x3d2   :  { %5710 = vsyncpa [#allocation4 + $0x1], 1 }
 0x3d3   :  { %5711 = vsyncpa [#allocation7], 1 }
 0x3d4   :  { %5713 = vsyncpa [#allocation7 + $0x1], 1 }
 0x3d5   :  { %5714 = vsyncpa [#allocation10], 1 }
 0x3d6   :  { %5715 = vsyncpa [#allocation5], 1 }
 0x3d7   :  { %5717 = vsyncpa [#allocation5 + $0x1], 1 }

</bundles_post_ra>
